<compile_context>
chip_gen: v7x
topology: tpu7x:2x2x1
jax: 0.10.0
libtpu: 0.0.40
codegen_flags: <defaults>
</compile_context>

<pallas_src>
import jax
import jax.numpy as jnp
from jax.experimental import pallas as pl
from jax.experimental.pallas import tpu as pltpu

EPS = 1e-3  # matches BatchNorm2d(..., eps=0.001) in the source module


def conv_bn_kernel(w_ref, x_ref, gamma_ref, beta_ref, o_ref):
    # w_ref:      [blk_cout, Cin]   (one Cout block of the 1x1-conv weight)
    # x_ref:      [Cin, M]          (same block every grid step -> stays resident)
    # gamma/beta: [blk_cout, 1]
    # o_ref:      [blk_cout, M]     (doubles as the matmul accumulator / BN workspace)
    o_ref[...] = jnp.dot(w_ref[...], x_ref[...], preferred_element_type=jnp.float32)
    y = o_ref[...]

    m = y.shape[1]
    inv_m = 1.0 / m
    s = jnp.sum(y, axis=1, keepdims=True)          # [blk, 1]
    ss = jnp.sum(y * y, axis=1, keepdims=True)     # [blk, 1]
    mean = s * inv_m
    # Single-pass biased variance; fine in f32 for conv outputs of ~unit scale.
    # (Switch to the centered two-pass form if activations carry a huge DC offset.)
    var = ss * inv_m - mean * mean

    scale = gamma_ref[...] * jax.lax.rsqrt(var + EPS)
    shift = beta_ref[...] - mean * scale
    o_ref[...] = y * scale + shift                 # single fused scale/shift epilogue


def conv2d_1x1_batchnorm(x_nchw, weight_oi, gamma, beta, *, blk_cout=672,
                         input_dtype=jnp.float32):
    """x_nchw: [1, Cin, H, W]; weight_oi: [Cout, Cin]; gamma/beta: [Cout]."""
    n, cin, h, w = x_nchw.shape
    # N == 1 (as in the spec module): NCHW -> [Cin, M] is a pure reshape (no copy).
    assert n == 1, "kernel is specialized for batch size 1 (matches the module)"
    cout = weight_oi.shape[0]
    m = h * w
    assert cout % blk_cout == 0 and blk_cout % 8 == 0

    x2d = x_nchw.reshape(cin, m).astype(input_dtype)      # no transpose
    w2d = weight_oi.astype(input_dtype)
    g2d = gamma.reshape(cout, 1).astype(jnp.float32)
    b2d = beta.reshape(cout, 1).astype(jnp.float32)

    in_bytes = jnp.dtype(input_dtype).itemsize
    cost = pl.CostEstimate(
        flops=2 * m * cin * cout,
        transcendentals=cout,
        bytes_accessed=in_bytes * (cin * m + cout * cin) + 4 * (cout * m + 2 * cout),
    )

    out2d = pl.pallas_call(
        conv_bn_kernel,
        out_shape=jax.ShapeDtypeStruct((cout, m), jnp.float32),
        grid_spec=pltpu.PrefetchScalarGridSpec(
            num_scalar_prefetch=0,
            grid=(cout // blk_cout,),                              # 2 steps at blk=672
            in_specs=[
                pl.BlockSpec((blk_cout, cin), lambda i: (i, 0)),   # weight: tiled over Cout
                pl.BlockSpec((cin, m), lambda i: (0, 0)),          # X: resident across steps
                pl.BlockSpec((blk_cout, 1), lambda i: (i, 0)),     # gamma
                pl.BlockSpec((blk_cout, 1), lambda i: (i, 0)),     # beta
            ],
            out_specs=pl.BlockSpec((blk_cout, m), lambda i: (i, 0)),
        ),
        compiler_params=pltpu.CompilerParams(
            # Cout blocks are independent -> one block per TensorCore on v7x megacore;
            # on single-TC chips this still pipelines store(i-1) / weight-DMA(i+1).
            dimension_semantics=("parallel",),
        ),
        cost_estimate=cost,
    )(w2d, x2d, g2d, b2d)

    # [Cout, M] -> [1, Cout, H, W]: pure reshape, no transpose.
    return out2d.reshape(n, cout, h, w)


def reference(x_nchw, weight_oi, gamma, beta):
    # Pure-JAX reference: 1x1 conv (matmul) + training-mode BN (batch stats, biased var).
    n, cin, h, w = x_nchw.shape
    cout = weight_oi.shape[0]
    x2d = jnp.transpose(x_nchw, (0, 2, 3, 1)).reshape(-1, cin)
    y = x2d @ weight_oi.T
    mean = jnp.mean(y, axis=0, keepdims=True)
    var = jnp.mean((y - mean) ** 2, axis=0, keepdims=True)
    yn = (y - mean) / jnp.sqrt(var + EPS) * gamma[None, :] + beta[None, :]
    return jnp.transpose(yn.reshape(n, h, w, cout), (0, 3, 1, 2))


if __name__ == "__main__":
    key = jax.random.PRNGKey(0)
    k_x, k_w = jax.random.split(key)

    # Shapes from the PyTorch module: Conv2d(224 -> 1344, 1x1), input [1, 224, 14, 14].
    N, CIN, H, W = 1, 224, 14, 14
    COUT = 1344

    x = jax.random.normal(k_x, (N, CIN, H, W), dtype=jnp.float32)
    # Conv2d weight [Cout, Cin, 1, 1] (kaiming-uniform-ish bound), squeezed to [Cout, Cin].
    bound = 1.0 / (CIN ** 0.5)
    weight = jax.random.uniform(
        k_w, (COUT, CIN), dtype=jnp.float32, minval=-bound, maxval=bound
    )
    # BatchNorm2d default init: gamma=1, beta=0.
    gamma = jnp.ones((COUT,), dtype=jnp.float32)
    beta = jnp.zeros((COUT,), dtype=jnp.float32)

    # TODO(synk): BatchNorm2d running_mean/running_var momentum update is a training
    # side effect not reflected in the returned tensor; only the forward output is computed.
    out = conv2d_1x1_batchnorm(x, weight, gamma, beta)
    out = jax.block_until_ready(out)

    ref = reference(x, weight, gamma, beta)
    assert out.shape == (N, COUT, H, W), out.shape
    assert jnp.allclose(out, ref, atol=1e-3, rtol=1e-3), "mismatch vs reference"

    print("KERNEL_OK")
</pallas_src>

<mosaic_0001>
module attributes {stable_mosaic.version = 11 : i64} {
  func.func @conv_bn_kernel(%arg0: i32, %arg1: memref<672x224xf32, #tpu.memory_space<vmem>>, %arg2: memref<224x196xf32, #tpu.memory_space<vmem>>, %arg3: memref<672x1xf32, #tpu.memory_space<vmem>>, %arg4: memref<672x1xf32, #tpu.memory_space<vmem>>, %arg5: memref<672x196xf32, #tpu.memory_space<vmem>>) attributes {dimension_semantics = [#tpu.dimension_semantics<parallel>], iteration_bounds = array<i64: 2>, scalar_prefetch = 0 : i64, scratch_operands = 0 : i64, tpu.core_type = #tpu.core_type<tc>, window_params = [{transform_indices = @transform_0, window_bounds = array<i64: 672, 224>}, {pipeline_mode = #tpu.pipeline_mode<synchronous>, transform_indices = @transform_1, window_bounds = array<i64: 224, 196>}, {transform_indices = @transform_2, window_bounds = array<i64: 672, 1>}, {transform_indices = @transform_3, window_bounds = array<i64: 672, 1>}, {transform_indices = @transform_4, window_bounds = array<i64: 672, 196>}]} {
    %c0 = arith.constant 0 : index
    %c0_0 = arith.constant 0 : index
    %0 = vector.load %arg1[%c0, %c0_0] : memref<672x224xf32, #tpu.memory_space<vmem>>, vector<672x224xf32>
    %c0_1 = arith.constant 0 : index
    %c0_2 = arith.constant 0 : index
    %1 = vector.load %arg2[%c0_1, %c0_2] : memref<224x196xf32, #tpu.memory_space<vmem>>, vector<224x196xf32>
    %cst = arith.constant dense<0.000000e+00> : vector<672x196xf32>
    %2 = tpu.matmul %0, %1, %cst {dimension_numbers = #tpu.dot_dimension_numbers<[1], [0], [0], [1], [0, 0, 1, 1], [], []>} : vector<672x224xf32>, vector<224x196xf32>, vector<672x196xf32> -> vector<672x196xf32>
    %c0_3 = arith.constant 0 : index
    %c0_4 = arith.constant 0 : index
    %3 = vector.load %arg5[%c0_3, %c0_4] : memref<672x196xf32, #tpu.memory_space<vmem>>, vector<672x196xf32>
    tpu.vector_store %arg5[%c0_3, %c0_4], %2 {strides = array<i32>} : memref<672x196xf32, #tpu.memory_space<vmem>>, vector<672x196xf32>,
    %c0_5 = arith.constant 0 : index
    %c0_6 = arith.constant 0 : index
    %4 = vector.load %arg5[%c0_5, %c0_6] : memref<672x196xf32, #tpu.memory_space<vmem>>, vector<672x196xf32>
    %cst_7 = arith.constant dense<0.000000e+00> : vector<672xf32>
    %5 = vector.multi_reduction <add>, %4, %cst_7 [1] : vector<672x196xf32> to vector<672xf32>
    %6 = vector.shape_cast %5 : vector<672xf32> to vector<672x1xf32>
    %7 = arith.mulf %4, %4 : vector<672x196xf32>
    %cst_8 = arith.constant dense<0.000000e+00> : vector<672xf32>
    %8 = vector.multi_reduction <add>, %7, %cst_8 [1] : vector<672x196xf32> to vector<672xf32>
    %9 = vector.shape_cast %8 : vector<672xf32> to vector<672x1xf32>
    %cst_9 = arith.constant 0.00510204071 : f32
    %10 = vector.broadcast %cst_9 : f32 to vector<672x1xf32>
    %11 = arith.mulf %6, %10 : vector<672x1xf32>
    %cst_10 = arith.constant 0.00510204071 : f32
    %12 = vector.broadcast %cst_10 : f32 to vector<672x1xf32>
    %13 = arith.mulf %9, %12 : vector<672x1xf32>
    %14 = arith.mulf %11, %11 : vector<672x1xf32>
    %15 = arith.subf %13, %14 : vector<672x1xf32>
    %c0_11 = arith.constant 0 : index
    %c0_12 = arith.constant 0 : index
    %16 = vector.load %arg3[%c0_11, %c0_12] : memref<672x1xf32, #tpu.memory_space<vmem>>, vector<672x1xf32>
    %cst_13 = arith.constant 1.000000e-03 : f32
    %17 = vector.broadcast %cst_13 : f32 to vector<672x1xf32>
    %18 = arith.addf %15, %17 : vector<672x1xf32>
    %19 = math.rsqrt %18 : vector<672x1xf32>
    %20 = arith.mulf %16, %19 : vector<672x1xf32>
    %c0_14 = arith.constant 0 : index
    %c0_15 = arith.constant 0 : index
    %21 = vector.load %arg4[%c0_14, %c0_15] : memref<672x1xf32, #tpu.memory_space<vmem>>, vector<672x1xf32>
    %22 = arith.mulf %11, %20 : vector<672x1xf32>
    %23 = arith.subf %21, %22 : vector<672x1xf32>
    %24 = vector.broadcast %20 : vector<672x1xf32> to vector<672x196xf32>
    %25 = arith.mulf %4, %24 : vector<672x196xf32>
    %26 = vector.broadcast %23 : vector<672x1xf32> to vector<672x196xf32>
    %27 = arith.addf %25, %26 : vector<672x196xf32>
    %c0_16 = arith.constant 0 : index
    %c0_17 = arith.constant 0 : index
    %28 = vector.load %arg5[%c0_16, %c0_17] : memref<672x196xf32, #tpu.memory_space<vmem>>, vector<672x196xf32>
    tpu.vector_store %arg5[%c0_16, %c0_17], %27 {strides = array<i32>} : memref<672x196xf32, #tpu.memory_space<vmem>>, vector<672x196xf32>,
    return
  }
  func.func @transform_0(%arg0: i32) -> (i32, i32) {
    %c0_i32 = arith.constant 0 : i32
    %c0_i32_0 = arith.constant 0 : i32
    return %arg0, %c0_i32 : i32, i32
  }
  func.func @transform_1(%arg0: i32) -> (i32, i32) {
    %c0_i32 = arith.constant 0 : i32
    %c0_i32_0 = arith.constant 0 : i32
    %c0_i32_1 = arith.constant 0 : i32
    return %c0_i32, %c0_i32_0 : i32, i32
  }
  func.func @transform_2(%arg0: i32) -> (i32, i32) {
    %c0_i32 = arith.constant 0 : i32
    %c0_i32_0 = arith.constant 0 : i32
    return %arg0, %c0_i32 : i32, i32
  }
  func.func @transform_3(%arg0: i32) -> (i32, i32) {
    %c0_i32 = arith.constant 0 : i32
    %c0_i32_0 = arith.constant 0 : i32
    return %arg0, %c0_i32 : i32, i32
  }
  func.func @transform_4(%arg0: i32) -> (i32, i32) {
    %c0_i32 = arith.constant 0 : i32
    %c0_i32_0 = arith.constant 0 : i32
    return %arg0, %c0_i32 : i32, i32
  }
}

</mosaic_0001>

<bundles_post_ra>
// kernel: tpu_custom_call.1
= control target key start
LH: loop header
LB: loop body
LE: loop exit
PB: predicated region body
PF: predicated region fallthrough
CT: control target
= control target key end

     0   :  { %s5303_s15 = smov 0   ;;  %s8610_s0 = inlined_call_operand.vmem [shape: f32[1344,224], index: 0, kind: input, shape index: {}]   ;;  %s8611_s1 = inlined_call_operand.vmem [shape: f32[224,196], index: 1, kind: input, shape index: {}]   ;;  %s8612_s2 = inlined_call_operand.vmem [shape: f32[1344,1], index: 2, kind: input, shape index: {}]   ;;  %s8613_s3 = inlined_call_operand.vmem [shape: f32[1344,1], index: 3, kind: input, shape index: {}]   ;;  %s8614_s4 = inlined_call_operand.vmem [shape: f32[1344,196], index: 4, kind: output, shape index: {}]  }
   0x1 LB: > { %s4823_s16 = sadd.s32 4294967295, %s5275_s15   ;;  %p4827_p0 = scmp.ge.s32.totalorder %s5275_s15, 1  ;;  %s5275_s15 = sphi %s5303_s15, %s14_s15  }
   0x2   : > { %p186_p1 = scmp.lt.s32.totalorder %s5275_s15, 3 }
   0x4   : > { %p187_p2 = pnand %p4827_p0, %p186_p1 }
   0x6   : > { %190 = sbr.rel (%p187_p2) target bundleno = 1170 (0x492), region = 36 }
   0xd   : > { %v419_v0 = vld [vmem:[%s8611_s1 + $0x8] sm:$0xff]  ;;  %v421_v1 = vld [vmem:[%s8611_s1 + $0x18] sm:$0xff]  ;;  %v418_v2 = vld [vmem:[%s8611_s1] sm:$0xff]  ;;  %s224_s23 = smul.u32 84, %s4823_s16  ;;  %vm474_vm0 = vcmask 785408   ;;  %vm1297_vm1 = vcmask 556032  }
   0xe   : > { %v4922_v3 = vpack.c.bf16 %v421_v1, %v419_v0  ;;  %v420_v4 = vld [vmem:[%s8611_s1 + $0x10] sm:$0xff]  ;;  %v423_v5 = vld [vmem:[%s8611_s1 + $0x28] sm:$0xff]  ;;  %v425_v6 = vld [vmem:[%s8611_s1 + $0x38] sm:$0xff] }
   0xf   : > { %v4924_v7 = vpack.c.bf16 %v420_v4, %v418_v2  ;;  %v4926_v8 = vpack.c.bf16 %v425_v6, %v423_v5  ;;  %v422_v9 = vld [vmem:[%s8611_s1 + $0x20] sm:$0xff]  ;;  %v424_v10 = vld [vmem:[%s8611_s1 + $0x30] sm:$0xff]  ;;  %v427_v11 = vld [vmem:[%s8611_s1 + $0x48] sm:$0xff]  ;;  %p225_p3 = scmp.lt.s32.totalorder %s224_s23, 167 }
  0x10   : > { %4923 = vmatprep.subr.bf16.mxu0 %v4922_v3  ;;  %4978 = vmatprep.subr.bf16.mxu1 %v4922_v3  ;;  %v429_v12 = vld [vmem:[%s8611_s1 + $0x58] sm:$0xff]  ;;  %v4928_v13 = vpack.c.bf16 %v424_v10, %v422_v9  ;;  %v426_v15 = vld [vmem:[%s8611_s1 + $0x40] sm:$0xff]  ;;  %v428_v16 = vld [vmem:[%s8611_s1 + $0x50] sm:$0xff] }
  0x11   : > { %4925 = vmatpush1.bf16.msra.mxu0 %v4924_v7  ;;  %4992 = vmatpush1.bf16.msra.mxu1 %v4924_v7  ;;  %v4930_v14 = vpack.c.bf16 %v429_v12, %v427_v11  ;;  %v431_v17 = vld [vmem:[%s8611_s1 + $0x68] sm:$0xff]  ;;  %v433_v18 = vld [vmem:[%s8611_s1 + $0x78] sm:$0xff]  ;;  %v4932_v19 = vpack.c.bf16 %v428_v16, %v426_v15  ;;  %s9279_s23 = smov (!%p225_p3, %s224_s23), 167  ;;  %v430_v21 = vld [vmem:[%s8611_s1 + $0x60] sm:$0xff] }
  0x12   : > { %4927 = vmatprep.subr.bf16.mxu0 %v4926_v8  ;;  %4979 = vmatprep.subr.bf16.mxu1 %v4926_v8  ;;  %v4934_v20 = vpack.c.bf16 %v433_v18, %v431_v17  ;;  %v432_v22 = vld [vmem:[%s8611_s1 + $0x70] sm:$0xff]  ;;  %v435_v23 = vld [vmem:[%s8611_s1 + $0x88] sm:$0xff]  ;;  %v437_v24 = vld [vmem:[%s8611_s1 + $0x98] sm:$0xff]  ;;  %s4920_s30 = sshll.u32 %s9279_s23, 4 }
  0x13   : > { %v4936_v25 = vpack.c.bf16 %v432_v22, %v430_v21  ;;  %v4938_v26 = vpack.c.bf16 %v437_v24, %v435_v23  ;;  %v434_v27 = vld [vmem:[%s8611_s1 + $0x80] sm:$0xff]  ;;  %v436_v28 = vld [vmem:[%s8611_s1 + $0x90] sm:$0xff]  ;;  %v439_v29 = vld [vmem:[%s8611_s1 + $0xa8] sm:$0xff]  ;;  %s5385_s16 = scalar_lea.vmem %s8610_s0, %s4920_s30  ;;  %s5740_s21 = scalar_lea.vmem %s8614_s4, %s4920_s30 }
  0x14   : > { %v441_v30 = vld [vmem:[%s8611_s1 + $0xb8] sm:$0xff]  ;;  %v4940_v31 = vpack.c.bf16 %v436_v28, %v434_v27  ;;  %v438_v33 = vld [vmem:[%s8611_s1 + $0xa0] sm:$0xff]  ;;  %v440_v34 = vld [vmem:[%s8611_s1 + $0xb0] sm:$0xff]  ;;  %s4830_s30 = sshll.u32 %s9279_s23, 3 }
  0x15   : > { %4929 = vmatpush1.bf16.msra.mxu0 %v4928_v13  ;;  %4993 = vmatpush1.bf16.msra.mxu1 %v4928_v13  ;;  %v4942_v32 = vpack.c.bf16 %v441_v30, %v439_v29  ;;  %v443_v35 = vld [vmem:[%s8611_s1 + $0xc8] sm:$0xff]  ;;  %v445_v36 = vld [vmem:[%s8611_s1 + $0xd8] sm:$0xff]  ;;  %v4944_v39 = vpack.c.bf16 %v440_v34, %v438_v33  ;;  %v442_v41 = vld [vmem:[%s8611_s1 + $0xc0] sm:$0xff]  ;;  %s6367_s24 = scalar_lea.vmem %s8612_s2, %s4830_s30  ;;  %s7029_s27 = scalar_lea.vmem %s8613_s3, %s4830_s30 }
  0x16   : > { %4931 = vmatprep.subr.bf16.mxu0 %v4930_v14  ;;  %4980 = vmatprep.subr.bf16.mxu1 %v4930_v14  ;;  %v251_v37 = vld [vmem:[%s5385_s16 + $0x8] sm:$0xff]  ;;  %v4946_v40 = vpack.c.bf16 %v445_v36, %v443_v35  ;;  %v444_v42 = vld [vmem:[%s8611_s1 + $0xd0] sm:$0xff]  ;;  %v449_v44 = vld [vmem:[%s8611_s1 + $0xf8] sm:$0xff] }
  0x17   : > { %4834 = vmatprep.mubr.msk.f32.mxu0 %vm474_vm0, %v251_v37  ;;  %v335_v38 = vld [vmem:[%s5385_s16 + $0x2a8] sm:$0xff]  ;;  %v4948_v45 = vpack.c.bf16 %v444_v42, %v442_v41  ;;  %v446_v47 = vld [vmem:[%s8611_s1 + $0xe0] sm:$0xff]  ;;  %v448_v48 = vld [vmem:[%s8611_s1 + $0xf0] sm:$0xff] }
  0x18   : > { %v447_v43 = vld [vmem:[%s8611_s1 + $0xe8] sm:$0xff]  ;;  %4876 = vmatprep.mubr.msk.f32.mxu1 %vm474_vm0, %v335_v38  ;;  %v453_v50 = vld [vmem:[%s8611_s1 + $0x118] sm:$0xff]  ;;  %v4952_v51 = vpack.c.bf16 %v448_v48, %v446_v47  ;;  %v450_v53 = vld [vmem:[%s8611_s1 + $0x100] sm:$0xff] }
  0x19   : > { %4933 = vmatpush1.bf16.msra.mxu0 %v4932_v19  ;;  %4994 = vmatpush1.bf16.msra.mxu1 %v4932_v19  ;;  %v4950_v46 = vpack.c.bf16 %v449_v44, %v447_v43  ;;  %v451_v49 = vld [vmem:[%s8611_s1 + $0x108] sm:$0xff]  ;;  %v452_v54 = vld [vmem:[%s8611_s1 + $0x110] sm:$0xff]  ;;  %v457_v56 = vld [vmem:[%s8611_s1 + $0x138] sm:$0xff] }
  0x1a   : > { %4935 = vmatprep.subr.bf16.mxu0 %v4934_v20  ;;  %4981 = vmatprep.subr.bf16.mxu1 %v4934_v20  ;;  %v4954_v52 = vpack.c.bf16 %v453_v50, %v451_v49  ;;  %v455_v55 = vld [vmem:[%s8611_s1 + $0x128] sm:$0xff]  ;;  %v4956_v57 = vpack.c.bf16 %v452_v54, %v450_v53  ;;  %v454_v59 = vld [vmem:[%s8611_s1 + $0x120] sm:$0xff]  ;;  %v456_v60 = vld [vmem:[%s8611_s1 + $0x130] sm:$0xff] }
  0x1b   : > { %v4958_v58 = vpack.c.bf16 %v457_v56, %v455_v55  ;;  %v459_v61 = vld [vmem:[%s8611_s1 + $0x148] sm:$0xff]  ;;  %v461_v62 = vld [vmem:[%s8611_s1 + $0x158] sm:$0xff]  ;;  %v4960_v63 = vpack.c.bf16 %v456_v60, %v454_v59  ;;  %v458_v1 = vld [vmem:[%s8611_s1 + $0x140] sm:$0xff] }
  0x1c   : > { %v4962_v0 = vpack.c.bf16 %v461_v62, %v459_v61  ;;  %v460_v2 = vld [vmem:[%s8611_s1 + $0x150] sm:$0xff]  ;;  %v463_v3 = vld [vmem:[%s8611_s1 + $0x168] sm:$0xff]  ;;  %v465_v4 = vld [vmem:[%s8611_s1 + $0x178] sm:$0xff] }
  0x1d   : > { %4937 = vmatpush1.bf16.msra.mxu0 %v4936_v25  ;;  %4995 = vmatpush1.bf16.msra.mxu1 %v4936_v25  ;;  %v4964_v5 = vpack.c.bf16 %v460_v2, %v458_v1  ;;  %v4966_v6 = vpack.c.bf16 %v465_v4, %v463_v3  ;;  %v462_v7 = vld [vmem:[%s8611_s1 + $0x160] sm:$0xff]  ;;  %v464_v8 = vld [vmem:[%s8611_s1 + $0x170] sm:$0xff]  ;;  %v467_v9 = vld [vmem:[%s8611_s1 + $0x188] sm:$0xff] }
  0x1e   : > { %4939 = vmatprep.subr.bf16.mxu0 %v4938_v26  ;;  %4982 = vmatprep.subr.bf16.mxu1 %v4938_v26  ;;  %v469_v10 = vld [vmem:[%s8611_s1 + $0x198] sm:$0xff]  ;;  %v4968_v11 = vpack.c.bf16 %v464_v8, %v462_v7  ;;  %v466_v13 = vld [vmem:[%s8611_s1 + $0x180] sm:$0xff]  ;;  %v468_v14 = vld [vmem:[%s8611_s1 + $0x190] sm:$0xff] }
  0x1f   : > { %v4970_v12 = vpack.c.bf16 %v469_v10, %v467_v9  ;;  %v471_v15 = vld [vmem:[%s8611_s1 + $0x1a8] sm:$0xff]  ;;  %v473_v16 = vld [vmem:[%s8611_s1 + $0x1b8] sm:$0xff]  ;;  %v4972_v17 = vpack.c.bf16 %v468_v14, %v466_v13  ;;  %v470_v19 = vld [vmem:[%s8611_s1 + $0x1a0] sm:$0xff] }
  0x20   : > { %v4974_v18 = vpack.c.bf16 %v473_v16, %v471_v15  ;;  %v472_v20 = vld [vmem:[%s8611_s1 + $0x1b0] sm:$0xff]  ;;  %v250_v22 = vld [vmem:[%s5385_s16] sm:$0xff]  ;;  %v253_v24 = vld [vmem:[%s5385_s16 + $0x18] sm:$0xff] }
  0x21   : > { %4941 = vmatpush1.bf16.msra.mxu0 %v4940_v31  ;;  %4996 = vmatpush1.bf16.msra.mxu1 %v4940_v31  ;;  %v4976_v21 = vpack.c.bf16 %v472_v20, %v470_v19  ;;  %v334_v23 = vld [vmem:[%s5385_s16 + $0x2a0] sm:$0xff]  ;;  %v337_v25 = vld [vmem:[%s5385_s16 + $0x2b8] sm:$0xff]  ;;  %v252_v26 = vld [vmem:[%s5385_s16 + $0x10] sm:$0xff] }
  0x22   : > { %4943 = vmatprep.subr.bf16.mxu0 %v4942_v32  ;;  %4983 = vmatprep.subr.bf16.mxu1 %v4942_v32  ;;  %v336_v27 = vld [vmem:[%s5385_s16 + $0x2b0] sm:$0xff]  ;;  %v255_v28 = vld [vmem:[%s5385_s16 + $0x28] sm:$0xff]  ;;  %v254_v30 = vld [vmem:[%s5385_s16 + $0x20] sm:$0xff] }
  0x23   : > { %v339_v29 = vld [vmem:[%s5385_s16 + $0x2c8] sm:$0xff]  ;;  %v338_v31 = vld [vmem:[%s5385_s16 + $0x2c0] sm:$0xff]  ;;  %v257_v32 = vld [vmem:[%s5385_s16 + $0x38] sm:$0xff] }
  0x24   : > { %v341_v33 = vld [vmem:[%s5385_s16 + $0x2d8] sm:$0xff]  ;;  %v256_v34 = vld [vmem:[%s5385_s16 + $0x30] sm:$0xff]  ;;  %v259_v36 = vld [vmem:[%s5385_s16 + $0x48] sm:$0xff] }
  0x25   : > { %4945 = vmatpush1.bf16.msra.mxu0 %v4944_v39  ;;  %4997 = vmatpush1.bf16.msra.mxu1 %v4944_v39  ;;  %v340_v35 = vld [vmem:[%s5385_s16 + $0x2d0] sm:$0xff]  ;;  %v343_v37 = vld [vmem:[%s5385_s16 + $0x2e8] sm:$0xff]  ;;  %v258_v38 = vld [vmem:[%s5385_s16 + $0x40] sm:$0xff] }
  0x26   : > { %4947 = vmatprep.subr.bf16.mxu0 %v4946_v40  ;;  %4984 = vmatprep.subr.bf16.mxu1 %v4946_v40  ;;  %v342_v39 = vld [vmem:[%s5385_s16 + $0x2e0] sm:$0xff]  ;;  %v261_v40 = vld [vmem:[%s5385_s16 + $0x58] sm:$0xff]  ;;  %v260_v42 = vld [vmem:[%s5385_s16 + $0x50] sm:$0xff] }
  0x27   : > { %v345_v41 = vld [vmem:[%s5385_s16 + $0x2f8] sm:$0xff]  ;;  %v344_v43 = vld [vmem:[%s5385_s16 + $0x2f0] sm:$0xff]  ;;  %v263_v44 = vld [vmem:[%s5385_s16 + $0x68] sm:$0xff] }
  0x28   : > { %v346_v47 = vld [vmem:[%s5385_s16 + $0x300] sm:$0xff]  ;;  %v265_v48 = vld [vmem:[%s5385_s16 + $0x78] sm:$0xff]  ;;  %v264_v50 = vld [vmem:[%s5385_s16 + $0x70] sm:$0xff] }
  0x29   : > { %4949 = vmatpush1.bf16.msra.mxu0 %v4948_v45  ;;  %4998 = vmatpush1.bf16.msra.mxu1 %v4948_v45  ;;  %v347_v45 = vld [vmem:[%s5385_s16 + $0x308] sm:$0xff]  ;;  %v349_v49 = vld [vmem:[%s5385_s16 + $0x318] sm:$0xff]  ;;  %v266_v54 = vld [vmem:[%s5385_s16 + $0x80] sm:$0xff] }
  0x2a   : > { %4951 = vmatprep.subr.bf16.mxu0 %v4950_v46  ;;  %4985 = vmatprep.subr.bf16.mxu1 %v4950_v46  ;;  %v262_v46 = vld [vmem:[%s5385_s16 + $0x60] sm:$0xff]  ;;  %v351_v53 = vld [vmem:[%s5385_s16 + $0x328] sm:$0xff]  ;;  %v269_v56 = vld [vmem:[%s5385_s16 + $0x98] sm:$0xff] }
  0x2b   : > { %v350_v55 = vld [vmem:[%s5385_s16 + $0x320] sm:$0xff]  ;;  %v352_v59 = vld [vmem:[%s5385_s16 + $0x330] sm:$0xff]  ;;  %v271_v60 = vld [vmem:[%s5385_s16 + $0xa8] sm:$0xff] }
  0x2c   : > { %v355_v61 = vld [vmem:[%s5385_s16 + $0x348] sm:$0xff]  ;;  %v270_v62 = vld [vmem:[%s5385_s16 + $0xa0] sm:$0xff]  ;;  %v357_v1 = vld [vmem:[%s5385_s16 + $0x358] sm:$0xff] }
  0x2d   : > { %4953 = vmatpush1.bf16.msra.mxu0 %v4952_v51  ;;  %4999 = vmatpush1.bf16.msra.mxu1 %v4952_v51  ;;  %v348_v51 = vld [vmem:[%s5385_s16 + $0x310] sm:$0xff]  ;;  %v275_v4 = vld [vmem:[%s5385_s16 + $0xc8] sm:$0xff]  ;;  %v358_v7 = vld [vmem:[%s5385_s16 + $0x360] sm:$0xff] }
  0x2e   : > { %4955 = vmatprep.subr.bf16.mxu0 %v4954_v52  ;;  %4986 = vmatprep.subr.bf16.mxu1 %v4954_v52  ;;  %v267_v52 = vld [vmem:[%s5385_s16 + $0x88] sm:$0xff]  ;;  %v272_v2 = vld [vmem:[%s5385_s16 + $0xb0] sm:$0xff]  ;;  %v277_v8 = vld [vmem:[%s5385_s16 + $0xd8] sm:$0xff] }
  0x2f   : > { %v356_v3 = vld [vmem:[%s5385_s16 + $0x350] sm:$0xff]  ;;  %v361_v9 = vld [vmem:[%s5385_s16 + $0x378] sm:$0xff]  ;;  %v363_v13 = vld [vmem:[%s5385_s16 + $0x388] sm:$0xff] }
  0x30   : > { %v276_v10 = vld [vmem:[%s5385_s16 + $0xd0] sm:$0xff]  ;;  %v278_v14 = vld [vmem:[%s5385_s16 + $0xe0] sm:$0xff]  ;;  %v281_v16 = vld [vmem:[%s5385_s16 + $0xf8] sm:$0xff] }
  0x31   : > { %4957 = vmatpush1.bf16.msra.mxu0 %v4956_v57  ;;  %5000 = vmatpush1.bf16.msra.mxu1 %v4956_v57  ;;  %v353_v57 = vld [vmem:[%s5385_s16 + $0x338] sm:$0xff]  ;;  %v362_v15 = vld [vmem:[%s5385_s16 + $0x380] sm:$0xff]  ;;  %v364_v19 = vld [vmem:[%s5385_s16 + $0x390] sm:$0xff] }
  0x32   : > { %4959 = vmatprep.subr.bf16.mxu0 %v4958_v58  ;;  %4987 = vmatprep.subr.bf16.mxu1 %v4958_v58  ;;  %v268_v58 = vld [vmem:[%s5385_s16 + $0x90] sm:$0xff]  ;;  %v283_v20 = vld [vmem:[%s5385_s16 + $0x108] sm:$0xff] }
  0x35   : > { %4961 = vmatpush1.bf16.msra.mxu0 %v4960_v63  ;;  %5001 = vmatpush1.bf16.msra.mxu1 %v4960_v63  ;;  %v354_v63 = vld [vmem:[%s5385_s16 + $0x340] sm:$0xff] }
  0x36   : > { %4963 = vmatprep.subr.bf16.mxu0 %v4962_v0  ;;  %4988 = vmatprep.subr.bf16.mxu1 %v4962_v0  ;;  %v273_v0 = vld [vmem:[%s5385_s16 + $0xb8] sm:$0xff] }
  0x39   : > { %4965 = vmatpush1.bf16.msra.mxu0 %v4964_v5  ;;  %5002 = vmatpush1.bf16.msra.mxu1 %v4964_v5  ;;  %v359_v5 = vld [vmem:[%s5385_s16 + $0x368] sm:$0xff] }
  0x3a   : > { %4967 = vmatprep.subr.bf16.mxu0 %v4966_v6  ;;  %4989 = vmatprep.subr.bf16.mxu1 %v4966_v6  ;;  %v274_v6 = vld [vmem:[%s5385_s16 + $0xc0] sm:$0xff] }
  0x3d   : > { %4969 = vmatpush1.bf16.msra.mxu0 %v4968_v11  ;;  %5003 = vmatpush1.bf16.msra.mxu1 %v4968_v11  ;;  %v360_v11 = vld [vmem:[%s5385_s16 + $0x370] sm:$0xff] }
  0x3e   : > { %4971 = vmatprep.subr.bf16.mxu0 %v4970_v12  ;;  %4990 = vmatprep.subr.bf16.mxu1 %v4970_v12  ;;  %v279_v12 = vld [vmem:[%s5385_s16 + $0xe8] sm:$0xff] }
  0x41   : > { %4973 = vmatpush1.bf16.msra.mxu0 %v4972_v17  ;;  %5004 = vmatpush1.bf16.msra.mxu1 %v4972_v17  ;;  %v365_v17 = vld [vmem:[%s5385_s16 + $0x398] sm:$0xff] }
  0x42   : > { %4975 = vmatprep.subr.bf16.mxu0 %v4974_v18  ;;  %4991 = vmatprep.subr.bf16.mxu1 %v4974_v18  ;;  %v280_v18 = vld [vmem:[%s5385_s16 + $0xf0] sm:$0xff] }
  0x45   : > { %4977 = vmatpush1.bf16.msra.mxu0 %v4976_v21  ;;  %5005 = vmatpush1.bf16.msra.mxu1 %v4976_v21  ;;  %v367_v21 = vld [vmem:[%s5385_s16 + $0x3a8] sm:$0xff] }
  0x48   : > { %792 = vmatmul.mubr.f32.vlgmr.msra.gmra.mrb[0].mxu0 %v250_v22  ;;  %1044 = vmatmul.mubr.f32.vlgmr.msra.gmra.mrb[0].mxu1 %v334_v23  ;;  %v282_v22 = vld [vmem:[%s5385_s16 + $0x100] sm:$0xff] }
  0x49   : > { %4835 = vmatprep.mubr.msk.f32.mxu0 %vm474_vm0, %v253_v24  ;;  %4877 = vmatprep.mubr.msk.f32.mxu1 %vm474_vm0, %v337_v25  ;;  %v366_v23 = vld [vmem:[%s5385_s16 + $0x3a0] sm:$0xff]  ;;  %v285_v24 = vld [vmem:[%s5385_s16 + $0x118] sm:$0xff] }
  0x4a   : > { %v369_v25 = vld [vmem:[%s5385_s16 + $0x3b8] sm:$0xff] }
  0x4c   : > { %798 = vmatmul.mubr.f32.gmra.mrb[2].mxu0 %v252_v26  ;;  %1050 = vmatmul.mubr.f32.gmra.mrb[2].mxu1 %v336_v27  ;;  %v284_v26 = vld [vmem:[%s5385_s16 + $0x110] sm:$0xff] }
  0x4d   : > { %4836 = vmatprep.mubr.msk.f32.mxu0 %vm474_vm0, %v255_v28  ;;  %4878 = vmatprep.mubr.msk.f32.mxu1 %vm474_vm0, %v339_v29  ;;  %v368_v27 = vld [vmem:[%s5385_s16 + $0x3b0] sm:$0xff]  ;;  %v287_v28 = vld [vmem:[%s5385_s16 + $0x128] sm:$0xff] }
  0x4e   : > { %v371_v29 = vld [vmem:[%s5385_s16 + $0x3c8] sm:$0xff] }
  0x50   : > { %804 = vmatmul.mubr.f32.gmra.mrb[4].mxu0 %v254_v30  ;;  %1056 = vmatmul.mubr.f32.gmra.mrb[4].mxu1 %v338_v31  ;;  %v286_v30 = vld [vmem:[%s5385_s16 + $0x120] sm:$0xff] }
  0x51   : > { %4837 = vmatprep.mubr.msk.f32.mxu0 %vm474_vm0, %v257_v32  ;;  %4879 = vmatprep.mubr.msk.f32.mxu1 %vm474_vm0, %v341_v33  ;;  %v370_v31 = vld [vmem:[%s5385_s16 + $0x3c0] sm:$0xff]  ;;  %v289_v32 = vld [vmem:[%s5385_s16 + $0x138] sm:$0xff] }
  0x52   : > { %v373_v33 = vld [vmem:[%s5385_s16 + $0x3d8] sm:$0xff] }
  0x54   : > { %810 = vmatmul.mubr.f32.gmra.mrb[6].mxu0 %v256_v34  ;;  %1062 = vmatmul.mubr.f32.gmra.mrb[6].mxu1 %v340_v35  ;;  %v288_v34 = vld [vmem:[%s5385_s16 + $0x130] sm:$0xff] }
  0x55   : > { %4838 = vmatprep.mubr.msk.f32.mxu0 %vm474_vm0, %v259_v36  ;;  %4880 = vmatprep.mubr.msk.f32.mxu1 %vm474_vm0, %v343_v37  ;;  %v372_v35 = vld [vmem:[%s5385_s16 + $0x3d0] sm:$0xff]  ;;  %v291_v36 = vld [vmem:[%s5385_s16 + $0x148] sm:$0xff] }
  0x56   : > { %v375_v37 = vld [vmem:[%s5385_s16 + $0x3e8] sm:$0xff] }
  0x58   : > { %816 = vmatmul.mubr.f32.gmra.mrb[8].mxu0 %v258_v38  ;;  %1068 = vmatmul.mubr.f32.gmra.mrb[8].mxu1 %v342_v39  ;;  %v290_v38 = vld [vmem:[%s5385_s16 + $0x140] sm:$0xff] }
  0x59   : > { %4839 = vmatprep.mubr.msk.f32.mxu0 %vm474_vm0, %v261_v40  ;;  %4881 = vmatprep.mubr.msk.f32.mxu1 %vm474_vm0, %v345_v41  ;;  %v374_v39 = vld [vmem:[%s5385_s16 + $0x3e0] sm:$0xff]  ;;  %v293_v40 = vld [vmem:[%s5385_s16 + $0x158] sm:$0xff] }
  0x5a   : > { %v377_v41 = vld [vmem:[%s5385_s16 + $0x3f8] sm:$0xff] }
  0x5c   : > { %822 = vmatmul.mubr.f32.gmra.mrb[10].mxu0 %v260_v42  ;;  %1074 = vmatmul.mubr.f32.gmra.mrb[10].mxu1 %v344_v43  ;;  %v292_v42 = vld [vmem:[%s5385_s16 + $0x150] sm:$0xff] }
  0x5d   : > { %4840 = vmatprep.mubr.msk.f32.mxu0 %vm474_vm0, %v263_v44  ;;  %4882 = vmatprep.mubr.msk.f32.mxu1 %vm474_vm0, %v347_v45  ;;  %v376_v43 = vld [vmem:[%s5385_s16 + $0x3f0] sm:$0xff]  ;;  %v295_v44 = vld [vmem:[%s5385_s16 + $0x168] sm:$0xff] }
  0x5e   : > { %v379_v45 = vld [vmem:[%s5385_s16 + $0x408] sm:$0xff] }
  0x60   : > { %828 = vmatmul.mubr.f32.gmra.mrb[12].mxu0 %v262_v46  ;;  %1080 = vmatmul.mubr.f32.gmra.mrb[12].mxu1 %v346_v47  ;;  %v294_v46 = vld [vmem:[%s5385_s16 + $0x160] sm:$0xff] }
  0x61   : > { %4841 = vmatprep.mubr.msk.f32.mxu0 %vm474_vm0, %v265_v48  ;;  %4883 = vmatprep.mubr.msk.f32.mxu1 %vm474_vm0, %v349_v49  ;;  %v378_v47 = vld [vmem:[%s5385_s16 + $0x400] sm:$0xff]  ;;  %v297_v48 = vld [vmem:[%s5385_s16 + $0x178] sm:$0xff] }
  0x62   : > { %v381_v49 = vld [vmem:[%s5385_s16 + $0x418] sm:$0xff] }
  0x64   : > { %834 = vmatmul.mubr.f32.gmra.mrb[14].mxu0 %v264_v50  ;;  %1086 = vmatmul.mubr.f32.gmra.mrb[14].mxu1 %v348_v51  ;;  %v296_v50 = vld [vmem:[%s5385_s16 + $0x170] sm:$0xff] }
  0x65   : > { %4842 = vmatprep.mubr.msk.f32.mxu0 %vm474_vm0, %v267_v52  ;;  %4884 = vmatprep.mubr.msk.f32.mxu1 %vm474_vm0, %v351_v53  ;;  %v380_v51 = vld [vmem:[%s5385_s16 + $0x410] sm:$0xff]  ;;  %v299_v52 = vld [vmem:[%s5385_s16 + $0x188] sm:$0xff] }
  0x66   : > { %v383_v53 = vld [vmem:[%s5385_s16 + $0x428] sm:$0xff] }
  0x68   : > { %840 = vmatmul.mubr.f32.gmra.mrb[16].mxu0 %v266_v54  ;;  %1092 = vmatmul.mubr.f32.gmra.mrb[16].mxu1 %v350_v55  ;;  %v298_v54 = vld [vmem:[%s5385_s16 + $0x180] sm:$0xff] }
  0x69   : > { %4843 = vmatprep.mubr.msk.f32.mxu0 %vm474_vm0, %v269_v56  ;;  %4885 = vmatprep.mubr.msk.f32.mxu1 %vm474_vm0, %v353_v57  ;;  %v382_v55 = vld [vmem:[%s5385_s16 + $0x420] sm:$0xff]  ;;  %v301_v56 = vld [vmem:[%s5385_s16 + $0x198] sm:$0xff] }
  0x6a   : > { %v385_v57 = vld [vmem:[%s5385_s16 + $0x438] sm:$0xff] }
  0x6c   : > { %846 = vmatmul.mubr.f32.gmra.mrb[18].mxu0 %v268_v58  ;;  %1098 = vmatmul.mubr.f32.gmra.mrb[18].mxu1 %v352_v59  ;;  %v300_v58 = vld [vmem:[%s5385_s16 + $0x190] sm:$0xff] }
  0x6d   : > { %4844 = vmatprep.mubr.msk.f32.mxu0 %vm474_vm0, %v271_v60  ;;  %4886 = vmatprep.mubr.msk.f32.mxu1 %vm474_vm0, %v355_v61  ;;  %v384_v59 = vld [vmem:[%s5385_s16 + $0x430] sm:$0xff]  ;;  %v303_v60 = vld [vmem:[%s5385_s16 + $0x1a8] sm:$0xff] }
  0x6e   : > { %v387_v61 = vld [vmem:[%s5385_s16 + $0x448] sm:$0xff] }
  0x70   : > { %852 = vmatmul.mubr.f32.gmra.mrb[20].mxu0 %v270_v62  ;;  %1104 = vmatmul.mubr.f32.gmra.mrb[20].mxu1 %v354_v63  ;;  %v302_v62 = vld [vmem:[%s5385_s16 + $0x1a0] sm:$0xff] }
  0x71   : > { %4845 = vmatprep.mubr.msk.f32.mxu0 %vm474_vm0, %v273_v0  ;;  %4887 = vmatprep.mubr.msk.f32.mxu1 %vm474_vm0, %v357_v1  ;;  %v386_v63 = vld [vmem:[%s5385_s16 + $0x440] sm:$0xff]  ;;  %v305_v0 = vld [vmem:[%s5385_s16 + $0x1b8] sm:$0xff] }
  0x72   : > { %v389_v1 = vld [vmem:[%s5385_s16 + $0x458] sm:$0xff] }
  0x74   : > { %858 = vmatmul.mubr.f32.gmra.mrb[22].mxu0 %v272_v2  ;;  %1110 = vmatmul.mubr.f32.gmra.mrb[22].mxu1 %v356_v3  ;;  %v304_v2 = vld [vmem:[%s5385_s16 + $0x1b0] sm:$0xff] }
  0x75   : > { %4846 = vmatprep.mubr.msk.f32.mxu0 %vm474_vm0, %v275_v4  ;;  %4888 = vmatprep.mubr.msk.f32.mxu1 %vm474_vm0, %v359_v5  ;;  %v388_v3 = vld [vmem:[%s5385_s16 + $0x450] sm:$0xff]  ;;  %v307_v4 = vld [vmem:[%s5385_s16 + $0x1c8] sm:$0xff] }
  0x76   : > { %v391_v5 = vld [vmem:[%s5385_s16 + $0x468] sm:$0xff] }
  0x78   : > { %864 = vmatmul.mubr.f32.gmra.mrb[24].mxu0 %v274_v6  ;;  %1116 = vmatmul.mubr.f32.gmra.mrb[24].mxu1 %v358_v7  ;;  %v306_v6 = vld [vmem:[%s5385_s16 + $0x1c0] sm:$0xff] }
  0x79   : > { %4847 = vmatprep.mubr.msk.f32.mxu0 %vm474_vm0, %v277_v8  ;;  %4889 = vmatprep.mubr.msk.f32.mxu1 %vm474_vm0, %v361_v9  ;;  %v390_v7 = vld [vmem:[%s5385_s16 + $0x460] sm:$0xff]  ;;  %v309_v8 = vld [vmem:[%s5385_s16 + $0x1d8] sm:$0xff] }
  0x7a   : > { %v393_v9 = vld [vmem:[%s5385_s16 + $0x478] sm:$0xff] }
  0x7c   : > { %870 = vmatmul.mubr.f32.gmra.mrb[26].mxu0 %v276_v10  ;;  %1122 = vmatmul.mubr.f32.gmra.mrb[26].mxu1 %v360_v11  ;;  %v308_v10 = vld [vmem:[%s5385_s16 + $0x1d0] sm:$0xff] }
  0x7d   : > { %4848 = vmatprep.mubr.msk.f32.mxu0 %vm474_vm0, %v279_v12  ;;  %4890 = vmatprep.mubr.msk.f32.mxu1 %vm474_vm0, %v363_v13  ;;  %v392_v11 = vld [vmem:[%s5385_s16 + $0x470] sm:$0xff]  ;;  %v311_v12 = vld [vmem:[%s5385_s16 + $0x1e8] sm:$0xff] }
  0x7e   : > { %v395_v13 = vld [vmem:[%s5385_s16 + $0x488] sm:$0xff] }
  0x80   : > { %876 = vmatmul.mubr.f32.gmra.mrb[28].mxu0 %v278_v14  ;;  %1128 = vmatmul.mubr.f32.gmra.mrb[28].mxu1 %v362_v15  ;;  %v310_v14 = vld [vmem:[%s5385_s16 + $0x1e0] sm:$0xff] }
  0x81   : > { %4849 = vmatprep.mubr.msk.f32.mxu0 %vm474_vm0, %v281_v16  ;;  %4891 = vmatprep.mubr.msk.f32.mxu1 %vm474_vm0, %v365_v17  ;;  %v394_v15 = vld [vmem:[%s5385_s16 + $0x480] sm:$0xff]  ;;  %v313_v16 = vld [vmem:[%s5385_s16 + $0x1f8] sm:$0xff] }
  0x82   : > { %v397_v17 = vld [vmem:[%s5385_s16 + $0x498] sm:$0xff] }
  0x84   : > { %882 = vmatmul.mubr.f32.gmra.mrb[30].mxu0 %v280_v18  ;;  %1134 = vmatmul.mubr.f32.gmra.mrb[30].mxu1 %v364_v19  ;;  %v312_v18 = vld [vmem:[%s5385_s16 + $0x1f0] sm:$0xff] }
  0x85   : > { %4850 = vmatprep.mubr.msk.f32.mxu0 %vm474_vm0, %v283_v20  ;;  %4892 = vmatprep.mubr.msk.f32.mxu1 %vm474_vm0, %v367_v21  ;;  %v396_v19 = vld [vmem:[%s5385_s16 + $0x490] sm:$0xff]  ;;  %v315_v20 = vld [vmem:[%s5385_s16 + $0x208] sm:$0xff] }
  0x86   : > { %v399_v21 = vld [vmem:[%s5385_s16 + $0x4a8] sm:$0xff] }
  0x88   : > { %888 = vmatmul.mubr.f32.gmra.mrb[32].mxu0 %v282_v22  ;;  %1140 = vmatmul.mubr.f32.gmra.mrb[32].mxu1 %v366_v23  ;;  %v314_v22 = vld [vmem:[%s5385_s16 + $0x200] sm:$0xff] }
  0x89   : > { %4851 = vmatprep.mubr.msk.f32.mxu0 %vm474_vm0, %v285_v24  ;;  %4893 = vmatprep.mubr.msk.f32.mxu1 %vm474_vm0, %v369_v25  ;;  %v398_v23 = vld [vmem:[%s5385_s16 + $0x4a0] sm:$0xff]  ;;  %v317_v24 = vld [vmem:[%s5385_s16 + $0x218] sm:$0xff] }
  0x8a   : > { %v401_v25 = vld [vmem:[%s5385_s16 + $0x4b8] sm:$0xff] }
  0x8c   : > { %894 = vmatmul.mubr.f32.gmra.mrb[34].mxu0 %v284_v26  ;;  %1146 = vmatmul.mubr.f32.gmra.mrb[34].mxu1 %v368_v27  ;;  %v316_v26 = vld [vmem:[%s5385_s16 + $0x210] sm:$0xff] }
  0x8d   : > { %4852 = vmatprep.mubr.msk.f32.mxu0 %vm474_vm0, %v287_v28  ;;  %4894 = vmatprep.mubr.msk.f32.mxu1 %vm474_vm0, %v371_v29  ;;  %v400_v27 = vld [vmem:[%s5385_s16 + $0x4b0] sm:$0xff]  ;;  %v319_v28 = vld [vmem:[%s5385_s16 + $0x228] sm:$0xff]  ;;  %v318_v29 = vld [vmem:[%s5385_s16 + $0x220] sm:$0xff] }
  0x90   : > { %900 = vmatmul.mubr.f32.gmra.mrb[36].mxu0 %v286_v30  ;;  %1152 = vmatmul.mubr.f32.gmra.mrb[36].mxu1 %v370_v31  ;;  %v321_v30 = vld [vmem:[%s5385_s16 + $0x238] sm:$0xff]  ;;  %v403_v31 = vld [vmem:[%s5385_s16 + $0x4c8] sm:$0xff] }
  0x91   : > { %4853 = vmatprep.mubr.msk.f32.mxu0 %vm474_vm0, %v289_v32  ;;  %4895 = vmatprep.mubr.msk.f32.mxu1 %vm474_vm0, %v373_v33  ;;  %v320_v32 = vld [vmem:[%s5385_s16 + $0x230] sm:$0xff]  ;;  %v402_v33 = vld [vmem:[%s5385_s16 + $0x4c0] sm:$0xff] }
  0x94   : > { %906 = vmatmul.mubr.f32.gmra.mrb[38].mxu0 %v288_v34  ;;  %1158 = vmatmul.mubr.f32.gmra.mrb[38].mxu1 %v372_v35  ;;  %v405_v34 = vld [vmem:[%s5385_s16 + $0x4d8] sm:$0xff]  ;;  %v404_v35 = vld [vmem:[%s5385_s16 + $0x4d0] sm:$0xff] }
  0x95   : > { %4854 = vmatprep.mubr.msk.f32.mxu0 %vm474_vm0, %v291_v36  ;;  %4896 = vmatprep.mubr.msk.f32.mxu1 %vm474_vm0, %v375_v37  ;;  %v323_v36 = vld [vmem:[%s5385_s16 + $0x248] sm:$0xff]  ;;  %v322_v37 = vld [vmem:[%s5385_s16 + $0x240] sm:$0xff] }
  0x98   : > { %912 = vmatmul.mubr.f32.gmra.mrb[40].mxu0 %v290_v38  ;;  %1164 = vmatmul.mubr.f32.gmra.mrb[40].mxu1 %v374_v39  ;;  %v325_v38 = vld [vmem:[%s5385_s16 + $0x258] sm:$0xff]  ;;  %v407_v39 = vld [vmem:[%s5385_s16 + $0x4e8] sm:$0xff] }
  0x99   : > { %4855 = vmatprep.mubr.msk.f32.mxu0 %vm474_vm0, %v293_v40  ;;  %4897 = vmatprep.mubr.msk.f32.mxu1 %vm474_vm0, %v377_v41  ;;  %v324_v40 = vld [vmem:[%s5385_s16 + $0x250] sm:$0xff]  ;;  %v406_v41 = vld [vmem:[%s5385_s16 + $0x4e0] sm:$0xff] }
  0x9c   : > { %918 = vmatmul.mubr.f32.gmra.mrb[42].mxu0 %v292_v42  ;;  %1170 = vmatmul.mubr.f32.gmra.mrb[42].mxu1 %v376_v43  ;;  %v409_v42 = vld [vmem:[%s5385_s16 + $0x4f8] sm:$0xff]  ;;  %v408_v43 = vld [vmem:[%s5385_s16 + $0x4f0] sm:$0xff] }
  0x9d   : > { %4856 = vmatprep.mubr.msk.f32.mxu0 %vm474_vm0, %v295_v44  ;;  %4898 = vmatprep.mubr.msk.f32.mxu1 %vm474_vm0, %v379_v45  ;;  %v327_v44 = vld [vmem:[%s5385_s16 + $0x268] sm:$0xff]  ;;  %v326_v45 = vld [vmem:[%s5385_s16 + $0x260] sm:$0xff] }
  0xa0   : > { %924 = vmatmul.mubr.f32.gmra.mrb[44].mxu0 %v294_v46  ;;  %1176 = vmatmul.mubr.f32.gmra.mrb[44].mxu1 %v378_v47  ;;  %v329_v46 = vld [vmem:[%s5385_s16 + $0x278] sm:$0xff]  ;;  %v411_v47 = vld [vmem:[%s5385_s16 + $0x508] sm:$0xff] }
  0xa1   : > { %4857 = vmatprep.mubr.msk.f32.mxu0 %vm474_vm0, %v297_v48  ;;  %4899 = vmatprep.mubr.msk.f32.mxu1 %vm474_vm0, %v381_v49  ;;  %v328_v48 = vld [vmem:[%s5385_s16 + $0x270] sm:$0xff]  ;;  %v410_v49 = vld [vmem:[%s5385_s16 + $0x500] sm:$0xff] }
  0xa4   : > { %930 = vmatmul.mubr.f32.gmra.mrb[46].mxu0 %v296_v50  ;;  %1182 = vmatmul.mubr.f32.gmra.mrb[46].mxu1 %v380_v51  ;;  %v413_v50 = vld [vmem:[%s5385_s16 + $0x518] sm:$0xff]  ;;  %v412_v51 = vld [vmem:[%s5385_s16 + $0x510] sm:$0xff] }
  0xa5   : > { %4858 = vmatprep.mubr.msk.f32.mxu0 %vm474_vm0, %v299_v52  ;;  %4900 = vmatprep.mubr.msk.f32.mxu1 %vm474_vm0, %v383_v53  ;;  %v331_v52 = vld [vmem:[%s5385_s16 + $0x288] sm:$0xff]  ;;  %v330_v53 = vld [vmem:[%s5385_s16 + $0x280] sm:$0xff] }
  0xa8   : > { %936 = vmatmul.mubr.f32.gmra.mrb[48].mxu0 %v298_v54  ;;  %1188 = vmatmul.mubr.f32.gmra.mrb[48].mxu1 %v382_v55  ;;  %v415_v54 = vld [vmem:[%s5385_s16 + $0x528] sm:$0xff]  ;;  %v414_v55 = vld [vmem:[%s5385_s16 + $0x520] sm:$0xff] }
  0xa9   : > { %4859 = vmatprep.mubr.msk.f32.mxu0 %vm474_vm0, %v301_v56  ;;  %4901 = vmatprep.mubr.msk.f32.mxu1 %vm474_vm0, %v385_v57 }
  0xac   : > { %942 = vmatmul.mubr.f32.gmra.mrb[50].mxu0 %v300_v58  ;;  %1194 = vmatmul.mubr.f32.gmra.mrb[50].mxu1 %v384_v59 }
  0xad   : > { %4860 = vmatprep.mubr.msk.f32.mxu0 %vm474_vm0, %v303_v60  ;;  %4902 = vmatprep.mubr.msk.f32.mxu1 %vm474_vm0, %v387_v61 }
  0xb0   : > { %948 = vmatmul.mubr.f32.gmra.mrb[52].mxu0 %v302_v62  ;;  %1200 = vmatmul.mubr.f32.gmra.mrb[52].mxu1 %v386_v63 }
  0xb1   : > { %4861 = vmatprep.mubr.msk.f32.mxu0 %vm474_vm0, %v305_v0  ;;  %4903 = vmatprep.mubr.msk.f32.mxu1 %vm474_vm0, %v389_v1 }
  0xb4   : > { %954 = vmatmul.mubr.f32.gmra.mrb[54].mxu0 %v304_v2  ;;  %1206 = vmatmul.mubr.f32.gmra.mrb[54].mxu1 %v388_v3 }
  0xb5   : > { %4862 = vmatprep.mubr.msk.f32.mxu0 %vm474_vm0, %v307_v4  ;;  %4904 = vmatprep.mubr.msk.f32.mxu1 %vm474_vm0, %v391_v5 }
  0xb8   : > { %960 = vmatmul.mubr.f32.gmra.mrb[56].mxu0 %v306_v6  ;;  %1212 = vmatmul.mubr.f32.gmra.mrb[56].mxu1 %v390_v7 }
  0xb9   : > { %4863 = vmatprep.mubr.msk.f32.mxu0 %vm474_vm0, %v309_v8  ;;  %4905 = vmatprep.mubr.msk.f32.mxu1 %vm474_vm0, %v393_v9 }
  0xbc   : > { %966 = vmatmul.mubr.f32.gmra.mrb[58].mxu0 %v308_v10  ;;  %1218 = vmatmul.mubr.f32.gmra.mrb[58].mxu1 %v392_v11 }
  0xbd   : > { %4864 = vmatprep.mubr.msk.f32.mxu0 %vm474_vm0, %v311_v12  ;;  %4906 = vmatprep.mubr.msk.f32.mxu1 %vm474_vm0, %v395_v13 }
  0xc0   : > { %972 = vmatmul.mubr.f32.gmra.mrb[60].mxu0 %v310_v14  ;;  %1224 = vmatmul.mubr.f32.gmra.mrb[60].mxu1 %v394_v15 }
  0xc1   : > { %4865 = vmatprep.mubr.msk.f32.mxu0 %vm474_vm0, %v313_v16  ;;  %4907 = vmatprep.mubr.msk.f32.mxu1 %vm474_vm0, %v397_v17 }
  0xc4   : > { %978 = vmatmul.mubr.f32.gmra.mrb[62].mxu0 %v312_v18  ;;  %1230 = vmatmul.mubr.f32.gmra.mrb[62].mxu1 %v396_v19 }
  0xc5   : > { %4866 = vmatprep.mubr.msk.f32.mxu0 %vm474_vm0, %v315_v20  ;;  %4908 = vmatprep.mubr.msk.f32.mxu1 %vm474_vm0, %v399_v21 }
  0xc8   : > { %984 = vmatmul.mubr.f32.gmra.mrb[64].mxu0 %v314_v22  ;;  %1236 = vmatmul.mubr.f32.gmra.mrb[64].mxu1 %v398_v23 }
  0xc9   : > { %4867 = vmatprep.mubr.msk.f32.mxu0 %vm474_vm0, %v317_v24  ;;  %4909 = vmatprep.mubr.msk.f32.mxu1 %vm474_vm0, %v401_v25 }
  0xcc   : > { %990 = vmatmul.mubr.f32.gmra.mrb[66].mxu0 %v316_v26  ;;  %1242 = vmatmul.mubr.f32.gmra.mrb[66].mxu1 %v400_v27 }
  0xcd   : > { %4868 = vmatprep.mubr.msk.f32.mxu0 %vm474_vm0, %v319_v28  ;;  %4910 = vmatprep.mubr.msk.f32.mxu1 %vm474_vm0, %v403_v31 }
  0xd0   : > { %996 = vmatmul.mubr.f32.gmra.mrb[68].mxu0 %v318_v29  ;;  %1248 = vmatmul.mubr.f32.gmra.mrb[68].mxu1 %v402_v33 }
  0xd1   : > { %4869 = vmatprep.mubr.msk.f32.mxu0 %vm474_vm0, %v321_v30  ;;  %4911 = vmatprep.mubr.msk.f32.mxu1 %vm474_vm0, %v405_v34 }
  0xd4   : > { %1002 = vmatmul.mubr.f32.gmra.mrb[70].mxu0 %v320_v32  ;;  %1254 = vmatmul.mubr.f32.gmra.mrb[70].mxu1 %v404_v35 }
  0xd5   : > { %4870 = vmatprep.mubr.msk.f32.mxu0 %vm474_vm0, %v323_v36  ;;  %4912 = vmatprep.mubr.msk.f32.mxu1 %vm474_vm0, %v407_v39 }
  0xd8   : > { %1008 = vmatmul.mubr.f32.gmra.mrb[72].mxu0 %v322_v37  ;;  %1260 = vmatmul.mubr.f32.gmra.mrb[72].mxu1 %v406_v41  ;;  %v333_v41 = vld [vmem:[%s5385_s16 + $0x298] sm:$0xff] }
  0xd9   : > { %4871 = vmatprep.mubr.msk.f32.mxu0 %vm474_vm0, %v325_v38  ;;  %4913 = vmatprep.mubr.msk.f32.mxu1 %vm474_vm0, %v409_v42 }
  0xdc   : > { %1014 = vmatmul.mubr.f32.gmra.mrb[74].mxu0 %v324_v40  ;;  %1266 = vmatmul.mubr.f32.gmra.mrb[74].mxu1 %v408_v43 }
  0xdd   : > { %4872 = vmatprep.mubr.msk.f32.mxu0 %vm474_vm0, %v327_v44  ;;  %4914 = vmatprep.mubr.msk.f32.mxu1 %vm474_vm0, %v411_v47  ;;  %v332_v44 = vld [vmem:[%s5385_s16 + $0x290] sm:$0xff] }
  0xe0   : > { %1020 = vmatmul.mubr.f32.gmra.mrb[76].mxu0 %v326_v45  ;;  %1272 = vmatmul.mubr.f32.gmra.mrb[76].mxu1 %v410_v49 }
  0xe1   : > { %4873 = vmatprep.mubr.msk.f32.mxu0 %vm474_vm0, %v329_v46  ;;  %4915 = vmatprep.mubr.msk.f32.mxu1 %vm474_vm0, %v413_v50 }
  0xe4   : > { %1026 = vmatmul.mubr.f32.gmra.mrb[78].mxu0 %v328_v48  ;;  %1278 = vmatmul.mubr.f32.gmra.mrb[78].mxu1 %v412_v51 }
  0xe5   : > { %4874 = vmatprep.mubr.msk.f32.mxu0 %vm474_vm0, %v331_v52  ;;  %4916 = vmatprep.mubr.msk.f32.mxu1 %vm474_vm0, %v415_v54 }
  0xe8   : > { %1032 = vmatmul.mubr.f32.gmra.mrb[80].mxu0 %v330_v53  ;;  %1284 = vmatmul.mubr.f32.gmra.mrb[80].mxu1 %v414_v55  ;;  %v417_v53 = vld [vmem:[%s5385_s16 + $0x538] sm:$0xff] }
  0xe9   : > { %4875 = vmatprep.mubr.msk.f32.mxu0 %vm474_vm0, %v333_v41  ;;  %4917 = vmatprep.mubr.msk.f32.mxu1 %vm474_vm0, %v417_v53 }
  0xec   : > { %1038 = vmatmul.mubr.f32.gmra.mrb[82].mxu0 %v332_v44 }
 0x11b   : > { %v5742_v56 = vpop.f32.mrb[0].mxu0  ;;  %v5744_v57 = vpop.f32.mrb[0].mxu1 }
 0x11c   : > { %8799 = vst [vmem:[#allocation2_spill] sm:$0xff] %v5742_v56  ;;  %8800 = vst [vmem:[#allocation3_spill] sm:$0xff] %v5744_v57  ;;  %v795_v58 = vpop.f32.mrb[1].mxu0  ;;  %v1047_v59 = vpop.f32.mrb[1].mxu1  ;;  %v1969_v26 = vmul.f32 %v5742_v56, %v5742_v56  ;;  %v2053_v36 = vmul.f32 %v5744_v57, %v5744_v57 }
 0x11d   : > { %1298 = vst.msk [vmem:[%s5740_s21 + $0x8] sm:$0xff] %vm1297_vm1, %v795_v58  ;;  %1382 = vst.msk [vmem:[%s5740_s21 + $0x2a8] sm:$0xff] %vm1297_vm1, %v1047_v59  ;;  %v416_v58 = vld [vmem:[%s5385_s16 + $0x530] sm:$0xff] }
 0x11e   : > { %1290 = vmatmul.mubr.f32.gmra.mrb[82].mxu1 %v416_v58 }
 0x11f   : > { %v5750_v60 = vpop.f32.mrb[2].mxu0  ;;  %v5752_v61 = vpop.f32.mrb[2].mxu1 }
 0x120   : > { %8801 = vst [vmem:[#allocation4_spill] sm:$0xff] %v5750_v60  ;;  %8802 = vst [vmem:[#allocation5_spill] sm:$0xff] %v5752_v61  ;;  %v801_v62 = vpop.f32.mrb[3].mxu0  ;;  %v1053_v63 = vpop.f32.mrb[3].mxu1  ;;  %v1971_v27 = vmul.f32 %v5750_v60, %v5750_v60  ;;  %v2055_v37 = vmul.f32 %v5752_v61, %v5752_v61 }
 0x121   : > { %1300 = vst.msk [vmem:[%s5740_s21 + $0x18] sm:$0xff] %vm1297_vm1, %v801_v62  ;;  %1384 = vst.msk [vmem:[%s5740_s21 + $0x2b8] sm:$0xff] %vm1297_vm1, %v1053_v63 }
 0x123   : > { %v5758_v0 = vpop.f32.mrb[4].mxu0  ;;  %v5760_v1 = vpop.f32.mrb[4].mxu1 }
 0x124   : > { %8803 = vst [vmem:[#allocation6_spill] sm:$0xff] %v5758_v0  ;;  %8804 = vst [vmem:[#allocation7_spill] sm:$0xff] %v5760_v1  ;;  %v1466_v2 = vld [vmem:[%s5740_s21 + $0x8] sm:$0xff]  ;;  %v807_v3 = vpop.f32.mrb[5].mxu0  ;;  %v1059_v5 = vpop.f32.mrb[5].mxu1 }
 0x125   : > { %v1550_v4 = vld [vmem:[%s5740_s21 + $0x2a8] sm:$0xff]  ;;  %v1633_v6 = vsel %vm1297_vm1, %v1466_v2, 0.0  ;;  %1302 = vst.msk [vmem:[%s5740_s21 + $0x28] sm:$0xff] %vm1297_vm1, %v807_v3  ;;  %1386 = vst.msk [vmem:[%s5740_s21 + $0x2c8] sm:$0xff] %vm1297_vm1, %v1059_v5  ;;  %v1970_v10 = vmul.f32 %v1466_v2, %v1466_v2 }
 0x126   : > { %v1634_v7 = vadd.f32 %v1633_v6, %v5742_v56  ;;  %v1801_v8 = vsel %vm1297_vm1, %v1550_v4, 0.0  ;;  %v2054_v22 = vmul.f32 %v1550_v4, %v1550_v4 }
 0x127   : > { %v5771_v9 = vpop.f32.mrb[6].mxu0  ;;  %v5773_v11 = vpop.f32.mrb[6].mxu1  ;;  %v1802_v19 = vadd.f32 %v1801_v8, %v5744_v57  ;;  %v2137_v20 = vsel %vm1297_vm1, %v1970_v10, 0.0 }
 0x128   : > { %8805 = vst [vmem:[#allocation8_spill] sm:$0xff] %v5771_v9  ;;  %8806 = vst [vmem:[#allocation9_spill] sm:$0xff] %v5773_v11  ;;  %1635 = vadd.xlane.f32.xlu0 %v1634_v7  ;;  %v1552_v12 = vld [vmem:[%s5740_s21 + $0x2b8] sm:$0xff]  ;;  %v813_v13 = vpop.f32.mrb[7].mxu0  ;;  %v1065_v15 = vpop.f32.mrb[7].mxu1  ;;  %v2138_v30 = vadd.f32 %v2137_v20, %v1969_v26  ;;  %v2305_v32 = vsel %vm1297_vm1, %v2054_v22, 0.0  ;;  %v2057_v22 = vmul.f32 %v5760_v1, %v5760_v1 }
 0x129   : > { %v1468_v14 = vld [vmem:[%s5740_s21 + $0x18] sm:$0xff]  ;;  %v1805_v16 = vsel %vm1297_vm1, %v1552_v12, 0.0  ;;  %1304 = vst.msk [vmem:[%s5740_s21 + $0x38] sm:$0xff] %vm1297_vm1, %v813_v13  ;;  %1388 = vst.msk [vmem:[%s5740_s21 + $0x2d8] sm:$0xff] %vm1297_vm1, %v1065_v15  ;;  %v2056_v23 = vmul.f32 %v1552_v12, %v1552_v12  ;;  %v2306_v42 = vadd.f32 %v2305_v32, %v2053_v36 }
 0x12a   : > { %v1972_v17 = vmul.f32 %v1468_v14, %v1468_v14  ;;  %v1806_v18 = vadd.f32 %v1805_v16, %v5752_v61  ;;  %v1637_v45 = vsel %vm1297_vm1, %v1468_v14, 0.0 }
 0x12b   : > { %v5786_v24 = vpop.f32.mrb[8].mxu0  ;;  %v5788_v25 = vpop.f32.mrb[8].mxu1  ;;  %v2309_v33 = vsel %vm1297_vm1, %v2056_v23, 0.0  ;;  %v1638_v54 = vadd.f32 %v1637_v45, %v5750_v60 }
 0x12c   : > { %v2141_v21 = vsel %vm1297_vm1, %v1972_v17, 0.0  ;;  %8807 = vst [vmem:[#allocation10_spill] sm:$0xff] %v5786_v24  ;;  %8808 = vst [vmem:[#allocation11_spill] sm:$0xff] %v5788_v25  ;;  %1807 = vadd.xlane.f32.xlu1 %v1806_v18  ;;  %1803 = vadd.xlane.f32.xlu0 %v1802_v19  ;;  %v819_v28 = vpop.f32.mrb[9].mxu0  ;;  %v1071_v29 = vpop.f32.mrb[9].mxu1  ;;  %v1470_v38 = vld [vmem:[%s5740_s21 + $0x28] sm:$0xff]  ;;  %v2310_v43 = vadd.f32 %v2309_v33, %v2055_v37  ;;  %v1973_v17 = vmul.f32 %v5758_v0, %v5758_v0 }
 0x12d   : > { %1306 = vst.msk [vmem:[%s5740_s21 + $0x48] sm:$0xff] %vm1297_vm1, %v819_v28  ;;  %1390 = vst.msk [vmem:[%s5740_s21 + $0x2e8] sm:$0xff] %vm1297_vm1, %v1071_v29  ;;  %v2142_v31 = vadd.f32 %v2141_v21, %v1971_v27  ;;  %v1641_v46 = vsel %vm1297_vm1, %v1470_v38, 0.0  ;;  %v1554_v49 = vld [vmem:[%s5740_s21 + $0x2c8] sm:$0xff]  ;;  %v1974_v63 = vmul.f32 %v1470_v38, %v1470_v38  ;;  %v2059_v38 = vmul.f32 %v5773_v11, %v5773_v11 }
 0x12e   : > { %v1642_v55 = vadd.f32 %v1641_v46, %v5758_v0  ;;  %v1809_v59 = vsel %vm1297_vm1, %v1554_v49, 0.0  ;;  %v2058_v13 = vmul.f32 %v1554_v49, %v1554_v49 }
 0x12f   : > { %v5800_v34 = vpop.f32.mrb[10].mxu0  ;;  %v5802_v35 = vpop.f32.mrb[10].mxu1  ;;  %v1810_v7 = vadd.f32 %v1809_v59, %v5760_v1  ;;  %v2145_v10 = vsel %vm1297_vm1, %v1974_v63, 0.0 }
 0x130   : > { %8809 = vst [vmem:[#allocation12_spill] sm:$0xff] %v5800_v34  ;;  %8810 = vst [vmem:[#allocation13_spill] sm:$0xff] %v5802_v35  ;;  %2139 = vadd.xlane.f32.xlu0 %v2138_v30  ;;  %2143 = vadd.xlane.f32.xlu1 %v2142_v31  ;;  %v825_v39 = vpop.f32.mrb[11].mxu0  ;;  %v1077_v40 = vpop.f32.mrb[11].mxu1  ;;  %v1472_v50 = vld [vmem:[%s5740_s21 + $0x38] sm:$0xff]  ;;  %v2146_v20 = vadd.f32 %v2145_v10, %v1973_v17  ;;  %v2313_v23 = vsel %vm1297_vm1, %v2058_v13, 0.0  ;;  %v1975_v30 = vmul.f32 %v5771_v9, %v5771_v9 }
 0x131   : > { %1308 = vst.msk [vmem:[%s5740_s21 + $0x58] sm:$0xff] %vm1297_vm1, %v825_v39  ;;  %1392 = vst.msk [vmem:[%s5740_s21 + $0x2f8] sm:$0xff] %vm1297_vm1, %v1077_v40  ;;  %v1645_v62 = vsel %vm1297_vm1, %v1472_v50, 0.0  ;;  %v1556_v4 = vld [vmem:[%s5740_s21 + $0x2d8] sm:$0xff]  ;;  %v1976_v14 = vmul.f32 %v1472_v50, %v1472_v50  ;;  %v2314_v36 = vadd.f32 %v2313_v23, %v2057_v22 }
 0x132   : > { %v1646_v8 = vadd.f32 %v1645_v62, %v5771_v9  ;;  %v1813_v12 = vsel %vm1297_vm1, %v1556_v4, 0.0  ;;  %v2060_v27 = vmul.f32 %v1556_v4, %v1556_v4 }
 0x133   : > { %v5818_v47 = vpop.f32.mrb[12].mxu0  ;;  %v5820_v48 = vpop.f32.mrb[12].mxu1  ;;  %v1814_v21 = vadd.f32 %v1813_v12, %v5773_v11  ;;  %v2149_v26 = vsel %vm1297_vm1, %v1976_v14, 0.0 }
 0x134   : > { %8811 = vst [vmem:[#allocation14_spill] sm:$0xff] %v5818_v47  ;;  %8812 = vst [vmem:[#allocation15_spill] sm:$0xff] %v5820_v48  ;;  %2307 = vadd.xlane.f32.xlu0 %v2306_v42  ;;  %2311 = vadd.xlane.f32.xlu1 %v2310_v43  ;;  %v831_v51 = vpop.f32.mrb[13].mxu0  ;;  %v1083_v52 = vpop.f32.mrb[13].mxu1  ;;  %v1474_v31 = vld [vmem:[%s5740_s21 + $0x48] sm:$0xff]  ;;  %v2150_v37 = vadd.f32 %v2149_v26, %v1975_v30  ;;  %v2317_v39 = vsel %vm1297_vm1, %v2060_v27, 0.0 }
 0x135   : > { %1310 = vst.msk [vmem:[%s5740_s21 + $0x68] sm:$0xff] %vm1297_vm1, %v831_v51  ;;  %1394 = vst.msk [vmem:[%s5740_s21 + $0x308] sm:$0xff] %vm1297_vm1, %v1083_v52  ;;  %v1649_v40 = vsel %vm1297_vm1, %v1474_v31, 0.0  ;;  %v1558_v43 = vld [vmem:[%s5740_s21 + $0x2e8] sm:$0xff]  ;;  %v2318_v49 = vadd.f32 %v2317_v39, %v2059_v38  ;;  %v1978_v53 = vmul.f32 %v1474_v31, %v1474_v31  ;;  %v2063_v38 = vmul.f32 %v5802_v35, %v5802_v35 }
 0x136   : > { %v1650_v50 = vadd.f32 %v1649_v40, %v5786_v24  ;;  %v1817_v51 = vsel %vm1297_vm1, %v1558_v43, 0.0 }
 0x137   : > { %v5835_v2 = vpop.f32.mrb[14].mxu0  ;;  %v5837_v3 = vpop.f32.mrb[14].mxu1  ;;  %v1818_v63 = vadd.f32 %v1817_v51, %v5788_v25 }
 0x138   : > { %8813 = vst [vmem:[#allocation16_spill] sm:$0xff] %v5835_v2  ;;  %8814 = vst [vmem:[#allocation17_spill] sm:$0xff] %v5837_v3  ;;  %1639 = vadd.xlane.f32.xlu0 %v1638_v54  ;;  %1643 = vadd.xlane.f32.xlu1 %v1642_v55  ;;  %v837_v5 = vpop.f32.mrb[15].mxu0  ;;  %v1089_v6 = vpop.f32.mrb[15].mxu1  ;;  %v1476_v44 = vld [vmem:[%s5740_s21 + $0x58] sm:$0xff] }
 0x139   : > { %1312 = vst.msk [vmem:[%s5740_s21 + $0x78] sm:$0xff] %vm1297_vm1, %v837_v5  ;;  %1396 = vst.msk [vmem:[%s5740_s21 + $0x318] sm:$0xff] %vm1297_vm1, %v1089_v6  ;;  %v1653_v52 = vsel %vm1297_vm1, %v1476_v44, 0.0  ;;  %v1560_v58 = vld [vmem:[%s5740_s21 + $0x2f8] sm:$0xff]  ;;  %v1977_v5 = vmul.f32 %v5786_v24, %v5786_v24  ;;  %v2153_v6 = vsel %vm1297_vm1, %v1978_v53, 0.0  ;;  %v1980_v10 = vmul.f32 %v1476_v44, %v1476_v44 }
 0x13a   : > { %v1654_v4 = vadd.f32 %v1653_v52, %v5800_v34  ;;  %v2064_v26 = vmul.f32 %v1560_v58, %v1560_v58 }
 0x13b   : > { %v5848_v15 = vpop.f32.mrb[16].mxu0  ;;  %v5850_v16 = vpop.f32.mrb[16].mxu1  ;;  %v2157_v23 = vsel %vm1297_vm1, %v1980_v10, 0.0  ;;  %v1981_v10 = vmul.f32 %v5818_v47, %v5818_v47 }
 0x13c   : > { %8815 = vst [vmem:[#allocation18_spill] sm:$0xff] %v5848_v15  ;;  %8816 = vst [vmem:[#allocation19_spill] sm:$0xff] %v5850_v16  ;;  %1811 = vadd.xlane.f32.xlu0 %v1810_v7  ;;  %1647 = vadd.xlane.f32.xlu1 %v1646_v8  ;;  %v843_v18 = vpop.f32.mrb[17].mxu0  ;;  %v1095_v19 = vpop.f32.mrb[17].mxu1  ;;  %v1821_v7 = vsel %vm1297_vm1, %v1560_v58, 0.0  ;;  %v2062_v8 = vmul.f32 %v1558_v43, %v1558_v43  ;;  %v1478_v31 = vld [vmem:[%s5740_s21 + $0x68] sm:$0xff] }
 0x13d   : > { %1314 = vst.msk [vmem:[%s5740_s21 + $0x88] sm:$0xff] %vm1297_vm1, %v843_v18  ;;  %1398 = vst.msk [vmem:[%s5740_s21 + $0x328] sm:$0xff] %vm1297_vm1, %v1095_v19  ;;  %v2154_v18 = vadd.f32 %v2153_v6, %v1977_v5  ;;  %v1822_v19 = vadd.f32 %v1821_v7, %v5802_v35  ;;  %v2325_v39 = vsel %vm1297_vm1, %v2064_v26, 0.0  ;;  %v1657_v40 = vsel %vm1297_vm1, %v1478_v31, 0.0 }
 0x13e   : > { %v2321_v22 = vsel %vm1297_vm1, %v2062_v8, 0.0  ;;  %v2326_v51 = vadd.f32 %v2325_v39, %v2063_v38  ;;  %v1658_v52 = vadd.f32 %v1657_v40, %v5818_v47 }
 0x13f   : > { %v5863_v28 = vpop.f32.mrb[18].mxu0  ;;  %v5865_v29 = vpop.f32.mrb[18].mxu1 }
 0x140   : > { %8817 = vst [vmem:[#allocation20_spill] sm:$0xff] %v5863_v28  ;;  %8818 = vst [vmem:[#allocation21_spill] sm:$0xff] %v5865_v29  ;;  %2147 = vadd.xlane.f32.xlu0 %v2146_v20  ;;  %1815 = vadd.xlane.f32.xlu1 %v1814_v21  ;;  %v849_v32 = vpop.f32.mrb[19].mxu0  ;;  %v1101_v33 = vpop.f32.mrb[19].mxu1  ;;  %v2061_v20 = vmul.f32 %v5788_v25, %v5788_v25  ;;  %v1979_v21 = vmul.f32 %v5800_v34, %v5800_v34 }
 0x141   : > { %1316 = vst.msk [vmem:[%s5740_s21 + $0x98] sm:$0xff] %vm1297_vm1, %v849_v32  ;;  %1400 = vst.msk [vmem:[%s5740_s21 + $0x338] sm:$0xff] %vm1297_vm1, %v1101_v33 }
 0x143   : > { %v5878_v41 = vpop.f32.mrb[20].mxu0  ;;  %v5880_v42 = vpop.f32.mrb[20].mxu1 }
 0x144   : > { %8819 = vst [vmem:[#allocation22_spill] sm:$0xff] %v5878_v41  ;;  %8820 = vst [vmem:[#allocation23_spill] sm:$0xff] %v5880_v42  ;;  %2315 = vadd.xlane.f32.xlu0 %v2314_v36  ;;  %2151 = vadd.xlane.f32.xlu1 %v2150_v37  ;;  %v855_v45 = vpop.f32.mrb[21].mxu0  ;;  %v1107_v46 = vpop.f32.mrb[21].mxu1  ;;  %v2322_v36 = vadd.f32 %v2321_v22, %v2061_v20  ;;  %v2158_v37 = vadd.f32 %v2157_v23, %v1979_v21 }
 0x145   : > { %1318 = vst.msk [vmem:[%s5740_s21 + $0xa8] sm:$0xff] %vm1297_vm1, %v855_v45  ;;  %1402 = vst.msk [vmem:[%s5740_s21 + $0x348] sm:$0xff] %vm1297_vm1, %v1107_v46  ;;  %v1562_v45 = vld [vmem:[%s5740_s21 + $0x308] sm:$0xff]  ;;  %v1480_v46 = vld [vmem:[%s5740_s21 + $0x78] sm:$0xff] }
 0x146   : > { %v1825_v53 = vsel %vm1297_vm1, %v1562_v45, 0.0  ;;  %v1661_v58 = vsel %vm1297_vm1, %v1480_v46, 0.0 }
 0x147   : > { %v5891_v54 = vpop.f32.mrb[22].mxu0  ;;  %v5893_v55 = vpop.f32.mrb[22].mxu1  ;;  %v1826_v7 = vadd.f32 %v1825_v53, %v5820_v48  ;;  %v1662_v8 = vadd.f32 %v1661_v58, %v5835_v2 }
 0x148   : > { %8821 = vst [vmem:[#allocation24_spill] sm:$0xff] %v5891_v54  ;;  %8822 = vst [vmem:[#allocation25_spill] sm:$0xff] %v5893_v55  ;;  %2319 = vadd.xlane.f32.xlu1 %v2318_v49  ;;  %1651 = vadd.xlane.f32.xlu0 %v1650_v50  ;;  %v861_v59 = vpop.f32.mrb[23].mxu0  ;;  %v1113_v62 = vpop.f32.mrb[23].mxu1 }
 0x149   : > { %1320 = vst.msk [vmem:[%s5740_s21 + $0xb8] sm:$0xff] %vm1297_vm1, %v861_v59  ;;  %1404 = vst.msk [vmem:[%s5740_s21 + $0x358] sm:$0xff] %vm1297_vm1, %v1113_v62  ;;  %v1982_v59 = vmul.f32 %v1478_v31, %v1478_v31 }
 0x14b   : > { %v5906_v12 = vpop.f32.mrb[24].mxu0  ;;  %v5908_v13 = vpop.f32.mrb[24].mxu1 }
 0x14c   : > { %8823 = vst [vmem:[#allocation26_spill] sm:$0xff] %v5906_v12  ;;  %8824 = vst [vmem:[#allocation27_spill] sm:$0xff] %v5908_v13  ;;  %1819 = vadd.xlane.f32.xlu0 %v1818_v63  ;;  %1655 = vadd.xlane.f32.xlu1 %v1654_v4  ;;  %v867_v14 = vpop.f32.mrb[25].mxu0  ;;  %v1119_v17 = vpop.f32.mrb[25].mxu1  ;;  %v1564_v4 = vld [vmem:[%s5740_s21 + $0x318] sm:$0xff] }
 0x14d   : > { %1322 = vst.msk [vmem:[%s5740_s21 + $0xc8] sm:$0xff] %vm1297_vm1, %v867_v14  ;;  %1406 = vst.msk [vmem:[%s5740_s21 + $0x368] sm:$0xff] %vm1297_vm1, %v1119_v17  ;;  %v2161_v14 = vsel %vm1297_vm1, %v1982_v59, 0.0  ;;  %v1829_v17 = vsel %vm1297_vm1, %v1564_v4, 0.0  ;;  %v2068_v38 = vmul.f32 %v1564_v4, %v1564_v4 }
 0x14e   : > { %v2162_v26 = vadd.f32 %v2161_v14, %v1981_v10  ;;  %v1830_v31 = vadd.f32 %v1829_v17, %v5837_v3 }
 0x14f   : > { %v5921_v27 = vpop.f32.mrb[26].mxu0  ;;  %v5923_v30 = vpop.f32.mrb[26].mxu1  ;;  %v2333_v53 = vsel %vm1297_vm1, %v2068_v38, 0.0 }
 0x150   : > { %8825 = vst [vmem:[#allocation28_spill] sm:$0xff] %v5921_v27  ;;  %8826 = vst [vmem:[#allocation29_spill] sm:$0xff] %v5923_v30  ;;  %2155 = vadd.xlane.f32.xlu0 %v2154_v18  ;;  %1823 = vadd.xlane.f32.xlu1 %v1822_v19  ;;  %v873_v32 = vpop.f32.mrb[27].mxu0  ;;  %v1125_v33 = vpop.f32.mrb[27].mxu1  ;;  %v2066_v18 = vmul.f32 %v1562_v45, %v1562_v45  ;;  %v1984_v19 = vmul.f32 %v1480_v46, %v1480_v46  ;;  %v1482_v45 = vld [vmem:[%s5740_s21 + $0x88] sm:$0xff] }
 0x151   : > { %1324 = vst.msk [vmem:[%s5740_s21 + $0xd8] sm:$0xff] %vm1297_vm1, %v873_v32  ;;  %1408 = vst.msk [vmem:[%s5740_s21 + $0x378] sm:$0xff] %vm1297_vm1, %v1125_v33  ;;  %v2065_v32 = vmul.f32 %v5820_v48, %v5820_v48  ;;  %v1983_v33 = vmul.f32 %v5835_v2, %v5835_v2  ;;  %v1665_v58 = vsel %vm1297_vm1, %v1482_v45, 0.0 }
 0x152   : > { %v1666_v14 = vadd.f32 %v1665_v58, %v5848_v15 }
 0x153   : > { %v5934_v43 = vpop.f32.mrb[28].mxu0  ;;  %v5936_v44 = vpop.f32.mrb[28].mxu1 }
 0x154   : > { %8827 = vst [vmem:[#allocation30_spill] sm:$0xff] %v5934_v43  ;;  %8828 = vst [vmem:[#allocation31_spill] sm:$0xff] %v5936_v44  ;;  %2323 = vadd.xlane.f32.xlu0 %v2322_v36  ;;  %2159 = vadd.xlane.f32.xlu1 %v2158_v37  ;;  %v879_v49 = vpop.f32.mrb[29].mxu0  ;;  %v1131_v50 = vpop.f32.mrb[29].mxu1  ;;  %v2329_v36 = vsel %vm1297_vm1, %v2066_v18, 0.0  ;;  %v2165_v37 = vsel %vm1297_vm1, %v1984_v19, 0.0  ;;  %v1986_v19 = vmul.f32 %v1482_v45, %v1482_v45 }
 0x155   : > { %1326 = vst.msk [vmem:[%s5740_s21 + $0xe8] sm:$0xff] %vm1297_vm1, %v879_v49  ;;  %1410 = vst.msk [vmem:[%s5740_s21 + $0x388] sm:$0xff] %vm1297_vm1, %v1131_v50  ;;  %v2330_v50 = vadd.f32 %v2329_v36, %v2065_v32 }
 0x156   : > { %v2169_v38 = vsel %vm1297_vm1, %v1986_v19, 0.0  ;;  %v1486_v19 = vld [vmem:[%s5740_s21 + $0xa8] sm:$0xff] }
 0x157   : > { %v5947_v62 = vpop.f32.mrb[30].mxu0  ;;  %v5949_v63 = vpop.f32.mrb[30].mxu1 }
 0x158   : > { %8829 = vst [vmem:[#allocation32_spill] sm:$0xff] %v5947_v62  ;;  %8830 = vst [vmem:[#allocation33_spill] sm:$0xff] %v5949_v63  ;;  %2327 = vadd.xlane.f32.xlu1 %v2326_v51  ;;  %1659 = vadd.xlane.f32.xlu0 %v1658_v52  ;;  %v885_v5 = vpop.f32.mrb[31].mxu0  ;;  %v1137_v6 = vpop.f32.mrb[31].mxu1  ;;  %v2166_v51 = vadd.f32 %v2165_v37, %v1983_v33  ;;  %v2067_v52 = vmul.f32 %v5837_v3, %v5837_v3  ;;  %v1492_v25 = vld [vmem:[%s5740_s21 + $0xd8] sm:$0xff] }
 0x159   : > { %1328 = vst.msk [vmem:[%s5740_s21 + $0xf8] sm:$0xff] %vm1297_vm1, %v885_v5  ;;  %1412 = vst.msk [vmem:[%s5740_s21 + $0x398] sm:$0xff] %vm1297_vm1, %v1137_v6  ;;  %v1566_v5 = vld [vmem:[%s5740_s21 + $0x328] sm:$0xff]  ;;  %v1484_v6 = vld [vmem:[%s5740_s21 + $0x98] sm:$0xff]  ;;  %v1985_v37 = vmul.f32 %v5848_v15, %v5848_v15 }
 0x15a   : > { %v2334_v10 = vadd.f32 %v2333_v53, %v2067_v52  ;;  %v1833_v17 = vsel %vm1297_vm1, %v1566_v5, 0.0  ;;  %v1669_v18 = vsel %vm1297_vm1, %v1484_v6, 0.0  ;;  %v1576_v57 = vld [vmem:[%s5740_s21 + $0x378] sm:$0xff] }
 0x15b   : > { %v5962_v20 = vpop.f32.mrb[32].mxu0  ;;  %v5964_v21 = vpop.f32.mrb[32].mxu1  ;;  %v1834_v33 = vadd.f32 %v1833_v17, %v5850_v16  ;;  %v1670_v36 = vadd.f32 %v1669_v18, %v5863_v28  ;;  %v2170_v58 = vadd.f32 %v2169_v38, %v1985_v37  ;;  %v1673_v38 = vsel %vm1297_vm1, %v1486_v19, 0.0 }
 0x15c   : > { %8831 = vst [vmem:[#allocation34_spill] sm:$0xff] %v5962_v20  ;;  %8832 = vst [vmem:[#allocation35_spill] sm:$0xff] %v5964_v21  ;;  %1827 = vadd.xlane.f32.xlu0 %v1826_v7  ;;  %1663 = vadd.xlane.f32.xlu1 %v1662_v8  ;;  %v891_v22 = vpop.f32.mrb[33].mxu0  ;;  %v1143_v23 = vpop.f32.mrb[33].mxu1 }
 0x15d   : > { %1330 = vst.msk [vmem:[%s5740_s21 + $0x108] sm:$0xff] %vm1297_vm1, %v891_v22  ;;  %1414 = vst.msk [vmem:[%s5740_s21 + $0x3a8] sm:$0xff] %vm1297_vm1, %v1143_v23 }
 0x15f   : > { %v5977_v39 = vpop.f32.mrb[34].mxu0  ;;  %v5979_v40 = vpop.f32.mrb[34].mxu1 }
 0x160   : > { %8833 = vst [vmem:[#allocation36_spill] sm:$0xff] %v5977_v39  ;;  %8834 = vst [vmem:[#allocation37_spill] sm:$0xff] %v5979_v40  ;;  %2163 = vadd.xlane.f32.xlu0 %v2162_v26  ;;  %1831 = vadd.xlane.f32.xlu1 %v1830_v31  ;;  %v897_v46 = vpop.f32.mrb[35].mxu0  ;;  %v1149_v49 = vpop.f32.mrb[35].mxu1  ;;  %v1568_v26 = vld [vmem:[%s5740_s21 + $0x338] sm:$0xff] }
 0x161   : > { %1332 = vst.msk [vmem:[%s5740_s21 + $0x118] sm:$0xff] %vm1297_vm1, %v897_v46  ;;  %1416 = vst.msk [vmem:[%s5740_s21 + $0x3b8] sm:$0xff] %vm1297_vm1, %v1149_v49  ;;  %v1837_v45 = vsel %vm1297_vm1, %v1568_v26, 0.0  ;;  %v2070_v46 = vmul.f32 %v1566_v5, %v1566_v5  ;;  %v1988_v49 = vmul.f32 %v1484_v6, %v1484_v6  ;;  %v2069_v5 = vmul.f32 %v5850_v16, %v5850_v16  ;;  %v1496_v11 = vld [vmem:[%s5740_s21 + $0xf8] sm:$0xff] }
 0x162   : > { %v1987_v6 = vmul.f32 %v5863_v28, %v5863_v28 }
 0x163   : > { %v5990_v59 = vpop.f32.mrb[36].mxu0  ;;  %v5992_v4 = vpop.f32.mrb[36].mxu1 }
 0x164   : > { %8835 = vst [vmem:[#allocation38_spill] sm:$0xff] %v5990_v59  ;;  %8836 = vst [vmem:[#allocation39_spill] sm:$0xff] %v5992_v4  ;;  %2331 = vadd.xlane.f32.xlu0 %v2330_v50  ;;  %2167 = vadd.xlane.f32.xlu1 %v2166_v51  ;;  %v903_v7 = vpop.f32.mrb[37].mxu0  ;;  %v1155_v8 = vpop.f32.mrb[37].mxu1 }
 0x165   : > { %1334 = vst.msk [vmem:[%s5740_s21 + $0x128] sm:$0xff] %vm1297_vm1, %v903_v7  ;;  %1418 = vst.msk [vmem:[%s5740_s21 + $0x3c8] sm:$0xff] %vm1297_vm1, %v1155_v8  ;;  %v1838_v7 = vadd.f32 %v1837_v45, %v5865_v29  ;;  %v2337_v8 = vsel %vm1297_vm1, %v2070_v46, 0.0 }
 0x167   : > { %v6003_v22 = vpop.f32.mrb[38].mxu0  ;;  %v6005_v23 = vpop.f32.mrb[38].mxu1 }
 0x168   : > { %8837 = vst [vmem:[#allocation40_spill] sm:$0xff] %v6003_v22  ;;  %8838 = vst [vmem:[#allocation41_spill] sm:$0xff] %v6005_v23  ;;  %2335 = vadd.xlane.f32.xlu1 %v2334_v10  ;;  %1667 = vadd.xlane.f32.xlu0 %v1666_v14  ;;  %v909_v31 = vpop.f32.mrb[39].mxu0  ;;  %v1161_v32 = vpop.f32.mrb[39].mxu1  ;;  %v2173_v10 = vsel %vm1297_vm1, %v1988_v49, 0.0  ;;  %v2072_v14 = vmul.f32 %v1568_v26, %v1568_v26  ;;  %v2071_v26 = vmul.f32 %v5865_v29, %v5865_v29  ;;  %v1570_v49 = vld [vmem:[%s5740_s21 + $0x348] sm:$0xff] }
 0x169   : > { %1336 = vst.msk [vmem:[%s5740_s21 + $0x138] sm:$0xff] %vm1297_vm1, %v909_v31  ;;  %1420 = vst.msk [vmem:[%s5740_s21 + $0x3d8] sm:$0xff] %vm1297_vm1, %v1161_v32  ;;  %v1500_v47 = vld [vmem:[%s5740_s21 + $0x118] sm:$0xff] }
 0x16a   : > { %v2341_v37 = vsel %vm1297_vm1, %v2072_v14, 0.0  ;;  %v2004_v24 = vmul.f32 %v1500_v47, %v1500_v47 }
 0x16b   : > { %v6018_v50 = vpop.f32.mrb[40].mxu0  ;;  %v6020_v51 = vpop.f32.mrb[40].mxu1 }
 0x16c   : > { %8839 = vst [vmem:[#allocation42_spill] sm:$0xff] %v6018_v50  ;;  %8840 = vst [vmem:[#allocation43_spill] sm:$0xff] %v6020_v51  ;;  %1835 = vadd.xlane.f32.xlu0 %v1834_v33  ;;  %1671 = vadd.xlane.f32.xlu1 %v1670_v36  ;;  %v915_v52 = vpop.f32.mrb[41].mxu0  ;;  %v1167_v53 = vpop.f32.mrb[41].mxu1  ;;  %v2338_v33 = vadd.f32 %v2337_v8, %v2069_v5  ;;  %v2174_v36 = vadd.f32 %v2173_v10, %v1987_v6  ;;  %v1841_v6 = vsel %vm1297_vm1, %v1570_v49, 0.0 }
 0x16d   : > { %1338 = vst.msk [vmem:[%s5740_s21 + $0x148] sm:$0xff] %vm1297_vm1, %v915_v52  ;;  %1422 = vst.msk [vmem:[%s5740_s21 + $0x3e8] sm:$0xff] %vm1297_vm1, %v1167_v53  ;;  %v1488_v52 = vld [vmem:[%s5740_s21 + $0xb8] sm:$0xff]  ;;  %v1674_v5 = vadd.f32 %v1673_v38, %v5878_v41  ;;  %v1990_v10 = vmul.f32 %v1486_v19, %v1486_v19  ;;  %v1989_v19 = vmul.f32 %v5878_v41, %v5878_v41 }
 0x16e   : > { %v1677_v8 = vsel %vm1297_vm1, %v1488_v52, 0.0 }
 0x16f   : > { %v6033_v17 = vpop.f32.mrb[42].mxu0  ;;  %v6035_v18 = vpop.f32.mrb[42].mxu1  ;;  %v2177_v38 = vsel %vm1297_vm1, %v1990_v10, 0.0 }
 0x170   : > { %8841 = vst [vmem:[#allocation44_spill] sm:$0xff] %v6033_v17  ;;  %8842 = vst [vmem:[#allocation45_spill] sm:$0xff] %v6035_v18  ;;  %2171 = vadd.xlane.f32.xlu0 %v2170_v58  ;;  %1839 = vadd.xlane.f32.xlu1 %v1838_v7  ;;  %v921_v31 = vpop.f32.mrb[43].mxu0  ;;  %v1173_v32 = vpop.f32.mrb[43].mxu1  ;;  %v2342_v7 = vadd.f32 %v2341_v37, %v2071_v26  ;;  %v1842_v26 = vadd.f32 %v1841_v6, %v5880_v42 }
 0x171   : > { %1340 = vst.msk [vmem:[%s5740_s21 + $0x158] sm:$0xff] %vm1297_vm1, %v921_v31  ;;  %1424 = vst.msk [vmem:[%s5740_s21 + $0x3f8] sm:$0xff] %vm1297_vm1, %v1173_v32  ;;  %v1572_v32 = vld [vmem:[%s5740_s21 + $0x358] sm:$0xff]  ;;  %v1678_v37 = vadd.f32 %v1677_v8, %v5891_v54  ;;  %v2178_v8 = vadd.f32 %v2177_v38, %v1989_v19  ;;  %v1490_v19 = vld [vmem:[%s5740_s21 + $0xc8] sm:$0xff] }
 0x173   : > { %v6046_v45 = vpop.f32.mrb[44].mxu0  ;;  %v6048_v46 = vpop.f32.mrb[44].mxu1 }
 0x174   : > { %8843 = vst [vmem:[#allocation46_spill] sm:$0xff] %v6046_v45  ;;  %8844 = vst [vmem:[#allocation47_spill] sm:$0xff] %v6048_v46  ;;  %2339 = vadd.xlane.f32.xlu0 %v2338_v33  ;;  %2175 = vadd.xlane.f32.xlu1 %v2174_v36  ;;  %v927_v53 = vpop.f32.mrb[45].mxu0  ;;  %v1179_v58 = vpop.f32.mrb[45].mxu1 }
 0x175   : > { %1342 = vst.msk [vmem:[%s5740_s21 + $0x168] sm:$0xff] %vm1297_vm1, %v927_v53  ;;  %1426 = vst.msk [vmem:[%s5740_s21 + $0x408] sm:$0xff] %vm1297_vm1, %v1179_v58  ;;  %v1845_v53 = vsel %vm1297_vm1, %v1572_v32, 0.0  ;;  %v2074_v58 = vmul.f32 %v1570_v49, %v1570_v49  ;;  %v2073_v49 = vmul.f32 %v5880_v42, %v5880_v42 }
 0x176   : > { %v1846_v10 = vadd.f32 %v1845_v53, %v5893_v55 }
 0x177   : > { %v6059_v14 = vpop.f32.mrb[46].mxu0  ;;  %v6061_v31 = vpop.f32.mrb[46].mxu1 }
 0x178   : > { %8845 = vst [vmem:[#allocation48_spill] sm:$0xff] %v6059_v14  ;;  %8846 = vst [vmem:[#allocation49_spill] sm:$0xff] %v6061_v31  ;;  %2343 = vadd.xlane.f32.xlu1 %v2342_v7  ;;  %1675 = vadd.xlane.f32.xlu0 %v1674_v5  ;;  %v933_v33 = vpop.f32.mrb[47].mxu0  ;;  %v1185_v36 = vpop.f32.mrb[47].mxu1  ;;  %v1992_v7 = vmul.f32 %v1488_v52, %v1488_v52  ;;  %v1991_v52 = vmul.f32 %v5891_v54, %v5891_v54 }
 0x179   : > { %1344 = vst.msk [vmem:[%s5740_s21 + $0x178] sm:$0xff] %vm1297_vm1, %v933_v33  ;;  %1428 = vst.msk [vmem:[%s5740_s21 + $0x418] sm:$0xff] %vm1297_vm1, %v1185_v36  ;;  %v2345_v36 = vsel %vm1297_vm1, %v2074_v58, 0.0 }
 0x17a   : > { %v2346_v58 = vadd.f32 %v2345_v36, %v2073_v49 }
 0x17b   : > { %v6074_v5 = vpop.f32.mrb[48].mxu0  ;;  %v6076_v16 = vpop.f32.mrb[48].mxu1 }
 0x17c   : > { %8847 = vst [vmem:[#allocation50_spill] sm:$0xff] %v6074_v5  ;;  %8848 = vst [vmem:[#allocation51_spill] sm:$0xff] %v6076_v16  ;;  %1843 = vadd.xlane.f32.xlu0 %v1842_v26  ;;  %1679 = vadd.xlane.f32.xlu1 %v1678_v37  ;;  %v939_v33 = vpop.f32.mrb[49].mxu0  ;;  %v1191_v6 = vpop.f32.mrb[49].mxu1  ;;  %v2181_v26 = vsel %vm1297_vm1, %v1992_v7, 0.0  ;;  %v2076_v37 = vmul.f32 %v1572_v32, %v1572_v32  ;;  %v2075_v32 = vmul.f32 %v5893_v55, %v5893_v55 }
 0x17d   : > { %1346 = vst.msk [vmem:[%s5740_s21 + $0x188] sm:$0xff] %vm1297_vm1, %v939_v33  ;;  %1430 = vst.msk [vmem:[%s5740_s21 + $0x428] sm:$0xff] %vm1297_vm1, %v1191_v6  ;;  %v2182_v7 = vadd.f32 %v2181_v26, %v1991_v52 }
 0x17e   : > { %v2349_v6 = vsel %vm1297_vm1, %v2076_v37, 0.0  ;;  %v1685_v37 = vsel %vm1297_vm1, %v1492_v25, 0.0 }
 0x17f   : > { %v6089_v48 = vpop.f32.mrb[50].mxu0  ;;  %v6091_v33 = vpop.f32.mrb[50].mxu1  ;;  %v2350_v52 = vadd.f32 %v2349_v6, %v2075_v32  ;;  %v1686_v32 = vadd.f32 %v1685_v37, %v5921_v27 }
 0x180   : > { %8849 = vst [vmem:[#allocation52_spill] sm:$0xff] %v6089_v48  ;;  %8850 = vst [vmem:[#allocation53_spill] sm:$0xff] %v6091_v33  ;;  %2179 = vadd.xlane.f32.xlu0 %v2178_v8  ;;  %1847 = vadd.xlane.f32.xlu1 %v1846_v10  ;;  %v945_v38 = vpop.f32.mrb[51].mxu0  ;;  %v1197_v53 = vpop.f32.mrb[51].mxu1  ;;  %v1681_v8 = vsel %vm1297_vm1, %v1490_v19, 0.0 }
 0x181   : > { %1348 = vst.msk [vmem:[%s5740_s21 + $0x198] sm:$0xff] %vm1297_vm1, %v945_v38  ;;  %1432 = vst.msk [vmem:[%s5740_s21 + $0x438] sm:$0xff] %vm1297_vm1, %v1197_v53  ;;  %v1574_v38 = vld [vmem:[%s5740_s21 + $0x368] sm:$0xff]  ;;  %v1682_v36 = vadd.f32 %v1681_v8, %v5906_v12  ;;  %v1994_v53 = vmul.f32 %v1490_v19, %v1490_v19  ;;  %v1993_v19 = vmul.f32 %v5906_v12, %v5906_v12  ;;  %v1853_v8 = vsel %vm1297_vm1, %v1576_v57, 0.0 }
 0x182   : > { %v1849_v26 = vsel %vm1297_vm1, %v1574_v38, 0.0  ;;  %v1854_v37 = vadd.f32 %v1853_v8, %v5923_v30 }
 0x183   : > { %v6102_v10 = vpop.f32.mrb[52].mxu0  ;;  %v6104_v42 = vpop.f32.mrb[52].mxu1  ;;  %v2185_v6 = vsel %vm1297_vm1, %v1994_v53, 0.0 }
 0x184   : > { %8851 = vst [vmem:[#allocation54_spill] sm:$0xff] %v6102_v10  ;;  %8852 = vst [vmem:[#allocation55_spill] sm:$0xff] %v6104_v42  ;;  %2347 = vadd.xlane.f32.xlu0 %v2346_v58  ;;  %2183 = vadd.xlane.f32.xlu1 %v2182_v7  ;;  %v951_v1 = vpop.f32.mrb[53].mxu0  ;;  %v1203_v49 = vpop.f32.mrb[53].mxu1 }
 0x185   : > { %1350 = vst.msk [vmem:[%s5740_s21 + $0x1a8] sm:$0xff] %vm1297_vm1, %v951_v1  ;;  %1434 = vst.msk [vmem:[%s5740_s21 + $0x448] sm:$0xff] %vm1297_vm1, %v1203_v49  ;;  %v1850_v1 = vadd.f32 %v1849_v26, %v5908_v13  ;;  %v2078_v49 = vmul.f32 %v1574_v38, %v1574_v38  ;;  %v2186_v26 = vadd.f32 %v2185_v6, %v1993_v19  ;;  %v1494_v19 = vld [vmem:[%s5740_s21 + $0xe8] sm:$0xff] }
 0x186   : > { %v1995_v38 = vmul.f32 %v5921_v27, %v5921_v27 }
 0x187   : > { %v6115_v58 = vpop.f32.mrb[54].mxu0  ;;  %v6117_v7 = vpop.f32.mrb[54].mxu1  ;;  %v2353_v53 = vsel %vm1297_vm1, %v2078_v49, 0.0 }
 0x188   : > { %8853 = vst [vmem:[#allocation56_spill] sm:$0xff] %v6115_v58  ;;  %8854 = vst [vmem:[#allocation57_spill] sm:$0xff] %v6117_v7  ;;  %2351 = vadd.xlane.f32.xlu1 %v2350_v52  ;;  %1683 = vadd.xlane.f32.xlu0 %v1682_v36  ;;  %v957_v55 = vpop.f32.mrb[55].mxu0  ;;  %v1209_v29 = vpop.f32.mrb[55].mxu1  ;;  %v1996_v52 = vmul.f32 %v1492_v25, %v1492_v25  ;;  %v2077_v25 = vmul.f32 %v5908_v13, %v5908_v13 }
 0x189   : > { %1352 = vst.msk [vmem:[%s5740_s21 + $0x1b8] sm:$0xff] %vm1297_vm1, %v957_v55  ;;  %1436 = vst.msk [vmem:[%s5740_s21 + $0x458] sm:$0xff] %vm1297_vm1, %v1209_v29 }
 0x18a   : > { %v2354_v49 = vadd.f32 %v2353_v53, %v2077_v25 }
 0x18b   : > { %v6130_v36 = vpop.f32.mrb[56].mxu0  ;;  %v6132_v3 = vpop.f32.mrb[56].mxu1 }
 0x18c   : > { %8855 = vst [vmem:[#allocation58_spill] sm:$0xff] %v6130_v36  ;;  %8856 = vst [vmem:[#allocation59_spill] sm:$0xff] %v6132_v3  ;;  %1851 = vadd.xlane.f32.xlu0 %v1850_v1  ;;  %1687 = vadd.xlane.f32.xlu1 %v1686_v32  ;;  %v963_v29 = vpop.f32.mrb[57].mxu0  ;;  %v1215_v55 = vpop.f32.mrb[57].mxu1  ;;  %v2189_v1 = vsel %vm1297_vm1, %v1996_v52, 0.0  ;;  %v2080_v32 = vmul.f32 %v1576_v57, %v1576_v57  ;;  %v2079_v57 = vmul.f32 %v5923_v30, %v5923_v30  ;;  %v1580_v30 = vld [vmem:[%s5740_s21 + $0x398] sm:$0xff] }
 0x18d   : > { %1354 = vst.msk [vmem:[%s5740_s21 + $0x1c8] sm:$0xff] %vm1297_vm1, %v963_v29  ;;  %1438 = vst.msk [vmem:[%s5740_s21 + $0x468] sm:$0xff] %vm1297_vm1, %v1215_v55  ;;  %v2190_v52 = vadd.f32 %v2189_v1, %v1995_v38 }
 0x18e   : > { %v2357_v55 = vsel %vm1297_vm1, %v2080_v32, 0.0  ;;  %v1693_v32 = vsel %vm1297_vm1, %v1496_v11, 0.0 }
 0x18f   : > { %v6145_v35 = vpop.f32.mrb[58].mxu0  ;;  %v6147_v29 = vpop.f32.mrb[58].mxu1  ;;  %v2358_v38 = vadd.f32 %v2357_v55, %v2079_v57  ;;  %v1694_v57 = vadd.f32 %v1693_v32, %v5947_v62 }
 0x190   : > { %8857 = vst [vmem:[#allocation60_spill] sm:$0xff] %v6145_v35  ;;  %8858 = vst [vmem:[#allocation61_spill] sm:$0xff] %v6147_v29  ;;  %2187 = vadd.xlane.f32.xlu0 %v2186_v26  ;;  %1855 = vadd.xlane.f32.xlu1 %v1854_v37  ;;  %v969_v6 = vpop.f32.mrb[59].mxu0  ;;  %v1221_v8 = vpop.f32.mrb[59].mxu1  ;;  %v1689_v26 = vsel %vm1297_vm1, %v1494_v19, 0.0 }
 0x191   : > { %1356 = vst.msk [vmem:[%s5740_s21 + $0x1d8] sm:$0xff] %vm1297_vm1, %v969_v6  ;;  %1440 = vst.msk [vmem:[%s5740_s21 + $0x478] sm:$0xff] %vm1297_vm1, %v1221_v8  ;;  %v1578_v6 = vld [vmem:[%s5740_s21 + $0x388] sm:$0xff]  ;;  %v1690_v53 = vadd.f32 %v1689_v26, %v5934_v43  ;;  %v1998_v8 = vmul.f32 %v1494_v19, %v1494_v19  ;;  %v1997_v19 = vmul.f32 %v5934_v43, %v5934_v43  ;;  %v1861_v26 = vsel %vm1297_vm1, %v1580_v30, 0.0 }
 0x192   : > { %v1857_v1 = vsel %vm1297_vm1, %v1578_v6, 0.0  ;;  %v1862_v32 = vadd.f32 %v1861_v26, %v5949_v63 }
 0x193   : > { %v6158_v37 = vpop.f32.mrb[60].mxu0  ;;  %v6160_v13 = vpop.f32.mrb[60].mxu1  ;;  %v2193_v55 = vsel %vm1297_vm1, %v1998_v8, 0.0 }
 0x194   : > { %8859 = vst [vmem:[#allocation62_spill] sm:$0xff] %v6158_v37  ;;  %8860 = vst [vmem:[#allocation63_spill] sm:$0xff] %v6160_v13  ;;  %2355 = vadd.xlane.f32.xlu0 %v2354_v49  ;;  %2191 = vadd.xlane.f32.xlu1 %v2190_v52  ;;  %v975_v61 = vpop.f32.mrb[61].mxu0  ;;  %v1227_v25 = vpop.f32.mrb[61].mxu1 }
 0x195   : > { %1358 = vst.msk [vmem:[%s5740_s21 + $0x1e8] sm:$0xff] %vm1297_vm1, %v975_v61  ;;  %1442 = vst.msk [vmem:[%s5740_s21 + $0x488] sm:$0xff] %vm1297_vm1, %v1227_v25  ;;  %v1858_v61 = vadd.f32 %v1857_v1, %v5936_v44  ;;  %v2082_v25 = vmul.f32 %v1578_v6, %v1578_v6  ;;  %v2194_v1 = vadd.f32 %v2193_v55, %v1997_v19  ;;  %v1498_v19 = vld [vmem:[%s5740_s21 + $0x108] sm:$0xff] }
 0x196   : > { %v1999_v6 = vmul.f32 %v5947_v62, %v5947_v62 }
 0x197   : > { %v6171_v49 = vpop.f32.mrb[62].mxu0  ;;  %v6173_v52 = vpop.f32.mrb[62].mxu1  ;;  %v2361_v8 = vsel %vm1297_vm1, %v2082_v25, 0.0 }
 0x198   : > { %8861 = vst [vmem:[#allocation64_spill] sm:$0xff] %v6171_v49  ;;  %8862 = vst [vmem:[#allocation65_spill] sm:$0xff] %v6173_v52  ;;  %2359 = vadd.xlane.f32.xlu1 %v2358_v38  ;;  %1691 = vadd.xlane.f32.xlu0 %v1690_v53  ;;  %v981_v12 = vpop.f32.mrb[63].mxu0  ;;  %v1233_v41 = vpop.f32.mrb[63].mxu1  ;;  %v2000_v38 = vmul.f32 %v1496_v11, %v1496_v11  ;;  %v2081_v11 = vmul.f32 %v5936_v44, %v5936_v44  ;;  %v1697_v44 = vsel %vm1297_vm1, %v1498_v19, 0.0 }
 0x199   : > { %1360 = vst.msk [vmem:[%s5740_s21 + $0x1f8] sm:$0xff] %vm1297_vm1, %v981_v12  ;;  %1444 = vst.msk [vmem:[%s5740_s21 + $0x498] sm:$0xff] %vm1297_vm1, %v1233_v41 }
 0x19a   : > { %v2362_v25 = vadd.f32 %v2361_v8, %v2081_v11 }
 0x19b   : > { %v6186_v53 = vpop.f32.mrb[64].mxu0  ;;  %v6188_v15 = vpop.f32.mrb[64].mxu1 }
 0x19c   : > { %8863 = vst [vmem:[#allocation66_spill] sm:$0xff] %v6186_v53  ;;  %8864 = vst [vmem:[#allocation67_spill] sm:$0xff] %v6188_v15  ;;  %1859 = vadd.xlane.f32.xlu0 %v1858_v61  ;;  %1695 = vadd.xlane.f32.xlu1 %v1694_v57  ;;  %v987_v41 = vpop.f32.mrb[65].mxu0  ;;  %v1239_v12 = vpop.f32.mrb[65].mxu1  ;;  %v2197_v61 = vsel %vm1297_vm1, %v2000_v38, 0.0  ;;  %v2084_v57 = vmul.f32 %v1580_v30, %v1580_v30  ;;  %v2083_v30 = vmul.f32 %v5949_v63, %v5949_v63  ;;  %v1584_v63 = vld [vmem:[%s5740_s21 + $0x3b8] sm:$0xff] }
 0x19d   : > { %1362 = vst.msk [vmem:[%s5740_s21 + $0x208] sm:$0xff] %vm1297_vm1, %v987_v41  ;;  %1446 = vst.msk [vmem:[%s5740_s21 + $0x4a8] sm:$0xff] %vm1297_vm1, %v1239_v12  ;;  %v2198_v12 = vadd.f32 %v2197_v61, %v1999_v6  ;;  %v1698_v6 = vadd.f32 %v1697_v44, %v5962_v20 }
 0x19e   : > { %v2365_v38 = vsel %vm1297_vm1, %v2084_v57, 0.0  ;;  %v1701_v57 = vsel %vm1297_vm1, %v1500_v47, 0.0  ;;  %v2205_v47 = vsel %vm1297_vm1, %v2004_v24, 0.0  ;;  %v1504_v24 = vld [vmem:[%s5740_s21 + $0x138] sm:$0xff] }
 0x19f   : > { %v6201_v43 = vpop.f32.mrb[66].mxu0  ;;  %v6203_v41 = vpop.f32.mrb[66].mxu1  ;;  %v2366_v11 = vadd.f32 %v2365_v38, %v2083_v30  ;;  %v1702_v30 = vadd.f32 %v1701_v57, %v5977_v39  ;;  %v2001_v38 = vmul.f32 %v5962_v20, %v5962_v20  ;;  %v2085_v57 = vmul.f32 %v5964_v21, %v5964_v21 }
 0x1a0   : > { %8865 = vst [vmem:[#allocation68_spill] sm:$0xff] %v6201_v43  ;;  %8866 = vst [vmem:[#allocation69_spill] sm:$0xff] %v6203_v41  ;;  %2195 = vadd.xlane.f32.xlu0 %v2194_v1  ;;  %1863 = vadd.xlane.f32.xlu1 %v1862_v32  ;;  %v993_v55 = vpop.f32.mrb[67].mxu0  ;;  %v1245_v26 = vpop.f32.mrb[67].mxu1  ;;  %v1582_v32 = vld [vmem:[%s5740_s21 + $0x3a8] sm:$0xff] }
 0x1a1   : > { %1364 = vst.msk [vmem:[%s5740_s21 + $0x218] sm:$0xff] %vm1297_vm1, %v993_v55  ;;  %1448 = vst.msk [vmem:[%s5740_s21 + $0x4b8] sm:$0xff] %vm1297_vm1, %v1245_v26  ;;  %v1865_v61 = vsel %vm1297_vm1, %v1582_v32, 0.0  ;;  %v2002_v26 = vmul.f32 %v1498_v19, %v1498_v19 }
 0x1a2   : > { %v1866_v44 = vadd.f32 %v1865_v61, %v5964_v21  ;;  %v1586_v21 = vld [vmem:[%s5740_s21 + $0x3c8] sm:$0xff] }
 0x1a3   : > { %v6214_v1 = vpop.f32.mrb[68].mxu0  ;;  %v6221_v8 = vpop.f32.mrb[68].mxu1 }
 0x1a4   : > { %8867 = vst [vmem:[#allocation70_spill] sm:$0xff] %v6214_v1  ;;  %2363 = vadd.xlane.f32.xlu0 %v2362_v25  ;;  %2199 = vadd.xlane.f32.xlu1 %v2198_v12  ;;  %v999_v55 = vpop.f32.mrb[69].mxu0  ;;  %8868 = vst [vmem:[#allocation71_spill] sm:$0xff] %v6221_v8  ;;  %v1251_v12 = vpop.f32.mrb[69].mxu1 }
 0x1a5   : > { %1366 = vst.msk [vmem:[%s5740_s21 + $0x228] sm:$0xff] %vm1297_vm1, %v999_v55  ;;  %1450 = vst.msk [vmem:[%s5740_s21 + $0x4c8] sm:$0xff] %vm1297_vm1, %v1251_v12  ;;  %v2201_v55 = vsel %vm1297_vm1, %v2002_v26, 0.0  ;;  %v2003_v26 = vmul.f32 %v5977_v39, %v5977_v39  ;;  %v2008_v39 = vmul.f32 %v1504_v24, %v1504_v24 }
 0x1a7   : > { %v6225_v25 = vpop.f32.mrb[70].mxu0  ;;  %v6236_v19 = vpop.f32.mrb[70].mxu1  ;;  %v2213_v27 = vsel %vm1297_vm1, %v2008_v39, 0.0  ;;  %v2091_v39 = vmul.f32 %v6005_v23, %v6005_v23 }
 0x1a8   : > { %8869 = vst [vmem:[#allocation72_spill] sm:$0xff] %v6225_v25  ;;  %2367 = vadd.xlane.f32.xlu1 %v2366_v11  ;;  %1699 = vadd.xlane.f32.xlu0 %v1698_v6  ;;  %v1005_v2 = vpop.f32.mrb[71].mxu0  ;;  %8870 = vst [vmem:[#allocation73_spill] sm:$0xff] %v6236_v19  ;;  %v1869_v11 = vsel %vm1297_vm1, %v1584_v63, 0.0  ;;  %v2086_v6 = vmul.f32 %v1582_v32, %v1582_v32  ;;  %v1257_v34 = vpop.f32.mrb[71].mxu1  ;;  %v2088_v32 = vmul.f32 %v1584_v63, %v1584_v63 }
 0x1a9   : > { %1368 = vst.msk [vmem:[%s5740_s21 + $0x238] sm:$0xff] %vm1297_vm1, %v1005_v2  ;;  %1452 = vst.msk [vmem:[%s5740_s21 + $0x4d8] sm:$0xff] %vm1297_vm1, %v1257_v34  ;;  %v2202_v2 = vadd.f32 %v2201_v55, %v2001_v38  ;;  %v1870_v61 = vadd.f32 %v1869_v11, %v5979_v40  ;;  %v1502_v34 = vld [vmem:[%s5740_s21 + $0x128] sm:$0xff]  ;;  %v2087_v38 = vmul.f32 %v5979_v40, %v5979_v40 }
 0x1aa   : > { %v2369_v12 = vsel %vm1297_vm1, %v2086_v6, 0.0  ;;  %v2373_v11 = vsel %vm1297_vm1, %v2088_v32, 0.0  ;;  %v1705_v6 = vsel %vm1297_vm1, %v1502_v34, 0.0  ;;  %v1709_v32 = vsel %vm1297_vm1, %v1504_v24, 0.0 }
 0x1ab   : > { %v6252_v55 = vpop.f32.mrb[72].mxu0  ;;  %v1710_v0 = vadd.f32 %v1709_v32, %v6003_v22 }
 0x1ac   : > { %1867 = vadd.xlane.f32.xlu0 %v1866_v44  ;;  %1703 = vadd.xlane.f32.xlu1 %v1702_v30  ;;  %v2370_v44 = vadd.f32 %v2369_v12, %v2085_v57  ;;  %v2206_v30 = vadd.f32 %v2205_v47, %v2003_v26  ;;  %8871 = vst [vmem:[#allocation74_spill] sm:$0xff] %v6252_v55  ;;  %v1011_v20 = vpop.f32.mrb[73].mxu0  ;;  %v1873_v57 = vsel %vm1297_vm1, %v1586_v21, 0.0  ;;  %v6262_v12 = vpop.f32.mrb[72].mxu1 }
 0x1ad   : > { %1370 = vst.msk [vmem:[%s5740_s21 + $0x248] sm:$0xff] %vm1297_vm1, %v1011_v20  ;;  %v2006_v26 = vmul.f32 %v1502_v34, %v1502_v34  ;;  %8872 = vst [vmem:[#allocation75_spill] sm:$0xff] %v6262_v12  ;;  %v1263_v40 = vpop.f32.mrb[73].mxu1  ;;  %v1874_v34 = vadd.f32 %v1873_v57, %v5992_v4  ;;  %v2089_v57 = vmul.f32 %v5992_v4, %v5992_v4 }
 0x1ae   : > { %1454 = vst.msk [vmem:[%s5740_s21 + $0x4e8] sm:$0xff] %vm1297_vm1, %v1263_v40 }
 0x1af   : > { %v6264_v47 = vpop.f32.mrb[74].mxu0 }
 0x1b0   : > { %2203 = vadd.xlane.f32.xlu0 %v2202_v2  ;;  %1871 = vadd.xlane.f32.xlu1 %v1870_v61  ;;  %v2374_v2 = vadd.f32 %v2373_v11, %v2087_v38  ;;  %v1706_v61 = vadd.f32 %v1705_v6, %v5990_v59  ;;  %8873 = vst [vmem:[#allocation76_spill] sm:$0xff] %v6264_v47 }
 0x1b1   : > { %v2005_v11 = vmul.f32 %v5990_v59, %v5990_v59  ;;  %v2090_v6 = vmul.f32 %v1586_v21, %v1586_v21  ;;  %v2007_v21 = vmul.f32 %v6003_v22, %v6003_v22 }
 0x1b3   : > { %v2377_v59 = vsel %vm1297_vm1, %v2090_v6, 0.0  ;;  %v2214_v6 = vadd.f32 %v2213_v27, %v2007_v21 }
 0x1b4   : > { %2371 = vadd.xlane.f32.xlu0 %v2370_v44  ;;  %2207 = vadd.xlane.f32.xlu1 %v2206_v30  ;;  %v1588_v44 = vld [vmem:[%s5740_s21 + $0x3d8] sm:$0xff]  ;;  %v1017_v30 = vpop.f32.mrb[75].mxu0 }
 0x1b5   : > { %v1636_v63 = vpop.xlane.xlu0 %1635  ;;  %1372 = vst.msk [vmem:[%s5740_s21 + $0x258] sm:$0xff] %vm1297_vm1, %v1017_v30  ;;  %v6280_v30 = vpop.f32.mrb[74].mxu1  ;;  %v2092_v9 = vmul.f32 %v1588_v44, %v1588_v44 }
 0x1b6   : > { %v6275_v62 = vmul.f32 0.0051020407, %v1636_v63  ;;  %8874 = vst [vmem:[#allocation77_spill] sm:$0xff] %v6280_v30  ;;  %v1269_v40 = vpop.f32.mrb[75].mxu1  ;;  %v6315_v21 = vpop.f32.mrb[76].mxu0 }
 0x1b7   : > { %1456 = vst.msk [vmem:[%s5740_s21 + $0x4f8] sm:$0xff] %vm1297_vm1, %v1269_v40  ;;  %v2378_v40 = vadd.f32 %v2377_v59, %v2089_v57  ;;  %v2381_v59 = vsel %vm1297_vm1, %v2092_v9, 0.0  ;;  %v1590_v57 = vld [vmem:[%s5740_s21 + $0x3e8] sm:$0xff]  ;;  %8881 = vst [vmem:[#allocation84_spill] sm:$0xff] %v6315_v21 }
 0x1b8   : > { %2375 = vadd.xlane.f32.xlu1 %v2374_v2  ;;  %1707 = vadd.xlane.f32.xlu0 %v1706_v61  ;;  %v2209_v2 = vsel %vm1297_vm1, %v2006_v26, 0.0  ;;  %v1877_v61 = vsel %vm1297_vm1, %v1588_v44, 0.0 }
 0x1b9   : > { %v1808_v20 = vpop.xlane.xlu1 %1807  ;;  %v1804_v38 = vpop.xlane.xlu0 %1803  ;;  %v2210_v32 = vadd.f32 %v2209_v2, %v2005_v11  ;;  %v1878_v26 = vadd.f32 %v1877_v61, %v6005_v23  ;;  %v1506_v11 = vld [vmem:[%s5740_s21 + $0x148] sm:$0xff] }
 0x1ba   : > { %v6295_v4 = vmul.f32 0.0051020407, %v1804_v38  ;;  %v1713_v27 = vsel %vm1297_vm1, %v1506_v11, 0.0  ;;  %v2010_v23 = vmul.f32 %v1506_v11, %v1506_v11 }
 0x1bc   : > { %1875 = vadd.xlane.f32.xlu0 %v1874_v34  ;;  %1711 = vadd.xlane.f32.xlu1 %v1710_v0  ;;  %v2641_v0 = vmul.f32 %v6275_v62, %v6275_v62  ;;  %v6293_v34 = vmul.f32 0.0051020407, %v1808_v20  ;;  %8876 = vst [vmem:[#allocation79_spill] sm:$0xff] %v6295_v4  ;;  %v6306_v44 = vmul.f32 %v6295_v4, %v6295_v4 }
 0x1bd   : > { %v2140_v24 = vpop.xlane.xlu0 %2139  ;;  %v2144_v63 = vpop.xlane.xlu1 %2143  ;;  %v2382_v4 = vadd.f32 %v2381_v59, %v2091_v39  ;;  %v2009_v39 = vmul.f32 %v6018_v50, %v6018_v50 }
 0x1be   : > { %8875 = vst [vmem:[#allocation78_spill] sm:$0xff] %v6293_v34  ;;  %v2557_v22 = vmul.f32 0.0051020407, %v2140_v24  ;;  %v6302_v20 = vmul.f32 %v6293_v34, %v6293_v34  ;;  %8878 = vst [vmem:[#allocation81_spill] sm:$0xff] %v6306_v44  ;;  %v1714_v34 = vadd.f32 %v1713_v27, %v6018_v50  ;;  %v2558_v11 = vmul.f32 0.0051020407, %v2144_v63 }
 0x1c0   : > { %v2725_v54 = vsub.f32 %v2557_v22, %v2641_v0  ;;  %2211 = vadd.xlane.f32.xlu0 %v2210_v32  ;;  %1879 = vadd.xlane.f32.xlu1 %v1878_v26  ;;  %8877 = vst [vmem:[#allocation80_spill] sm:$0xff] %v6302_v20  ;;  %v1508_v0 = vld [vmem:[%s5740_s21 + $0x158] sm:$0xff]  ;;  %v1881_v32 = vsel %vm1297_vm1, %v1590_v57, 0.0  ;;  %v2217_v20 = vsel %vm1297_vm1, %v2010_v23, 0.0  ;;  %v2093_v23 = vmul.f32 %v6020_v51, %v6020_v51 }
 0x1c1   : > { %v2308_v2 = vpop.xlane.xlu0 %2307  ;;  %v2312_v61 = vpop.xlane.xlu1 %2311  ;;  %v1717_v56 = vsel %vm1297_vm1, %v1508_v0, 0.0  ;;  %v1592_v26 = vld [vmem:[%s5740_s21 + $0x3f8] sm:$0xff]  ;;  %v1882_v28 = vadd.f32 %v1881_v32, %v6020_v51 }
 0x1c2   : > { %v6308_v22 = vmul.f32 0.0051020407, %v2308_v2  ;;  %v6310_v38 = vmul.f32 0.0051020407, %v2312_v61  ;;  %v2893_v24 = vadd.f32 0.001, %v2725_v54 }
 0x1c3   : > { %v1023_v2 = vpop.f32.mrb[77].mxu0 }
 0x1c4   : > { %8879 = vst [vmem:[#allocation82_spill] sm:$0xff] %v6308_v22  ;;  %8880 = vst [vmem:[#allocation83_spill] sm:$0xff] %v6310_v38  ;;  %2379 = vadd.xlane.f32.xlu0 %v2378_v40  ;;  %2215 = vadd.xlane.f32.xlu1 %v2214_v6  ;;  %5017 = vrsqrt.f32 %v2893_v24  ;;  %v6330_v40 = vpop.f32.mrb[76].mxu1  ;;  %v6332_v6 = vpop.f32.mrb[78].mxu0  ;;  %v2094_v24 = vmul.f32 %v1590_v57, %v1590_v57  ;;  %v2012_v38 = vmul.f32 %v1508_v0, %v1508_v0 }
 0x1c5   : > { %v1640_v61 = vpop.xlane.xlu0 %1639  ;;  %v1644_v54 = vpop.xlane.xlu1 %1643  ;;  %1374 = vst.msk [vmem:[%s5740_s21 + $0x268] sm:$0xff] %vm1297_vm1, %v1023_v2  ;;  %8882 = vst [vmem:[#allocation85_spill] sm:$0xff] %v6330_v40  ;;  %v1885_v57 = vsel %vm1297_vm1, %v1592_v26, 0.0 }
 0x1c6   : > { %v6324_v9 = vmul.f32 0.0051020407, %v1640_v61  ;;  %8883 = vst [vmem:[#allocation86_spill] sm:$0xff] %v6332_v6  ;;  %v1029_v59 = vpop.f32.mrb[79].mxu0  ;;  %v1275_v27 = vpop.f32.mrb[77].mxu1  ;;  %v1886_v44 = vadd.f32 %v1885_v57, %v6035_v18  ;;  %v2221_v51 = vsel %vm1297_vm1, %v2012_v38, 0.0  ;;  %v2095_v38 = vmul.f32 %v6035_v18, %v6035_v18 }
 0x1c7   : > { %1376 = vst.msk [vmem:[%s5740_s21 + $0x278] sm:$0xff] %vm1297_vm1, %v1029_v59  ;;  %1458 = vst.msk [vmem:[%s5740_s21 + $0x508] sm:$0xff] %vm1297_vm1, %v1275_v27  ;;  %v6344_v63 = vmul.f32 0.0051020407, %v1644_v54  ;;  %v6348_v50 = vpop.f32.mrb[78].mxu1  ;;  %v2218_v59 = vadd.f32 %v2217_v20, %v2009_v39  ;;  %v2011_v54 = vmul.f32 %v6033_v17, %v6033_v17 }
 0x1c8   : > { %v2642_v2 = vmul.f32 %v6324_v9, %v6324_v9  ;;  %2383 = vadd.xlane.f32.xlu1 %v2382_v4  ;;  %1715 = vadd.xlane.f32.xlu0 %v1714_v34  ;;  %v1718_v34 = vadd.f32 %v1717_v56, %v6033_v17  ;;  %8884 = vst [vmem:[#allocation87_spill] sm:$0xff] %v6348_v50  ;;  %v1281_v32 = vpop.f32.mrb[79].mxu1  ;;  %v2810_v50 = vld [vmem:[%s6367_s24 + $0x8] sm:$0xff] }
 0x1c9   : > { %v1812_v61 = vpop.xlane.xlu0 %1811  ;;  %v1648_v60 = vpop.xlane.xlu1 %1647  ;;  %1460 = vst.msk [vmem:[%s5740_s21 + $0x518] sm:$0xff] %vm1297_vm1, %v1281_v32 }
 0x1ca   : > { %v2726_v4 = vsub.f32 %v2558_v11, %v2642_v2  ;;  %v2385_v11 = vsel %vm1297_vm1, %v2094_v24, 0.0  ;;  %v6358_v56 = vmul.f32 0.0051020407, %v1812_v61  ;;  %v6371_v20 = vmul.f32 0.0051020407, %v1648_v60 }
 0x1cb   : > { %v2386_v61 = vadd.f32 %v2385_v11, %v2093_v23 }
 0x1cc   : > { %v2894_v0 = vadd.f32 0.001, %v2726_v4  ;;  %1883 = vadd.xlane.f32.xlu0 %v1882_v28  ;;  %1719 = vadd.xlane.f32.xlu1 %v1718_v34  ;;  %8885 = vst [vmem:[#allocation88_spill] sm:$0xff] %v6358_v56  ;;  %v2096_v4 = vmul.f32 %v1592_v26, %v1592_v26  ;;  %v2643_v28 = vmul.f32 %v6344_v63, %v6344_v63  ;;  %v1510_v26 = vld [vmem:[%s5740_s21 + $0x168] sm:$0xff] }
 0x1cd   : > { %v2148_v2 = vpop.xlane.xlu0 %2147  ;;  %v1816_v27 = vpop.xlane.xlu1 %1815  ;;  %v6378_v57 = vmul.f32 %v6358_v56, %v6358_v56  ;;  %v2644_v23 = vmul.f32 %v6371_v20, %v6371_v20  ;;  %v1721_v18 = vsel %vm1297_vm1, %v1510_v26, 0.0 }
 0x1ce   : > { %5019 = vrsqrt.f32 %v2894_v0  ;;  %v2559_v39 = vmul.f32 0.0051020407, %v2148_v2  ;;  %v5018_v34 = vpop.eup %5017  ;;  %v6380_v32 = vmul.f32 0.0051020407, %v1816_v27  ;;  %v2222_v2 = vadd.f32 %v2221_v51, %v2011_v54  ;;  %v1594_v51 = vld [vmem:[%s5740_s21 + $0x408] sm:$0xff]  ;;  %v1512_v54 = vld [vmem:[%s5740_s21 + $0x178] sm:$0xff] }
 0x1cf   : > { %8886 = vst [vmem:[#allocation89_spill] sm:$0xff] %v6378_v57  ;;  %v2016_v27 = vmul.f32 %v1512_v54, %v1512_v54 }
 0x1d0   : > { %v2727_v24 = vsub.f32 %v2559_v39, %v2643_v28  ;;  %2219 = vadd.xlane.f32.xlu0 %v2218_v59  ;;  %1887 = vadd.xlane.f32.xlu1 %v1886_v44  ;;  %8887 = vst [vmem:[#allocation90_spill] sm:$0xff] %v6380_v32  ;;  %v2389_v59 = vsel %vm1297_vm1, %v2096_v4, 0.0  ;;  %v2809_v44 = vld [vmem:[%s6367_s24] sm:$0xff] }
 0x1d1   : > { %v2316_v0 = vpop.xlane.xlu0 %2315  ;;  %v2152_v60 = vpop.xlane.xlu1 %2151  ;;  %v6393_v4 = vmul.f32 %v5018_v34, %v2809_v44  ;;  %v2390_v22 = vadd.f32 %v2389_v59, %v2095_v38  ;;  %v1725_v34 = vsel %vm1297_vm1, %v1512_v54, 0.0  ;;  %v2013_v38 = vmul.f32 %v6046_v45, %v6046_v45 }
 0x1d2   : > { %v2895_v11 = vadd.f32 0.001, %v2727_v24  ;;  %v6386_v28 = vmul.f32 0.0051020407, %v2316_v0  ;;  %v2560_v39 = vmul.f32 0.0051020407, %v2152_v60  ;;  %v2014_v0 = vmul.f32 %v1510_v26, %v1510_v26 }
 0x1d3   : > { %v6398_v60 = vmul.f32 %v6380_v32, %v6380_v32  ;;  %v1596_v26 = vld [vmem:[%s5740_s21 + $0x418] sm:$0xff]  ;;  %v2015_v54 = vmul.f32 %v6059_v14, %v6059_v14 }
 0x1d4   : > { %8888 = vst [vmem:[#allocation91_spill] sm:$0xff] %v6386_v28  ;;  %5021 = vrsqrt.f32 %v2895_v11  ;;  %v2728_v56 = vsub.f32 %v2560_v39, %v2644_v23  ;;  %2387 = vadd.xlane.f32.xlu0 %v2386_v61  ;;  %2223 = vadd.xlane.f32.xlu1 %v2222_v2  ;;  %v1722_v61 = vadd.f32 %v1721_v18, %v6046_v45  ;;  %v1889_v2 = vsel %vm1297_vm1, %v1594_v51, 0.0 }
 0x1d5   : > { %v2320_v17 = vpop.xlane.xlu1 %2319  ;;  %v1652_v24 = vpop.xlane.xlu0 %1651  ;;  %v2098_v39 = vmul.f32 %v1594_v51, %v1594_v51  ;;  %v2225_v23 = vsel %vm1297_vm1, %v2014_v0, 0.0  ;;  %v2097_v51 = vmul.f32 %v6048_v46, %v6048_v46  ;;  %v2811_v0 = vld [vmem:[%s6367_s24 + $0x10] sm:$0xff] }
 0x1d6   : > { %v2896_v11 = vadd.f32 0.001, %v2728_v56  ;;  %v6400_v6 = vmul.f32 0.0051020407, %v2320_v17  ;;  %v6412_v17 = vmul.f32 %v6393_v4, %v6275_v62  ;;  %v6416_v32 = vmul.f32 0.0051020407, %v1652_v24 }
 0x1d7   : > { %v2100_v24 = vmul.f32 %v1596_v26, %v1596_v26 }
 0x1d8   : > { %v5020_v44 = vpop.eup %5019  ;;  %2391 = vadd.xlane.f32.xlu1 %v2390_v22  ;;  %1723 = vadd.xlane.f32.xlu0 %v1722_v61  ;;  %8889 = vst [vmem:[#allocation92_spill] sm:$0xff] %v6412_v17  ;;  %5023 = vrsqrt.f32 %v2896_v11  ;;  %v1890_v22 = vadd.f32 %v1889_v2, %v6048_v46  ;;  %v1726_v61 = vadd.f32 %v1725_v34, %v6059_v14  ;;  %v6430_v11 = vpop.f32.mrb[80].mxu0 }
 0x1d9   : > { %v6414_v56 = vmul.f32 %v5020_v44, %v2810_v50  ;;  %v1820_v18 = vpop.xlane.xlu0 %1819  ;;  %v1656_v59 = vpop.xlane.xlu1 %1655  ;;  %v1893_v50 = vsel %vm1297_vm1, %v1596_v26, 0.0  ;;  %8892 = vst [vmem:[#allocation95_spill] sm:$0xff] %v6430_v11  ;;  %v2226_v44 = vadd.f32 %v2225_v23, %v2013_v38  ;;  %v2645_v46 = vmul.f32 %v6416_v32, %v6416_v32 }
 0x1da   : > { %v6433_v2 = vmul.f32 0.0051020407, %v1820_v18  ;;  %v6439_v17 = vmul.f32 0.0051020407, %v1656_v59  ;;  %v1894_v14 = vadd.f32 %v1893_v50, %v6061_v31  ;;  %v1035_v57 = vpop.f32.mrb[81].mxu0  ;;  %v2099_v18 = vmul.f32 %v6061_v31, %v6061_v31 }
 0x1db   : > { %8890 = vst [vmem:[#allocation93_spill] sm:$0xff] %v6414_v56  ;;  %v6423_v62 = vmul.f32 %v6414_v56, %v6324_v9  ;;  %v1514_v56 = vld [vmem:[%s5740_s21 + $0x188] sm:$0xff]  ;;  %1378 = vst.msk [vmem:[%s5740_s21 + $0x288] sm:$0xff] %vm1297_vm1, %v1035_v57 }
 0x1dc   : > { %1891 = vadd.xlane.f32.xlu0 %v1890_v22  ;;  %1727 = vadd.xlane.f32.xlu1 %v1726_v61  ;;  %8893 = vst [vmem:[#allocation96_spill] sm:$0xff] %v6433_v2  ;;  %v2393_v22 = vsel %vm1297_vm1, %v2098_v39, 0.0  ;;  %v2229_v61 = vsel %vm1297_vm1, %v2016_v27, 0.0  ;;  %v2397_v39 = vsel %vm1297_vm1, %v2100_v24, 0.0  ;;  %v6454_v50 = vmul.f32 %v6433_v2, %v6433_v2 }
 0x1dd   : > { %8891 = vst [vmem:[#allocation94_spill] sm:$0xff] %v6423_v62  ;;  %v2156_v9 = vpop.xlane.xlu0 %2155  ;;  %v1824_v34 = vpop.xlane.xlu1 %1823  ;;  %v2394_v38 = vadd.f32 %v2393_v22, %v2097_v51  ;;  %v2230_v59 = vadd.f32 %v2229_v61, %v2015_v54  ;;  %v2646_v51 = vmul.f32 %v6439_v17, %v6439_v17 }
 0x1de   : > { %v5022_v45 = vpop.eup %5021  ;;  %v2561_v26 = vmul.f32 0.0051020407, %v2156_v9  ;;  %v6450_v9 = vpop.f32.mrb[80].mxu1  ;;  %8896 = vst [vmem:[#allocation99_spill] sm:$0xff] %v6454_v50  ;;  %v6456_v28 = vmul.f32 0.0051020407, %v1824_v34 }
 0x1df   : > { %v6447_v23 = vmul.f32 %v5022_v45, %v2811_v0  ;;  %8895 = vst [vmem:[#allocation98_spill] sm:$0xff] %v6450_v9  ;;  %v1729_v45 = vsel %vm1297_vm1, %v1514_v56, 0.0 }
 0x1e0   : > { %v2729_v27 = vsub.f32 %v2561_v26, %v2645_v46  ;;  %2227 = vadd.xlane.f32.xlu0 %v2226_v44  ;;  %1895 = vadd.xlane.f32.xlu1 %v1894_v14  ;;  %8897 = vst [vmem:[#allocation100_spill] sm:$0xff] %v6456_v28  ;;  %v1598_v46 = vld [vmem:[%s5740_s21 + $0x428] sm:$0xff]  ;;  %v2812_v14 = vld [vmem:[%s6367_s24 + $0x18] sm:$0xff]  ;;  %v1287_v44 = vpop.f32.mrb[81].mxu1  ;;  %v6480_v22 = vmul.f32 %v6456_v28, %v6456_v28 }
 0x1e1   : > { %8894 = vst [vmem:[#allocation97_spill] sm:$0xff] %v6447_v23  ;;  %v2324_v31 = vpop.xlane.xlu0 %2323  ;;  %v2160_v62 = vpop.xlane.xlu1 %2159  ;;  %v6463_v57 = vmul.f32 %v6447_v23, %v6344_v63  ;;  %v1516_v26 = vld [vmem:[%s5740_s21 + $0x198] sm:$0xff]  ;;  %1462 = vst.msk [vmem:[%s5740_s21 + $0x528] sm:$0xff] %vm1297_vm1, %v1287_v44 }
 0x1e2   : > { %v2897_v54 = vadd.f32 0.001, %v2729_v27  ;;  %v6467_v24 = vmul.f32 0.0051020407, %v2324_v31  ;;  %v2562_v0 = vmul.f32 0.0051020407, %v2160_v62  ;;  %v5024_v34 = vpop.eup %5023  ;;  %v2398_v31 = vadd.f32 %v2397_v39, %v2099_v18 }
 0x1e3   : > { %8898 = vst [vmem:[#allocation101_spill] sm:$0xff] %v6463_v57  ;;  %v6474_v63 = vmul.f32 %v5024_v34, %v2812_v14  ;;  %v1730_v62 = vadd.f32 %v1729_v45, %v6074_v5  ;;  %v1897_v57 = vsel %vm1297_vm1, %v1598_v46, 0.0  ;;  %v1733_v14 = vsel %vm1297_vm1, %v1516_v26, 0.0 }
 0x1e4   : > { %8899 = vst [vmem:[#allocation102_spill] sm:$0xff] %v6467_v24  ;;  %5025 = vrsqrt.f32 %v2897_v54  ;;  %v2730_v61 = vsub.f32 %v2562_v0, %v2646_v51  ;;  %2395 = vadd.xlane.f32.xlu0 %v2394_v38  ;;  %2231 = vadd.xlane.f32.xlu1 %v2230_v59  ;;  %v2018_v54 = vmul.f32 %v1514_v56, %v1514_v56  ;;  %v1600_v0 = vld [vmem:[%s5740_s21 + $0x438] sm:$0xff] }
 0x1e5   : > { %8900 = vst [vmem:[#allocation103_spill] sm:$0xff] %v6474_v63  ;;  %v2328_v2 = vpop.xlane.xlu1 %2327  ;;  %v1660_v27 = vpop.xlane.xlu0 %1659  ;;  %v6486_v59 = vmul.f32 %v6474_v63, %v6371_v20  ;;  %v2017_v56 = vmul.f32 %v6074_v5, %v6074_v5  ;;  %v1898_v45 = vadd.f32 %v1897_v57, %v6076_v16  ;;  %v2102_v34 = vmul.f32 %v1598_v46, %v1598_v46  ;;  %v2813_v57 = vld [vmem:[%s6367_s24 + $0x20] sm:$0xff] }
 0x1e6   : > { %v2898_v38 = vadd.f32 0.001, %v2730_v61  ;;  %v6482_v51 = vmul.f32 0.0051020407, %v2328_v2  ;;  %v2233_v20 = vsel %vm1297_vm1, %v2018_v54, 0.0  ;;  %v1734_v61 = vadd.f32 %v1733_v14, %v6089_v48 }
 0x1e7   : > { %v6496_v44 = vmul.f32 0.0051020407, %v1660_v27  ;;  %v1901_v18 = vsel %vm1297_vm1, %v1600_v0, 0.0  ;;  %v2104_v5 = vmul.f32 %v1600_v0, %v1600_v0  ;;  %v2234_v54 = vadd.f32 %v2233_v20, %v2017_v56 }
 0x1e8   : > { %2399 = vadd.xlane.f32.xlu1 %v2398_v31  ;;  %1731 = vadd.xlane.f32.xlu0 %v1730_v62  ;;  %5027 = vrsqrt.f32 %v2898_v38  ;;  %v2020_v31 = vmul.f32 %v1516_v26, %v1516_v26  ;;  %v2101_v62 = vmul.f32 %v6076_v16, %v6076_v16  ;;  %v2019_v38 = vmul.f32 %v6089_v48, %v6089_v48 }
 0x1e9   : > { %v1828_v39 = vpop.xlane.xlu0 %1827  ;;  %v1664_v2 = vpop.xlane.xlu1 %1663  ;;  %v1902_v14 = vadd.f32 %v1901_v18, %v6091_v33  ;;  %v2401_v26 = vsel %vm1297_vm1, %v2102_v34, 0.0  ;;  %v2103_v18 = vmul.f32 %v6091_v33, %v6091_v33  ;;  %v2405_v20 = vsel %vm1297_vm1, %v2104_v5, 0.0  ;;  %v1518_v34 = vld [vmem:[%s5740_s21 + $0x1a8] sm:$0xff] }
 0x1ea   : > { %v6505_v28 = vmul.f32 0.0051020407, %v1828_v39  ;;  %v6511_v16 = vmul.f32 0.0051020407, %v1664_v2  ;;  %v2237_v0 = vsel %vm1297_vm1, %v2020_v31, 0.0  ;;  %v2402_v56 = vadd.f32 %v2401_v26, %v2101_v62 }
 0x1eb   : > { %v2406_v33 = vadd.f32 %v2405_v20, %v2103_v18 }
 0x1ec   : > { %1899 = vadd.xlane.f32.xlu0 %v1898_v45  ;;  %1735 = vadd.xlane.f32.xlu1 %v1734_v61  ;;  %8901 = vst [vmem:[#allocation104_spill] sm:$0xff] %v6505_v28  ;;  %v2647_v61 = vmul.f32 %v6496_v44, %v6496_v44  ;;  %v6522_v2 = vmul.f32 %v6505_v28, %v6505_v28  ;;  %v1602_v28 = vld [vmem:[%s5740_s21 + $0x448] sm:$0xff] }
 0x1ed   : > { %v2164_v46 = vpop.xlane.xlu0 %2163  ;;  %v1832_v27 = vpop.xlane.xlu1 %1831 }
 0x1ee   : > { %v5026_v45 = vpop.eup %5025  ;;  %v2563_v48 = vmul.f32 0.0051020407, %v2164_v46  ;;  %8903 = vst [vmem:[#allocation106_spill] sm:$0xff] %v6522_v2  ;;  %v6524_v46 = vmul.f32 0.0051020407, %v1832_v27  ;;  %v1905_v2 = vsel %vm1297_vm1, %v1602_v28, 0.0 }
 0x1ef   : > { %v6514_v39 = vmul.f32 %v5026_v45, %v2813_v57 }
 0x1f0   : > { %v2731_v63 = vsub.f32 %v2563_v48, %v2647_v61  ;;  %2235 = vadd.xlane.f32.xlu0 %v2234_v54  ;;  %1903 = vadd.xlane.f32.xlu1 %v1902_v14  ;;  %8904 = vst [vmem:[#allocation107_spill] sm:$0xff] %v6524_v46  ;;  %v2238_v48 = vadd.f32 %v2237_v0, %v2019_v38  ;;  %v2814_v54 = vld [vmem:[%s6367_s24 + $0x28] sm:$0xff]  ;;  %v1737_v61 = vsel %vm1297_vm1, %v1518_v34, 0.0  ;;  %v1520_v0 = vld [vmem:[%s5740_s21 + $0x1b8] sm:$0xff] }
 0x1f1   : > { %8902 = vst [vmem:[#allocation105_spill] sm:$0xff] %v6514_v39  ;;  %v2332_v31 = vpop.xlane.xlu0 %2331  ;;  %v2168_v57 = vpop.xlane.xlu1 %2167  ;;  %v6529_v62 = vmul.f32 %v6514_v39, %v6416_v32  ;;  %v6533_v14 = vmul.f32 %v6511_v16, %v6511_v16  ;;  %v6550_v39 = vmul.f32 %v6524_v46, %v6524_v46  ;;  %v1738_v38 = vadd.f32 %v1737_v61, %v6102_v10 }
 0x1f2   : > { %v2899_v5 = vadd.f32 0.001, %v2731_v63  ;;  %v6535_v26 = vmul.f32 0.0051020407, %v2332_v31  ;;  %v6537_v45 = vmul.f32 0.0051020407, %v2168_v57  ;;  %v5028_v27 = vpop.eup %5027  ;;  %v2022_v57 = vmul.f32 %v1518_v34, %v1518_v34 }
 0x1f3   : > { %8905 = vst [vmem:[#allocation108_spill] sm:$0xff] %v6529_v62  ;;  %v6546_v62 = vmul.f32 %v5028_v27, %v2814_v54  ;;  %v1906_v54 = vadd.f32 %v1905_v2, %v6104_v42  ;;  %v2021_v27 = vmul.f32 %v6102_v10, %v6102_v10  ;;  %v5277_v46 = vmov 0  }
 0x1f4   : > { %8906 = vst [vmem:[#allocation109_spill] sm:$0xff] %v6535_v26  ;;  %5029 = vrsqrt.f32 %v2899_v5  ;;  %2403 = vadd.xlane.f32.xlu0 %v2402_v56  ;;  %2239 = vadd.xlane.f32.xlu1 %v2238_v48  ;;  %v1741_v56 = vsel %vm1297_vm1, %v1520_v0, 0.0  ;;  %v1604_v48 = vld [vmem:[%s5740_s21 + $0x458] sm:$0xff]  ;;  %v2241_v61 = vsel %vm1297_vm1, %v2022_v57, 0.0  ;;  %v2105_v2 = vmul.f32 %v6104_v42, %v6104_v42 }
 0x1f5   : > { %v2336_v63 = vpop.xlane.xlu1 %2335  ;;  %v1668_v31 = vpop.xlane.xlu0 %1667  ;;  %8907 = vst [vmem:[#allocation110_spill] sm:$0xff] %v6546_v62  ;;  %v6560_v32 = vmul.f32 %v6546_v62, %v6439_v17  ;;  %5016 = vset.pattern.permute.xlu1 %v5277_v46  ;;  %5015 = vset.pattern.permute.xlu0 %v5277_v46  ;;  %v1742_v18 = vadd.f32 %v1741_v56, %v6115_v58 }
 0x1f6   : > { %v6552_v5 = vmul.f32 0.0051020407, %v2336_v63  ;;  %v2106_v63 = vmul.f32 %v1602_v28, %v1602_v28  ;;  %v6568_v17 = vmul.f32 0.0051020407, %v1668_v31  ;;  %v2023_v10 = vmul.f32 %v6115_v58, %v6115_v58  ;;  %v2815_v28 = vld [vmem:[%s6367_s24 + $0x30] sm:$0xff] }
 0x1f7   : > { %v2108_v57 = vmul.f32 %v1604_v48, %v1604_v48  ;;  %v2242_v26 = vadd.f32 %v2241_v61, %v2021_v27  ;;  %v2107_v61 = vmul.f32 %v6117_v7, %v6117_v7 }
 0x1f8   : > { %2407 = vadd.xlane.f32.xlu1 %v2406_v33  ;;  %1739 = vadd.xlane.f32.xlu0 %v1738_v38  ;;  %v1909_v33 = vsel %vm1297_vm1, %v1604_v48, 0.0  ;;  %v2024_v38 = vmul.f32 %v1520_v0, %v1520_v0  ;;  %v2409_v0 = vsel %vm1297_vm1, %v2106_v63, 0.0 }
 0x1f9   : > { %v1836_v20 = vpop.xlane.xlu0 %1835  ;;  %v1672_v34 = vpop.xlane.xlu1 %1671  ;;  %v1910_v56 = vadd.f32 %v1909_v33, %v6117_v7  ;;  %v2410_v27 = vadd.f32 %v2409_v0, %v2105_v2  ;;  %v2413_v63 = vsel %vm1297_vm1, %v2108_v57, 0.0  ;;  %v1522_v33 = vld [vmem:[%s5740_s21 + $0x1c8] sm:$0xff] }
 0x1fa   : > { %v6577_v62 = vmul.f32 0.0051020407, %v1836_v20  ;;  %v6583_v42 = vmul.f32 0.0051020407, %v1672_v34  ;;  %v2245_v48 = vsel %vm1297_vm1, %v2024_v38, 0.0 }
 0x1fc   : > { %1907 = vadd.xlane.f32.xlu0 %v1906_v54  ;;  %1743 = vadd.xlane.f32.xlu1 %v1742_v18  ;;  %8908 = vst [vmem:[#allocation111_spill] sm:$0xff] %v6577_v62  ;;  %v2649_v18 = vmul.f32 %v6568_v17, %v6568_v17  ;;  %v6594_v34 = vmul.f32 %v6577_v62, %v6577_v62 }
 0x1fd   : > { %v2172_v46 = vpop.xlane.xlu0 %2171  ;;  %v1840_v31 = vpop.xlane.xlu1 %1839  ;;  %v2650_v2 = vmul.f32 %v6583_v42, %v6583_v42  ;;  %v2414_v62 = vadd.f32 %v2413_v63, %v2107_v61  ;;  %v2025_v61 = vmul.f32 %v6130_v36, %v6130_v36 }
 0x1fe   : > { %v5030_v54 = vpop.eup %5029  ;;  %v2565_v58 = vmul.f32 0.0051020407, %v2172_v46  ;;  %8910 = vst [vmem:[#allocation113_spill] sm:$0xff] %v6594_v34  ;;  %v6596_v50 = vmul.f32 0.0051020407, %v1840_v31  ;;  %v2246_v46 = vadd.f32 %v2245_v48, %v2023_v10 }
 0x1ff   : > { %v6586_v20 = vmul.f32 %v5030_v54, %v2815_v28  ;;  %v1745_v54 = vsel %vm1297_vm1, %v1522_v33, 0.0 }
 0x200   : > { %v2733_v23 = vsub.f32 %v2565_v58, %v2649_v18  ;;  %2243 = vadd.xlane.f32.xlu0 %v2242_v26  ;;  %1911 = vadd.xlane.f32.xlu1 %v1910_v56  ;;  %8911 = vst [vmem:[#allocation114_spill] sm:$0xff] %v6596_v50  ;;  %v1606_v58 = vld [vmem:[%s5740_s21 + $0x468] sm:$0xff]  ;;  %v1524_v18 = vld [vmem:[%s5740_s21 + $0x1d8] sm:$0xff] }
 0x201   : > { %8909 = vst [vmem:[#allocation112_spill] sm:$0xff] %v6586_v20  ;;  %v2340_v38 = vpop.xlane.xlu0 %2339  ;;  %v2176_v28 = vpop.xlane.xlu1 %2175  ;;  %v6601_v26 = vmul.f32 %v6586_v20, %v6496_v44  ;;  %v1913_v7 = vsel %vm1297_vm1, %v1606_v58, 0.0 }
 0x202   : > { %v2901_v57 = vadd.f32 0.001, %v2733_v23  ;;  %v6605_v56 = vmul.f32 0.0051020407, %v2340_v38  ;;  %v2566_v0 = vmul.f32 0.0051020407, %v2176_v28  ;;  %v2026_v23 = vmul.f32 %v1522_v33, %v1522_v33 }
 0x203   : > { %8912 = vst [vmem:[#allocation115_spill] sm:$0xff] %v6601_v26  ;;  %v6614_v38 = vmul.f32 %v6596_v50, %v6596_v50  ;;  %v1746_v26 = vadd.f32 %v1745_v54, %v6130_v36  ;;  %v2110_v54 = vmul.f32 %v1606_v58, %v1606_v58 }
 0x204   : > { %8913 = vst [vmem:[#allocation116_spill] sm:$0xff] %v6605_v56  ;;  %5031 = vrsqrt.f32 %v2901_v57  ;;  %v2734_v10 = vsub.f32 %v2566_v0, %v2650_v2  ;;  %2411 = vadd.xlane.f32.xlu0 %v2410_v27  ;;  %2247 = vadd.xlane.f32.xlu1 %v2246_v46  ;;  %v1749_v2 = vsel %vm1297_vm1, %v1524_v18, 0.0  ;;  %v1608_v27 = vld [vmem:[%s5740_s21 + $0x478] sm:$0xff]  ;;  %v1914_v0 = vadd.f32 %v1913_v7, %v6132_v3 }
 0x205   : > { %v2344_v44 = vpop.xlane.xlu1 %2343  ;;  %v1676_v48 = vpop.xlane.xlu0 %1675  ;;  %v1750_v31 = vadd.f32 %v1749_v2, %v6145_v35  ;;  %v1917_v46 = vsel %vm1297_vm1, %v1608_v27, 0.0  ;;  %v2027_v7 = vmul.f32 %v6145_v35, %v6145_v35  ;;  %v2417_v34 = vsel %vm1297_vm1, %v2110_v54, 0.0 }
 0x206   : > { %v2902_v28 = vadd.f32 0.001, %v2734_v10  ;;  %v6616_v57 = vmul.f32 0.0051020407, %v2344_v44  ;;  %v2249_v10 = vsel %vm1297_vm1, %v2026_v23, 0.0  ;;  %v2112_v23 = vmul.f32 %v1608_v27, %v1608_v27  ;;  %v6649_v35 = vpop.f32.mrb[82].mxu1 }
 0x207   : > { %v6627_v44 = vmul.f32 0.0051020407, %v1676_v48  ;;  %v2817_v48 = vld [vmem:[%s6367_s24 + $0x40] sm:$0xff]  ;;  %v2250_v20 = vadd.f32 %v2249_v10, %v2025_v61  ;;  %8916 = vst [vmem:[#allocation119_spill] sm:$0xff] %v6649_v35  ;;  %v1293_v61 = vpop.f32.mrb[83].mxu1 }
 0x208   : > { %2415 = vadd.xlane.f32.xlu1 %v2414_v62  ;;  %1747 = vadd.xlane.f32.xlu0 %v1746_v26  ;;  %5033 = vrsqrt.f32 %v2902_v28  ;;  %v2028_v62 = vmul.f32 %v1524_v18, %v1524_v18  ;;  %v6631_v26 = vpop.f32.mrb[82].mxu0  ;;  %v2109_v28 = vmul.f32 %v6132_v3, %v6132_v3  ;;  %v1918_v18 = vadd.f32 %v1917_v46, %v6147_v29 }
 0x209   : > { %v1844_v63 = vpop.xlane.xlu0 %1843  ;;  %v1680_v33 = vpop.xlane.xlu1 %1679  ;;  %8914 = vst [vmem:[#allocation117_spill] sm:$0xff] %v6631_v26  ;;  %v2421_v56 = vsel %vm1297_vm1, %v2112_v23, 0.0  ;;  %1464 = vst.msk [vmem:[%s5740_s21 + $0x538] sm:$0xff] %vm1297_vm1, %v1293_v61 }
 0x20a   : > { %v1041_v58 = vpop.f32.mrb[83].mxu0  ;;  %v6638_v36 = vmul.f32 0.0051020407, %v1844_v63  ;;  %v6646_v27 = vmul.f32 0.0051020407, %v1680_v33  ;;  %v2253_v63 = vsel %vm1297_vm1, %v2028_v62, 0.0  ;;  %v2418_v54 = vadd.f32 %v2417_v34, %v2109_v28 }
 0x20b   : > { %1380 = vst.msk [vmem:[%s5740_s21 + $0x298] sm:$0xff] %vm1297_vm1, %v1041_v58  ;;  %v2111_v58 = vmul.f32 %v6147_v29, %v6147_v29  ;;  %v1526_v33 = vld [vmem:[%s5740_s21 + $0x1e8] sm:$0xff] }
 0x20c   : > { %1915 = vadd.xlane.f32.xlu0 %v1914_v0  ;;  %1751 = vadd.xlane.f32.xlu1 %v1750_v31  ;;  %8915 = vst [vmem:[#allocation118_spill] sm:$0xff] %v6638_v36  ;;  %v2651_v0 = vmul.f32 %v6627_v44, %v6627_v44  ;;  %v6661_v62 = vmul.f32 %v6638_v36, %v6638_v36  ;;  %v2818_v34 = vld [vmem:[%s6367_s24 + $0x48] sm:$0xff] }
 0x20d   : > { %v2180_v2 = vpop.xlane.xlu0 %2179  ;;  %v1848_v50 = vpop.xlane.xlu1 %1847  ;;  %v2652_v23 = vmul.f32 %v6646_v27, %v6646_v27 }
 0x20e   : > { %v5032_v31 = vpop.eup %5031  ;;  %v2567_v3 = vmul.f32 0.0051020407, %v2180_v2  ;;  %8918 = vst [vmem:[#allocation121_spill] sm:$0xff] %v6661_v62  ;;  %v6663_v2 = vmul.f32 0.0051020407, %v1848_v50  ;;  %v1753_v50 = vsel %vm1297_vm1, %v1526_v33, 0.0 }
 0x20f   : > { %v6651_v46 = vmul.f32 %v5032_v31, %v2817_v48 }
 0x210   : > { %v2735_v10 = vsub.f32 %v2567_v3, %v2651_v0  ;;  %2251 = vadd.xlane.f32.xlu0 %v2250_v20  ;;  %1919 = vadd.xlane.f32.xlu1 %v1918_v18  ;;  %8919 = vst [vmem:[#allocation122_spill] sm:$0xff] %v6663_v2  ;;  %v2254_v20 = vadd.f32 %v2253_v63, %v2027_v7  ;;  %v1610_v63 = vld [vmem:[%s5740_s21 + $0x488] sm:$0xff] }
 0x211   : > { %8917 = vst [vmem:[#allocation120_spill] sm:$0xff] %v6651_v46  ;;  %v2348_v48 = vpop.xlane.xlu0 %2347  ;;  %v2184_v3 = vpop.xlane.xlu1 %2183  ;;  %v6668_v28 = vmul.f32 %v6651_v46, %v6568_v17  ;;  %v1528_v17 = vld [vmem:[%s5740_s21 + $0x1f8] sm:$0xff]  ;;  %v2030_v46 = vmul.f32 %v1526_v33, %v1526_v33 }
 0x212   : > { %v2903_v18 = vadd.f32 0.001, %v2735_v10  ;;  %v6672_v31 = vmul.f32 0.0051020407, %v2348_v48  ;;  %v2568_v0 = vmul.f32 0.0051020407, %v2184_v3  ;;  %v5034_v61 = vpop.eup %5033  ;;  %v2422_v48 = vadd.f32 %v2421_v56, %v2111_v58 }
 0x213   : > { %8920 = vst [vmem:[#allocation123_spill] sm:$0xff] %v6668_v28  ;;  %v6679_v29 = vmul.f32 %v5034_v61, %v2818_v34  ;;  %v6683_v3 = vmul.f32 %v6663_v2, %v6663_v2  ;;  %v1612_v58 = vld [vmem:[%s5740_s21 + $0x498] sm:$0xff]  ;;  %v2114_v61 = vmul.f32 %v1610_v63, %v1610_v63  ;;  %v2257_v56 = vsel %vm1297_vm1, %v2030_v46, 0.0 }
 0x214   : > { %8921 = vst [vmem:[#allocation124_spill] sm:$0xff] %v6672_v31  ;;  %5035 = vrsqrt.f32 %v2903_v18  ;;  %v2736_v7 = vsub.f32 %v2568_v0, %v2652_v23  ;;  %2419 = vadd.xlane.f32.xlu0 %v2418_v54  ;;  %2255 = vadd.xlane.f32.xlu1 %v2254_v20  ;;  %v1754_v23 = vadd.f32 %v1753_v50, %v6158_v37  ;;  %v1921_v54 = vsel %vm1297_vm1, %v1610_v63, 0.0 }
 0x215   : > { %v2352_v28 = vpop.xlane.xlu1 %2351  ;;  %v1684_v10 = vpop.xlane.xlu0 %1683  ;;  %v1757_v20 = vsel %vm1297_vm1, %v1528_v17, 0.0  ;;  %v6692_v34 = vmul.f32 %v6679_v29, %v6583_v42  ;;  %v2029_v0 = vmul.f32 %v6158_v37, %v6158_v37  ;;  %v2032_v50 = vmul.f32 %v1528_v17, %v1528_v17 }
 0x216   : > { %v2904_v18 = vadd.f32 0.001, %v2736_v7  ;;  %v6685_v24 = vmul.f32 0.0051020407, %v2352_v28  ;;  %v6699_v7 = vmul.f32 0.0051020407, %v1684_v10  ;;  %v1922_v42 = vadd.f32 %v1921_v54, %v6160_v13 }
 0x217   : > { %8922 = vst [vmem:[#allocation125_spill] sm:$0xff] %v6692_v34  ;;  %v1758_v36 = vadd.f32 %v1757_v20, %v6171_v49  ;;  %v2031_v63 = vmul.f32 %v6171_v49, %v6171_v49  ;;  %v2116_v17 = vmul.f32 %v1612_v58, %v1612_v58  ;;  %v2819_v10 = vld [vmem:[%s6367_s24 + $0x50] sm:$0xff]  ;;  %v2258_v20 = vadd.f32 %v2257_v56, %v2029_v0 }
 0x218   : > { %2423 = vadd.xlane.f32.xlu1 %v2422_v48  ;;  %1755 = vadd.xlane.f32.xlu0 %v1754_v23  ;;  %5037 = vrsqrt.f32 %v2904_v18  ;;  %v1925_v48 = vsel %vm1297_vm1, %v1612_v58, 0.0  ;;  %v2113_v18 = vmul.f32 %v6160_v13, %v6160_v13  ;;  %v2425_v46 = vsel %vm1297_vm1, %v2114_v61, 0.0 }
 0x219   : > { %v1852_v33 = vpop.xlane.xlu0 %1851  ;;  %v1688_v28 = vpop.xlane.xlu1 %1687  ;;  %v2261_v2 = vsel %vm1297_vm1, %v2032_v50, 0.0  ;;  %v1926_v58 = vadd.f32 %v1925_v48, %v6173_v52  ;;  %v2115_v49 = vmul.f32 %v6173_v52, %v6173_v52  ;;  %v2429_v31 = vsel %vm1297_vm1, %v2116_v17, 0.0 }
 0x21a   : > { %v6710_v23 = vmul.f32 0.0051020407, %v1852_v33  ;;  %v6716_v62 = vmul.f32 0.0051020407, %v1688_v28  ;;  %v1530_v33 = vld [vmem:[%s5740_s21 + $0x208] sm:$0xff]  ;;  %v2426_v61 = vadd.f32 %v2425_v46, %v2113_v18  ;;  %v2262_v50 = vadd.f32 %v2261_v2, %v2031_v63 }
 0x21b   : > { %v1761_v52 = vsel %vm1297_vm1, %v1530_v33, 0.0 }
 0x21c   : > { %1923 = vadd.xlane.f32.xlu0 %v1922_v42  ;;  %1759 = vadd.xlane.f32.xlu1 %v1758_v36  ;;  %8923 = vst [vmem:[#allocation126_spill] sm:$0xff] %v6710_v23  ;;  %v2653_v36 = vmul.f32 %v6699_v7, %v6699_v7  ;;  %v6727_v28 = vmul.f32 %v6710_v23, %v6710_v23 }
 0x21d   : > { %v2188_v54 = vpop.xlane.xlu0 %2187  ;;  %v1856_v37 = vpop.xlane.xlu1 %1855  ;;  %v2654_v2 = vmul.f32 %v6716_v62, %v6716_v62 }
 0x21e   : > { %v5036_v42 = vpop.eup %5035  ;;  %v2569_v13 = vmul.f32 0.0051020407, %v2188_v54  ;;  %8925 = vst [vmem:[#allocation128_spill] sm:$0xff] %v6727_v28  ;;  %v6729_v54 = vmul.f32 0.0051020407, %v1856_v37 }
 0x21f   : > { %v6722_v56 = vmul.f32 %v5036_v42, %v2819_v10  ;;  %v1614_v10 = vld [vmem:[%s5740_s21 + $0x4a8] sm:$0xff]  ;;  %v2820_v42 = vld [vmem:[%s6367_s24 + $0x58] sm:$0xff] }
 0x220   : > { %v2737_v0 = vsub.f32 %v2569_v13, %v2653_v36  ;;  %2259 = vadd.xlane.f32.xlu0 %v2258_v20  ;;  %1927 = vadd.xlane.f32.xlu1 %v1926_v58  ;;  %8926 = vst [vmem:[#allocation129_spill] sm:$0xff] %v6729_v54  ;;  %v1532_v36 = vld [vmem:[%s5740_s21 + $0x218] sm:$0xff] }
 0x221   : > { %8924 = vst [vmem:[#allocation127_spill] sm:$0xff] %v6722_v56  ;;  %v2356_v48 = vpop.xlane.xlu0 %2355  ;;  %v2192_v34 = vpop.xlane.xlu1 %2191  ;;  %v6736_v13 = vmul.f32 %v6722_v56, %v6627_v44 }
 0x222   : > { %v2905_v18 = vadd.f32 0.001, %v2737_v0  ;;  %v6740_v63 = vmul.f32 0.0051020407, %v2356_v48  ;;  %v2570_v17 = vmul.f32 0.0051020407, %v2192_v34  ;;  %v5038_v37 = vpop.eup %5037  ;;  %v1762_v0 = vadd.f32 %v1761_v52, %v6186_v53 }
 0x223   : > { %8927 = vst [vmem:[#allocation130_spill] sm:$0xff] %v6736_v13  ;;  %v6745_v58 = vmul.f32 %v5038_v37, %v2820_v42  ;;  %v2430_v13 = vadd.f32 %v2429_v31, %v2115_v49  ;;  %v1929_v48 = vsel %vm1297_vm1, %v1614_v10, 0.0  ;;  %v2034_v34 = vmul.f32 %v1530_v33, %v1530_v33  ;;  %v1616_v42 = vld [vmem:[%s5740_s21 + $0x4b8] sm:$0xff] }
 0x224   : > { %5039 = vrsqrt.f32 %v2905_v18  ;;  %v2738_v46 = vsub.f32 %v2570_v17, %v2654_v2  ;;  %2427 = vadd.xlane.f32.xlu0 %v2426_v61  ;;  %2263 = vadd.xlane.f32.xlu1 %v2262_v50  ;;  %v6751_v18 = vmul.f32 %v6729_v54, %v6729_v54  ;;  %v1765_v50 = vsel %vm1297_vm1, %v1532_v36, 0.0 }
 0x225   : > { %v2360_v44 = vpop.xlane.xlu1 %2359  ;;  %v1692_v23 = vpop.xlane.xlu0 %1691  ;;  %v6757_v61 = vmul.f32 %v6745_v58, %v6646_v27  ;;  %v2118_v52 = vmul.f32 %v1614_v10, %v1614_v10  ;;  %v1930_v17 = vadd.f32 %v1929_v48, %v6188_v15  ;;  %v2033_v37 = vmul.f32 %v6186_v53, %v6186_v53  ;;  %v2821_v48 = vld [vmem:[%s6367_s24 + $0x60] sm:$0xff] }
 0x226   : > { %v2906_v20 = vadd.f32 0.001, %v2738_v46  ;;  %v6753_v2 = vmul.f32 0.0051020407, %v2360_v44  ;;  %v2265_v27 = vsel %vm1297_vm1, %v2034_v34, 0.0  ;;  %v1766_v44 = vadd.f32 %v1765_v50, %v6201_v43 }
 0x227   : > { %v6767_v46 = vmul.f32 0.0051020407, %v1692_v23  ;;  %v1933_v49 = vsel %vm1297_vm1, %v1616_v42, 0.0  ;;  %v2117_v10 = vmul.f32 %v6188_v15, %v6188_v15  ;;  %v2266_v50 = vadd.f32 %v2265_v27, %v2033_v37 }
 0x228   : > { %2431 = vadd.xlane.f32.xlu1 %v2430_v13  ;;  %1763 = vadd.xlane.f32.xlu0 %v1762_v0  ;;  %5041 = vrsqrt.f32 %v2906_v20  ;;  %v2036_v13 = vmul.f32 %v1532_v36, %v1532_v36  ;;  %v2433_v20 = vsel %vm1297_vm1, %v2118_v52, 0.0  ;;  %v2035_v0 = vmul.f32 %v6201_v43, %v6201_v43 }
 0x229   : > { %v1860_v31 = vpop.xlane.xlu0 %1859  ;;  %v1696_v33 = vpop.xlane.xlu1 %1695  ;;  %v1934_v36 = vadd.f32 %v1933_v49, %v6203_v41  ;;  %v2655_v15 = vmul.f32 %v6767_v46, %v6767_v46  ;;  %v2434_v28 = vadd.f32 %v2433_v20, %v2117_v10  ;;  %v2119_v49 = vmul.f32 %v6203_v41, %v6203_v41 }
 0x22a   : > { %v6777_v53 = vmul.f32 0.0051020407, %v1860_v31  ;;  %v6784_v52 = vmul.f32 0.0051020407, %v1696_v33  ;;  %v2269_v43 = vsel %vm1297_vm1, %v2036_v13, 0.0 }
 0x22c   : > { %1931 = vadd.xlane.f32.xlu0 %v1930_v17  ;;  %1767 = vadd.xlane.f32.xlu1 %v1766_v44  ;;  %8928 = vst [vmem:[#allocation131_spill] sm:$0xff] %v6777_v53  ;;  %v2120_v17 = vmul.f32 %v1616_v42, %v1616_v42  ;;  %v1534_v42 = vld [vmem:[%s5740_s21 + $0x228] sm:$0xff]  ;;  %v6794_v37 = vmul.f32 %v6777_v53, %v6777_v53 }
 0x22d   : > { %v2196_v23 = vpop.xlane.xlu0 %2195  ;;  %v6779_v34 = vpop.xlane.xlu1 %1863 }
 0x22e   : > { %v5040_v44 = vpop.eup %5039  ;;  %v2571_v54 = vmul.f32 0.0051020407, %v2196_v23  ;;  %8930 = vst [vmem:[#allocation133_spill] sm:$0xff] %v6794_v37  ;;  %v2270_v23 = vadd.f32 %v2269_v43, %v2035_v0  ;;  %v2437_v13 = vsel %vm1297_vm1, %v2120_v17, 0.0  ;;  %v1536_v17 = vld [vmem:[%s5740_s21 + $0x238] sm:$0xff] }
 0x22f   : > { %v6787_v31 = vmul.f32 %v5040_v44, %v2821_v48  ;;  %v2822_v48 = vld [vmem:[%s6367_s24 + $0x68] sm:$0xff]  ;;  %v1769_v44 = vsel %vm1297_vm1, %v1534_v42, 0.0 }
 0x230   : > { %v2739_v56 = vsub.f32 %v2571_v54, %v2655_v15  ;;  %2267 = vadd.xlane.f32.xlu0 %v2266_v50  ;;  %1935 = vadd.xlane.f32.xlu1 %v1934_v36  ;;  %v2656_v54 = vmul.f32 %v6784_v52, %v6784_v52 }
 0x231   : > { %8929 = vst [vmem:[#allocation132_spill] sm:$0xff] %v6787_v31  ;;  %v2364_v27 = vpop.xlane.xlu0 %2363  ;;  %v2200_v33 = vpop.xlane.xlu1 %2199  ;;  %v6800_v15 = vmul.f32 %v6787_v31, %v6699_v7  ;;  %v1618_v7 = vld [vmem:[%s5740_s21 + $0x4c8] sm:$0xff]  ;;  %v2038_v31 = vmul.f32 %v1534_v42, %v1534_v42  ;;  %v2037_v42 = vmul.f32 %v6214_v1, %v6214_v1 }
 0x232   : > { %v2907_v10 = vadd.f32 0.001, %v2739_v56  ;;  %v6804_v20 = vmul.f32 0.0051020407, %v2364_v27  ;;  %v2572_v50 = vmul.f32 0.0051020407, %v2200_v33  ;;  %v5042_v36 = vpop.eup %5041  ;;  %v2438_v27 = vadd.f32 %v2437_v13, %v2119_v49 }
 0x233   : > { %8931 = vst [vmem:[#allocation134_spill] sm:$0xff] %v6800_v15  ;;  %v6811_v53 = vmul.f32 %v5042_v36, %v2822_v48  ;;  %v1770_v15 = vadd.f32 %v1769_v44, %v6214_v1  ;;  %v1620_v48 = vld [vmem:[%s5740_s21 + $0x4d8] sm:$0xff]  ;;  %v2273_v36 = vsel %vm1297_vm1, %v2038_v31, 0.0 }
 0x234   : > { %5043 = vrsqrt.f32 %v2907_v10  ;;  %v2740_v0 = vsub.f32 %v2572_v50, %v2656_v54  ;;  %2435 = vadd.xlane.f32.xlu0 %v2434_v28  ;;  %2271 = vadd.xlane.f32.xlu1 %v2270_v23  ;;  %v1937_v28 = vsel %vm1297_vm1, %v1618_v7, 0.0  ;;  %v1773_v23 = vsel %vm1297_vm1, %v1536_v17, 0.0 }
 0x235   : > { %v6813_v41 = vpop.xlane.xlu1 %2367  ;;  %v1700_v56 = vpop.xlane.xlu0 %1699  ;;  %v6818_v10 = vmul.f32 %v6811_v53, %v6716_v62  ;;  %v1938_v62 = vadd.f32 %v1937_v28, %v6221_v8  ;;  %v1774_v50 = vadd.f32 %v1773_v23, %v6225_v25  ;;  %v1941_v44 = vsel %vm1297_vm1, %v1620_v48, 0.0 }
 0x236   : > { %v2908_v33 = vadd.f32 0.001, %v2740_v0  ;;  %v6829_v13 = vmul.f32 0.0051020407, %v1700_v56  ;;  %v2040_v0 = vmul.f32 %v1536_v17, %v1536_v17  ;;  %v2274_v1 = vadd.f32 %v2273_v36, %v2037_v42 }
 0x237   : > { %v2121_v56 = vmul.f32 %v6221_v8, %v6221_v8  ;;  %v2039_v17 = vmul.f32 %v6225_v25, %v6225_v25  ;;  %v1538_v8 = vld [vmem:[%s5740_s21 + $0x248] sm:$0xff] }
 0x238   : > { %2439 = vadd.xlane.f32.xlu1 %v2438_v27  ;;  %1771 = vadd.xlane.f32.xlu0 %v1770_v15  ;;  %5045 = vrsqrt.f32 %v2908_v33  ;;  %v2122_v15 = vmul.f32 %v1618_v7, %v1618_v7  ;;  %v2823_v27 = vld [vmem:[%s6367_s24 + $0x70] sm:$0xff]  ;;  %v2657_v31 = vmul.f32 %v6829_v13, %v6829_v13  ;;  %v1942_v7 = vadd.f32 %v1941_v44, %v6236_v19  ;;  %v2824_v44 = vld [vmem:[%s6367_s24 + $0x78] sm:$0xff] }
 0x239   : > { %v6823_v54 = vpop.xlane.xlu0 %1867  ;;  %v6825_v49 = vpop.xlane.xlu1 %1703 }
 0x23a   : > { %8932 = vst [vmem:[#allocation135_spill] sm:$0xff] %v6823_v54  ;;  %v2124_v54 = vmul.f32 %v1620_v48, %v1620_v48 }
 0x23c   : > { %1939 = vadd.xlane.f32.xlu0 %v1938_v62  ;;  %1775 = vadd.xlane.f32.xlu1 %v1774_v50  ;;  %v2441_v62 = vsel %vm1297_vm1, %v2122_v15, 0.0  ;;  %v2277_v50 = vsel %vm1297_vm1, %v2040_v0, 0.0 }
 0x23d   : > { %v2204_v33 = vpop.xlane.xlu0 %2203  ;;  %v6836_v43 = vpop.xlane.xlu1 %1871  ;;  %v2442_v0 = vadd.f32 %v2441_v62, %v2121_v56  ;;  %v2278_v48 = vadd.f32 %v2277_v50, %v2039_v17 }
 0x23e   : > { %v5044_v28 = vpop.eup %5043  ;;  %v2573_v23 = vmul.f32 0.0051020407, %v2204_v33 }
 0x23f   : > { %v6847_v42 = vmul.f32 %v5044_v28, %v2823_v27  ;;  %v2123_v27 = vmul.f32 %v6236_v19, %v6236_v19  ;;  %v2445_v28 = vsel %vm1297_vm1, %v2124_v54, 0.0 }
 0x240   : > { %v2741_v36 = vsub.f32 %v2573_v23, %v2657_v31  ;;  %2275 = vadd.xlane.f32.xlu0 %v2274_v1  ;;  %1943 = vadd.xlane.f32.xlu1 %v1942_v7  ;;  %v1777_v31 = vsel %vm1297_vm1, %v1538_v8, 0.0  ;;  %v1622_v23 = vld [vmem:[%s5740_s21 + $0x4e8] sm:$0xff]  ;;  %v1540_v7 = vld [vmem:[%s5740_s21 + $0x258] sm:$0xff] }
 0x241   : > { %8933 = vst [vmem:[#allocation136_spill] sm:$0xff] %v6847_v42  ;;  %v6850_v37 = vpop.xlane.xlu0 %2371  ;;  %v6852_v33 = vpop.xlane.xlu1 %2207  ;;  %v6857_v25 = vmul.f32 %v6847_v42, %v6767_v46  ;;  %v2446_v17 = vadd.f32 %v2445_v28, %v2123_v27  ;;  %v1778_v62 = vadd.f32 %v1777_v31, %v6252_v55  ;;  %v1945_v50 = vsel %vm1297_vm1, %v1622_v23, 0.0 }
 0x242   : > { %8934 = vst [vmem:[#allocation137_spill] sm:$0xff] %v6850_v37  ;;  %v2909_v15 = vadd.f32 0.001, %v2741_v36  ;;  %v5046_v1 = vpop.eup %5045  ;;  %v1781_v36 = vsel %vm1297_vm1, %v1540_v7, 0.0  ;;  %v1946_v27 = vadd.f32 %v1945_v50, %v6262_v12  ;;  %v2126_v19 = vmul.f32 %v1622_v23, %v1622_v23 }
 0x243   : > { %8935 = vst [vmem:[#allocation138_spill] sm:$0xff] %v6857_v25  ;;  %v6865_v37 = vmul.f32 %v5046_v1, %v2824_v44  ;;  %v1624_v44 = vld [vmem:[%s5740_s21 + $0x4f8] sm:$0xff]  ;;  %v1782_v1 = vadd.f32 %v1781_v36, %v6264_v47 }
 0x244   : > { %5047 = vrsqrt.f32 %v2909_v15  ;;  %2443 = vadd.xlane.f32.xlu0 %v2442_v0  ;;  %2279 = vadd.xlane.f32.xlu1 %v2278_v48  ;;  %v2042_v15 = vmul.f32 %v1538_v8, %v1538_v8  ;;  %v1949_v31 = vsel %vm1297_vm1, %v1624_v44, 0.0  ;;  %v2044_v8 = vmul.f32 %v1540_v7, %v1540_v7 }
 0x245   : > { %v6867_v46 = vpop.xlane.xlu1 %2375  ;;  %v6869_v56 = vpop.xlane.xlu0 %1707  ;;  %v6874_v54 = vmul.f32 %v6865_v37, %v6784_v52  ;;  %v2041_v52 = vmul.f32 %v6252_v55, %v6252_v55  ;;  %v1950_v36 = vadd.f32 %v1949_v31, %v6280_v30  ;;  %v2125_v55 = vmul.f32 %v6262_v12, %v6262_v12 }
 0x246   : > { %8936 = vst [vmem:[#allocation139_spill] sm:$0xff] %v6869_v56  ;;  %v2281_v28 = vsel %vm1297_vm1, %v2042_v15, 0.0  ;;  %v2043_v15 = vmul.f32 %v6264_v47, %v6264_v47  ;;  %v2449_v23 = vsel %vm1297_vm1, %v2126_v19, 0.0  ;;  %v2285_v7 = vsel %vm1297_vm1, %v2044_v8, 0.0 }
 0x247   : > { %v2282_v42 = vadd.f32 %v2281_v28, %v2041_v52  ;;  %v1542_v52 = vld [vmem:[%s5740_s21 + $0x268] sm:$0xff]  ;;  %v2450_v47 = vadd.f32 %v2449_v23, %v2125_v55  ;;  %v2127_v8 = vmul.f32 %v6280_v30, %v6280_v30 }
 0x248   : > { %2447 = vadd.xlane.f32.xlu1 %v2446_v17  ;;  %1779 = vadd.xlane.f32.xlu0 %v1778_v62  ;;  %v2825_v17 = vld [vmem:[%s6367_s24 + $0x80] sm:$0xff]  ;;  %v2286_v19 = vadd.f32 %v2285_v7, %v2043_v15  ;;  %v2046_v7 = vmul.f32 %v1542_v52, %v1542_v52 }
 0x249   : > { %v6879_v0 = vpop.xlane.xlu0 %1875  ;;  %v6881_v48 = vpop.xlane.xlu1 %1711 }
 0x24a   : > { %8937 = vst [vmem:[#allocation140_spill] sm:$0xff] %v6879_v0 }
 0x24c   : > { %1947 = vadd.xlane.f32.xlu0 %v1946_v27  ;;  %1783 = vadd.xlane.f32.xlu1 %v1782_v1  ;;  %v2128_v27 = vmul.f32 %v1624_v44, %v1624_v44 }
 0x24d   : > { %v6890_v62 = vpop.xlane.xlu0 %2211  ;;  %v6892_v25 = vpop.xlane.xlu1 %1879 }
 0x24e   : > { %8938 = vst [vmem:[#allocation141_spill] sm:$0xff] %v6890_v62  ;;  %v5048_v50 = vpop.eup %5047  ;;  %v2453_v44 = vsel %vm1297_vm1, %v2128_v27, 0.0  ;;  %v1628_v27 = vld [vmem:[%s5740_s21 + $0x518] sm:$0xff] }
 0x24f   : > { %v6901_v1 = vmul.f32 %v5048_v50, %v2825_v17  ;;  %v1626_v17 = vld [vmem:[%s5740_s21 + $0x508] sm:$0xff]  ;;  %v1544_v50 = vld [vmem:[%s5740_s21 + $0x278] sm:$0xff] }
 0x250   : > { %2283 = vadd.xlane.f32.xlu0 %v2282_v42  ;;  %1951 = vadd.xlane.f32.xlu1 %v1950_v36  ;;  %v1785_v42 = vsel %vm1297_vm1, %v1542_v52, 0.0  ;;  %v1953_v15 = vsel %vm1297_vm1, %v1626_v17, 0.0  ;;  %v1789_v23 = vsel %vm1297_vm1, %v1544_v50, 0.0  ;;  %v2130_v52 = vmul.f32 %v1626_v17, %v1626_v17 }
 0x251   : > { %8939 = vst [vmem:[#allocation142_spill] sm:$0xff] %v6901_v1  ;;  %v6904_v28 = vpop.xlane.xlu0 %2379  ;;  %v6906_v31 = vpop.xlane.xlu1 %2215  ;;  %v6910_v12 = vmul.f32 %v6901_v1, %v6829_v13  ;;  %v2454_v13 = vadd.f32 %v2453_v44, %v2127_v8  ;;  %v1786_v55 = vadd.f32 %v1785_v42, %v6315_v21  ;;  %v2045_v8 = vmul.f32 %v6315_v21, %v6315_v21  ;;  %v1546_v21 = vld [vmem:[%s5740_s21 + $0x288] sm:$0xff] }
 0x252   : > { %8940 = vst [vmem:[#allocation143_spill] sm:$0xff] %v6904_v28  ;;  %v2289_v44 = vsel %vm1297_vm1, %v2046_v7, 0.0  ;;  %v1957_v42 = vsel %vm1297_vm1, %v1628_v27, 0.0  ;;  %v2457_v17 = vsel %vm1297_vm1, %v2130_v52, 0.0 }
 0x253   : > { %8941 = vst [vmem:[#allocation144_spill] sm:$0xff] %v6910_v12  ;;  %v8944_v12 = vld [vmem:[#allocation86_spill] sm:$0xff]  ;;  %v2290_v0 = vadd.f32 %v2289_v44, %v2045_v8  ;;  %v1793_v44 = vsel %vm1297_vm1, %v1546_v21, 0.0 }
 0x254   : > { %2451 = vadd.xlane.f32.xlu0 %v2450_v47  ;;  %2287 = vadd.xlane.f32.xlu1 %v2286_v19  ;;  %v1954_v19 = vadd.f32 %v1953_v15, %v6330_v40  ;;  %v1790_v1 = vadd.f32 %v1789_v23, %v8944_v12  ;;  %v2129_v23 = vmul.f32 %v6330_v40, %v6330_v40 }
 0x255   : > { %v6918_v36 = vpop.xlane.xlu1 %2383  ;;  %v6920_v28 = vpop.xlane.xlu0 %1715  ;;  %v2047_v7 = vmul.f32 %v8944_v12, %v8944_v12  ;;  %v1630_v12 = vld [vmem:[%s5740_s21 + $0x528] sm:$0xff] }
 0x256   : > { %8942 = vst [vmem:[#allocation145_spill] sm:$0xff] %v6920_v28  ;;  %v8946_v28 = vld [vmem:[#allocation87_spill] sm:$0xff] }
 0x257   : > { %v1958_v15 = vadd.f32 %v1957_v42, %v8946_v28  ;;  %v2458_v42 = vadd.f32 %v2457_v17, %v2129_v23  ;;  %v2131_v40 = vmul.f32 %v8946_v28, %v8946_v28  ;;  %v8950_v23 = vld [vmem:[#allocation81_spill] sm:$0xff] }
 0x258   : > { %2455 = vadd.xlane.f32.xlu1 %v2454_v13  ;;  %1787 = vadd.xlane.f32.xlu0 %v1786_v55  ;;  %v2048_v13 = vmul.f32 %v1544_v50, %v1544_v50 }
 0x259   : > { %v6926_v30 = vpop.xlane.xlu0 %1883  ;;  %v6928_v47 = vpop.xlane.xlu1 %1719 }
 0x25a   : > { %8943 = vst [vmem:[#allocation146_spill] sm:$0xff] %v6926_v30  ;;  %v2293_v50 = vsel %vm1297_vm1, %v2048_v13, 0.0  ;;  %v1961_v13 = vsel %vm1297_vm1, %v1630_v12, 0.0 }
 0x25c   : > { %1955 = vadd.xlane.f32.xlu0 %v1954_v19  ;;  %1791 = vadd.xlane.f32.xlu1 %v1790_v1  ;;  %v2132_v1 = vmul.f32 %v1628_v27, %v1628_v27  ;;  %v1794_v27 = vadd.f32 %v1793_v44, %v6430_v11 }
 0x25d   : > { %v6936_v55 = vpop.xlane.xlu0 %2219  ;;  %v6938_v30 = vpop.xlane.xlu1 %1887 }
 0x25e   : > { %8945 = vst [vmem:[#allocation147_spill] sm:$0xff] %v6936_v55  ;;  %v2294_v55 = vadd.f32 %v2293_v50, %v2047_v7  ;;  %v2461_v62 = vsel %vm1297_vm1, %v2132_v1, 0.0  ;;  %v1962_v1 = vadd.f32 %v1961_v13, %v6450_v9 }
 0x25f   : > { %v2462_v50 = vadd.f32 %v2461_v62, %v2131_v40  ;;  %v2133_v40 = vmul.f32 %v6450_v9, %v6450_v9 }
 0x260   : > { %2291 = vadd.xlane.f32.xlu0 %v2290_v0  ;;  %1959 = vadd.xlane.f32.xlu1 %v1958_v15  ;;  %v2050_v15 = vmul.f32 %v1546_v21, %v1546_v21  ;;  %v2134_v21 = vmul.f32 %v1630_v12, %v1630_v12  ;;  %v2851_v12 = vld [vmem:[%s6367_s24 + $0x150] sm:$0xff] }
 0x261   : > { %v6948_v19 = vpop.xlane.xlu0 %2387  ;;  %v6950_v8 = vpop.xlane.xlu1 %2223 }
 0x262   : > { %8947 = vst [vmem:[#allocation148_spill] sm:$0xff] %v6948_v19  ;;  %v8949_v19 = vld [vmem:[#allocation82_spill] sm:$0xff]  ;;  %v2297_v28 = vsel %vm1297_vm1, %v2050_v15, 0.0  ;;  %v2465_v13 = vsel %vm1297_vm1, %v2134_v21, 0.0  ;;  %v8958_v21 = vld [vmem:[#allocation83_spill] sm:$0xff] }
 0x263   : > { %v8951_v7 = vsub.f32 %v8949_v19, %v8950_v23  ;;  %v2466_v23 = vadd.f32 %v2465_v13, %v2133_v40 }
 0x264   : > { %2459 = vadd.xlane.f32.xlu0 %v2458_v42  ;;  %2295 = vadd.xlane.f32.xlu1 %v2294_v55  ;;  %v2049_v55 = vmul.f32 %v6430_v11, %v6430_v11 }
 0x265   : > { %v6958_v0 = vpop.xlane.xlu1 %2391  ;;  %v6960_v52 = vpop.xlane.xlu0 %1723  ;;  %v2935_v17 = vadd.f32 0.001, %v8951_v7 }
 0x266   : > { %8948 = vst [vmem:[#allocation149_spill] sm:$0xff] %v6960_v52  ;;  %v2298_v19 = vadd.f32 %v2297_v28, %v2049_v55 }
 0x267   : > { %5049 = vrsqrt.f32 %v2935_v17 }
 0x268   : > { %2463 = vadd.xlane.f32.xlu1 %v2462_v50  ;;  %1795 = vadd.xlane.f32.xlu0 %v1794_v27 }
 0x269   : > { %v6969_v44 = vpop.xlane.xlu0 %1891  ;;  %v6971_v42 = vpop.xlane.xlu1 %1727 }
 0x26a   : > { %8952 = vst [vmem:[#allocation82_spill] sm:$0xff] %v6969_v44  ;;  %v2816_v44 = vld [vmem:[%s6367_s24 + $0x38] sm:$0xff] }
 0x26c   : > { %1963 = vadd.xlane.f32.xlu0 %v1962_v1 }
 0x26d   : > { %v6976_v62 = vpop.xlane.xlu0 %2227  ;;  %v6978_v27 = vpop.xlane.xlu1 %1895 }
 0x26e   : > { %8953 = vst [vmem:[#allocation81_spill] sm:$0xff] %v6976_v62 }
 0x270   : > { %2299 = vadd.xlane.f32.xlu0 %v2298_v19  ;;  %v8959_v19 = vld [vmem:[#allocation80_spill] sm:$0xff] }
 0x271   : > { %v6981_v7 = vpop.xlane.xlu0 %2395  ;;  %v6983_v50 = vpop.xlane.xlu1 %2231  ;;  %v8960_v40 = vsub.f32 %v8958_v21, %v8959_v19 }
 0x272   : > { %8954 = vst [vmem:[#allocation150_spill] sm:$0xff] %v6981_v7  ;;  %v5050_v15 = vpop.eup %5049 }
 0x273   : > { %v6990_v1 = vmul.f32 %v5050_v15, %v2851_v12  ;;  %v2936_v13 = vadd.f32 0.001, %v8960_v40  ;;  %v8963_v12 = vsub.f32 %v6400_v6, %v6398_v60  ;;  %v3146_v60 = vld [vmem:[%s7029_s27 + $0x8] sm:$0xff] }
 0x274   : > { %2467 = vadd.xlane.f32.xlu0 %v2466_v23 }
 0x275   : > { %v6986_v17 = vpop.xlane.xlu1 %2399  ;;  %v6988_v28 = vpop.xlane.xlu0 %1731  ;;  %8956 = vst [vmem:[#allocation152_spill] sm:$0xff] %v6990_v1  ;;  %5051 = vrsqrt.f32 %v2936_v13  ;;  %v2852_v13 = vld [vmem:[%s6367_s24 + $0x158] sm:$0xff] }
 0x276   : > { %8955 = vst [vmem:[#allocation151_spill] sm:$0xff] %v6988_v28 }
 0x279   : > { %v6992_v55 = vpop.xlane.xlu0 %1899  ;;  %v6994_v11 = vpop.xlane.xlu1 %1735  ;;  %3609 = vperm.xlu1 %5016, %v6990_v1  }
 0x27a   : > { %8957 = vst [vmem:[#allocation153_spill] sm:$0xff] %v6992_v55  ;;  %v2938_v55 = vadd.f32 0.001, %v8963_v12 }
 0x27c   : > { %5053 = vrsqrt.f32 %v2938_v55 }
 0x27d   : > { %v7000_v23 = vpop.xlane.xlu0 %2235  ;;  %v7002_v9 = vpop.xlane.xlu1 %1903 }
 0x27e   : > { %8961 = vst [vmem:[#allocation83_spill] sm:$0xff] %v7000_v23 }
 0x27f   : > { %v5052_v21 = vpop.eup %5051 }
 0x280   : > { %v7031_v6 = vmul.f32 %v5052_v21, %v2852_v13  ;;  %v2854_v13 = vld [vmem:[%s6367_s24 + $0x168] sm:$0xff] }
 0x281   : > { %v7004_v28 = vpop.xlane.xlu0 %2403  ;;  %v7006_v15 = vpop.xlane.xlu1 %2239 }
 0x282   : > { %8962 = vst [vmem:[#allocation80_spill] sm:$0xff] %v7004_v28  ;;  %v8966_v28 = vsub.f32 %v6482_v51, %v6480_v22  ;;  %8967 = vst [vmem:[#allocation156_spill] sm:$0xff] %v7031_v6  ;;  %v8970_v51 = vld [vmem:[#allocation94_spill] sm:$0xff] }
 0x284   : > { %v2940_v23 = vadd.f32 0.001, %v8966_v28  ;;  %v3314_v28 = vsub.f32 %v3146_v60, %v8970_v51  ;;  %v3148_v60 = vld [vmem:[%s7029_s27 + $0x18] sm:$0xff] }
 0x285   : > { %v7011_v7 = vpop.xlane.xlu1 %2407  ;;  %v7013_v1 = vpop.xlane.xlu0 %1739  ;;  %v3316_v51 = vsub.f32 %v3148_v60, %v6486_v59 }
 0x286   : > { %8964 = vst [vmem:[#allocation154_spill] sm:$0xff] %v7013_v1  ;;  %5055 = vrsqrt.f32 %v2940_v23 }
 0x289   : > { %v7015_v19 = vpop.xlane.xlu0 %1907  ;;  %v7017_v40 = vpop.xlane.xlu1 %1743 }
 0x28a   : > { %8965 = vst [vmem:[#allocation155_spill] sm:$0xff] %v7015_v19  ;;  %3399 = vperm.xlu0 %5015, %v6393_v4   ;;  %v8969_v4 = vsub.f32 %v6537_v45, %v6533_v14  ;;  %v5054_v19 = vpop.eup %5053 }
 0x28c   : > { %v2900_v22 = vadd.f32 0.001, %v8969_v4  ;;  %v1548_v4 = vld [vmem:[%s5740_s21 + $0x298] sm:$0xff] }
 0x28d   : > { %v7034_v55 = vpop.xlane.xlu0 %2243  ;;  %v7036_v12 = vpop.xlane.xlu1 %1911 }
 0x28e   : > { %8968 = vst [vmem:[#allocation157_spill] sm:$0xff] %v7034_v55  ;;  %3614 = vperm.xlu0 %5015, %v7031_v6   ;;  %5057 = vrsqrt.f32 %v2900_v22  ;;  %v8972_v6 = vsub.f32 %v6552_v5, %v6550_v39  ;;  %v7051_v55 = vmul.f32 %v5054_v19, %v2854_v13  ;;  %v1797_v22 = vsel %vm1297_vm1, %v1548_v4, 0.0  ;;  %v2856_v19 = vld [vmem:[%s6367_s24 + $0x178] sm:$0xff] }
 0x28f   : > { %v1798_v13 = vadd.f32 %v1797_v22, %v6631_v26 }
 0x290   : > { %v2942_v23 = vadd.f32 0.001, %v8972_v6  ;;  %8973 = vst [vmem:[#allocation158_spill] sm:$0xff] %v7051_v55  ;;  %v1632_v6 = vld [vmem:[%s5740_s21 + $0x538] sm:$0xff] }
 0x291   : > { %v7043_v1 = vpop.xlane.xlu0 %2411  ;;  %v7045_v21 = vpop.xlane.xlu1 %2247  ;;  %v2136_v62 = vmul.f32 %v1632_v6, %v1632_v6 }
 0x292   : > { %8971 = vst [vmem:[#allocation94_spill] sm:$0xff] %v7043_v1  ;;  %3992 = vperm.xlu0 %5015, %v3314_v28   ;;  %5059 = vrsqrt.f32 %v2942_v23  ;;  %v5056_v28 = vpop.eup %5055  ;;  %v1965_v23 = vsel %vm1297_vm1, %v1632_v6, 0.0  ;;  %v3152_v6 = vld [vmem:[%s7029_s27 + $0x38] sm:$0xff] }
 0x295   : > { %v7053_v14 = vpop.xlane.xlu1 %2415  ;;  %v7055_v45 = vpop.xlane.xlu0 %1747 }
 0x296   : > { %8974 = vst [vmem:[#allocation159_spill] sm:$0xff] %v7055_v45  ;;  %3624 = vperm.xlu0 %5015, %v7051_v55   ;;  %v7069_v45 = vmul.f32 %v5056_v28, %v2856_v19  ;;  %v2052_v55 = vmul.f32 %v1548_v4, %v1548_v4  ;;  %v1966_v28 = vadd.f32 %v1965_v23, %v6649_v35 }
 0x297   : > { %v2051_v4 = vmul.f32 %v6631_v26, %v6631_v26  ;;  %v2135_v23 = vmul.f32 %v6649_v35, %v6649_v35 }
 0x298   : > { %8976 = vst [vmem:[#allocation161_spill] sm:$0xff] %v7069_v45  ;;  %v5058_v59 = vpop.eup %5057 }
 0x299   : > { %v7062_v39 = vpop.xlane.xlu0 %1915  ;;  %v7064_v5 = vpop.xlane.xlu1 %1751 }
 0x29a   : > { %8975 = vst [vmem:[#allocation160_spill] sm:$0xff] %v7062_v39  ;;  %4002 = vperm.xlu0 %5015, %v3316_v51   ;;  %v3150_v39 = vld [vmem:[%s7029_s27 + $0x28] sm:$0xff]  ;;  %v8978_v51 = vsub.f32 %v6616_v57, %v6614_v38 }
 0x29b   : > { %v3318_v19 = vsub.f32 %v3150_v39, %v6560_v32 }
 0x29c   : > { %v2944_v22 = vadd.f32 0.001, %v8978_v51  ;;  %v5060_v52 = vpop.eup %5059 }
 0x29d   : > { %v7072_v60 = vpop.xlane.xlu0 %2251  ;;  %v7074_v1 = vpop.xlane.xlu1 %1919  ;;  %1799 = vadd.xlane.f32.xlu1 %v1798_v13  ;;  %v7087_v13 = vmul.f32 %v5058_v59, %v2816_v44 }
 0x29e   : > { %8977 = vst [vmem:[#allocation162_spill] sm:$0xff] %v7072_v60  ;;  %3634 = vperm.xlu0 %5015, %v7069_v45   ;;  %v2301_v60 = vsel %vm1297_vm1, %v2052_v55, 0.0  ;;  %v2858_v45 = vld [vmem:[%s6367_s24 + $0x188] sm:$0xff]  ;;  %5061 = vrsqrt.f32 %v2944_v22  ;;  %v2469_v55 = vsel %vm1297_vm1, %v2136_v62, 0.0 }
 0x29f   : > { %v2302_v57 = vadd.f32 %v2301_v60, %v2051_v4  ;;  %v7096_v32 = vmul.f32 %v5060_v52, %v2858_v45  ;;  %v3236_v44 = vmul.f32 %v7087_v13, %v6511_v16  ;;  %v2470_v59 = vadd.f32 %v2469_v55, %v2135_v23  ;;  %v3154_v23 = vld [vmem:[%s7029_s27 + $0x48] sm:$0xff] }
 0x2a0   : > { %v8980_v52 = vsub.f32 %v6685_v24, %v6683_v3  ;;  %v8982_v24 = vld [vmem:[#allocation91_spill] sm:$0xff]  ;;  %v8983_v3 = vld [vmem:[#allocation89_spill] sm:$0xff] }
 0x2a1   : > { %v7089_v56 = vpop.xlane.xlu0 %2419  ;;  %1967 = vadd.xlane.f32.xlu1 %v1966_v28  ;;  %v7092_v38 = vpop.xlane.xlu1 %2255  ;;  %8979 = vst [vmem:[#allocation163_spill] sm:$0xff] %v7096_v32  ;;  %v3320_v51 = vsub.f32 %v3152_v6, %v3236_v44  ;;  %v2860_v28 = vld [vmem:[%s6367_s24 + $0x198] sm:$0xff]  ;;  %v8984_v55 = vsub.f32 %v8982_v24, %v8983_v3  ;;  %v2862_v24 = vld [vmem:[%s6367_s24 + $0x1a8] sm:$0xff]  ;;  %v3145_v3 = vld [vmem:[%s7029_s27] sm:$0xff] }
 0x2a2   : > { %4012 = vperm.xlu0 %5015, %v3318_v19   ;;  %v2946_v62 = vadd.f32 0.001, %v8980_v52 }
 0x2a3   : > { %v2937_v44 = vadd.f32 0.001, %v8984_v55 }
 0x2a4   : > { %5063 = vrsqrt.f32 %v2946_v62 }
 0x2a5   : > { %v7101_v39 = vpop.xlane.xlu0 %1755  ;;  %2303 = vadd.xlane.f32.xlu1 %v2302_v57  ;;  %v7105_v60 = vpop.xlane.xlu1 %2423  ;;  %5065 = vrsqrt.f32 %v2937_v44  ;;  %v8990_v44 = vld [vmem:[#allocation92_spill] sm:$0xff] }
 0x2a6   : > { %3644 = vperm.xlu0 %5015, %v7096_v32  }
 0x2a8   : > { %v5062_v16 = vpop.eup %5061 }
 0x2a9   : > { %v7107_v22 = vpop.xlane.xlu0 %1923  ;;  %2471 = vadd.xlane.f32.xlu1 %v2470_v59  ;;  %v7115_v4 = vpop.xlane.xlu1 %1759  ;;  %v7118_v19 = vmul.f32 %v5062_v16, %v2860_v28  ;;  %v8985_v59 = vld [vmem:[#allocation125_spill] sm:$0xff]  ;;  %v7136_v28 = vmul.f32 0.0051020407, %v6779_v34 }
 0x2aa   : > { %4022 = vperm.xlu0 %5015, %v3320_v51   ;;  %v3322_v51 = vsub.f32 %v3154_v23, %v8985_v59  ;;  %v8988_v23 = vld [vmem:[#allocation93_spill] sm:$0xff]  ;;  %v3313_v59 = vsub.f32 %v3145_v3, %v8990_v44  ;;  %v2853_v3 = vld [vmem:[%s6367_s24 + $0x160] sm:$0xff]  ;;  %v8992_v44 = vld [vmem:[#allocation99_spill] sm:$0xff] }
 0x2ab   : > { %8981 = vst [vmem:[#allocation164_spill] sm:$0xff] %v7118_v19  ;;  %8987 = vst [vmem:[#allocation91_spill] sm:$0xff] %v7136_v28  ;;  %v2698_v34 = vmul.f32 %v7136_v28, %v7136_v28 }
 0x2ad   : > { %v7112_v45 = vpop.xlane.xlu0 %2259  ;;  %v7127_v6 = vpop.xlane.xlu1 %1927 }
 0x2ae   : > { %3444 = vperm.xlu0 %5015, %v6679_v29   ;;  %v8986_v29 = vsub.f32 %v6753_v2, %v6751_v18  ;;  %v5064_v16 = vpop.eup %5063  ;;  %v2614_v18 = vmul.f32 0.0051020407, %v6813_v41 }
 0x2af   : > { %v7147_v2 = vmul.f32 %v5064_v16, %v2862_v24  ;;  %v5066_v41 = vpop.eup %5065  ;;  %v7160_v16 = vmul.f32 0.0051020407, %v6825_v49 }
 0x2b0   : > { %v2948_v62 = vadd.f32 0.001, %v8986_v29  ;;  %v3156_v29 = vld [vmem:[%s7029_s27 + $0x58] sm:$0xff] }
 0x2b1   : > { %v7120_v57 = vpop.xlane.xlu0 %2427  ;;  %v7142_v55 = vpop.xlane.xlu1 %2263  ;;  %8989 = vst [vmem:[#allocation89_spill] sm:$0xff] %v7147_v2  ;;  %v2658_v49 = vmul.f32 %v7160_v16, %v7160_v16 }
 0x2b2   : > { %3654 = vperm.xlu0 %5015, %v7118_v19   ;;  %5067 = vrsqrt.f32 %v2948_v62  ;;  %v3324_v62 = vsub.f32 %v3156_v29, %v6757_v61  ;;  %v7175_v29 = vmul.f32 0.0051020407, %v6836_v43 }
 0x2b4   : > { %8996 = vst [vmem:[#allocation93_spill] sm:$0xff] %v7175_v29  ;;  %v2700_v43 = vmul.f32 %v7175_v29, %v7175_v29 }
 0x2b5   : > { %v7130_v52 = vpop.xlane.xlu0 %1763  ;;  %v7156_v35 = vpop.xlane.xlu1 %2431 }
 0x2b6   : > { %4032 = vperm.xlu0 %5015, %v3322_v51  }
 0x2b9   : > { %v7138_v26 = vpop.xlane.xlu0 %1931 }
 0x2ba   : > { %3454 = vperm.xlu0 %5015, %v6745_v58   ;;  %3404 = vperm.xlu1 %5016, %v8988_v23   ;;  %v2782_v58 = vsub.f32 %v2614_v18, %v2698_v34  ;;  %v8991_v23 = vld [vmem:[#allocation102_spill] sm:$0xff]  ;;  %v7170_v34 = vmul.f32 %v5066_v41, %v2853_v3  ;;  %v3158_v3 = vld [vmem:[%s7029_s27 + $0x68] sm:$0xff] }
 0x2bb   : > { %v8993_v28 = vsub.f32 %v8991_v23, %v8992_v44  ;;  %v3147_v23 = vld [vmem:[%s7029_s27 + $0x10] sm:$0xff] }
 0x2bc   : > { %v2950_v18 = vadd.f32 0.001, %v2782_v58  ;;  %8995 = vst [vmem:[#allocation125_spill] sm:$0xff] %v7170_v34  ;;  %v5068_v61 = vpop.eup %5067 }
 0x2bd   : > { %v7152_v51 = vpop.xlane.xlu0 %2267  ;;  %v2939_v19 = vadd.f32 0.001, %v8993_v28  ;;  %v2864_v28 = vld [vmem:[%s6367_s24 + $0x1b8] sm:$0xff] }
 0x2be   : > { %3664 = vperm.xlu0 %5015, %v7147_v2   ;;  %3987 = vperm.xlu1 %5016, %v3313_v59   ;;  %v8994_v2 = vld [vmem:[#allocation97_spill] sm:$0xff]  ;;  %v2574_v59 = vmul.f32 0.0051020407, %v6852_v33  ;;  %v7185_v58 = vmul.f32 %v5068_v61, %v2864_v28 }
 0x2bf   : > { %5069 = vrsqrt.f32 %v2939_v19  ;;  %v8999_v19 = vld [vmem:[#allocation103_spill] sm:$0xff] }
 0x2c0   : > { %5071 = vrsqrt.f32 %v2950_v18  ;;  %v2742_v33 = vsub.f32 %v2574_v59, %v2658_v49  ;;  %8997 = vst [vmem:[#allocation92_spill] sm:$0xff] %v7185_v58  ;;  %v9000_v59 = vld [vmem:[#allocation101_spill] sm:$0xff]  ;;  %v7200_v49 = vmul.f32 0.0051020407, %v6881_v48  ;;  %v2866_v48 = vld [vmem:[%s6367_s24 + $0x1c8] sm:$0xff] }
 0x2c1   : > { %v7162_v24 = vpop.xlane.xlu0 %2435  ;;  %v3315_v61 = vsub.f32 %v3147_v23, %v9000_v59  ;;  %v2855_v23 = vld [vmem:[%s6367_s24 + $0x170] sm:$0xff] }
 0x2c2   : > { %4042 = vperm.xlu0 %5015, %v3324_v62   ;;  %3409 = vperm.xlu1 %5016, %v8994_v2   ;;  %v7180_v62 = vpop.xlane.xlu1 %1767  ;;  %v2616_v2 = vmul.f32 0.0051020407, %v6867_v46  ;;  %v3326_v46 = vsub.f32 %v3158_v3, %v6818_v10  ;;  %v7208_v10 = vmul.f32 0.0051020407, %v6892_v25 }
 0x2c4   : > { %v2784_v44 = vsub.f32 %v2616_v2, %v2700_v43  ;;  %9001 = vst [vmem:[#allocation99_spill] sm:$0xff] %v7208_v10 }
 0x2c5   : > { %v7177_v32 = vpop.xlane.xlu0 %1771 }
 0x2c6   : > { %3464 = vperm.xlu0 %5015, %v6811_v53   ;;  %3619 = vperm.xlu1 %5016, %v7170_v34   ;;  %v2910_v53 = vadd.f32 0.001, %v2742_v33  ;;  %v7195_v18 = vpop.xlane.xlu1 %1935  ;;  %v2952_v34 = vadd.f32 0.001, %v2784_v44  ;;  %v2576_v33 = vmul.f32 0.0051020407, %v6906_v31 }
 0x2c7   : > { %v9004_v31 = vld [vmem:[#allocation109_spill] sm:$0xff]  ;;  %v9005_v44 = vld [vmem:[#allocation106_spill] sm:$0xff] }
 0x2c8   : > { %5073 = vrsqrt.f32 %v2910_v53  ;;  %v9003_v53 = vld [vmem:[#allocation105_spill] sm:$0xff] }
 0x2c9   : > { %v7189_v41 = vpop.xlane.xlu0 %1939  ;;  %v5070_v2 = vpop.eup %5069  ;;  %5075 = vrsqrt.f32 %v2952_v34 }
 0x2ca   : > { %8998 = vst [vmem:[#allocation102_spill] sm:$0xff] %v7189_v41  ;;  %3674 = vperm.xlu0 %5015, %v7185_v58   ;;  %3414 = vperm.xlu1 %5016, %v8999_v19   ;;  %v5072_v43 = vpop.eup %5071  ;;  %v2660_v19 = vmul.f32 %v7200_v49, %v7200_v49  ;;  %v7214_v59 = vpop.xlane.xlu1 %2271  ;;  %v2618_v58 = vmul.f32 0.0051020407, %v6918_v36  ;;  %v2702_v41 = vmul.f32 %v7208_v10, %v7208_v10  ;;  %v2857_v10 = vld [vmem:[%s6367_s24 + $0x180] sm:$0xff] }
 0x2cb   : > { %v7222_v25 = vmul.f32 %v5072_v43, %v2866_v48 }
 0x2cc   : > { %v2744_v29 = vsub.f32 %v2576_v33, %v2660_v19  ;;  %v2786_v33 = vsub.f32 %v2618_v58, %v2702_v41  ;;  %v9011_v41 = vld [vmem:[#allocation108_spill] sm:$0xff] }
 0x2cd   : > { %v7202_v28 = vpop.xlane.xlu0 %2275  ;;  %9007 = vst [vmem:[#allocation103_spill] sm:$0xff] %v7222_v25 }
 0x2ce   : > { %4052 = vperm.xlu0 %5015, %v3326_v46   ;;  %3997 = vperm.xlu1 %5016, %v3315_v61   ;;  %v9006_v46 = vsub.f32 %v9004_v31, %v9005_v44  ;;  %v2912_v34 = vadd.f32 0.001, %v2744_v29  ;;  %v7233_v36 = vpop.xlane.xlu1 %2439  ;;  %v3149_v31 = vld [vmem:[%s7029_s27 + $0x20] sm:$0xff]  ;;  %v2578_v29 = vmul.f32 0.0051020407, %v6950_v8 }
 0x2cf   : > { %v9010_v44 = vld [vmem:[#allocation110_spill] sm:$0xff] }
 0x2d0   : > { %v2941_v61 = vadd.f32 0.001, %v9006_v46  ;;  %v2954_v46 = vadd.f32 0.001, %v2786_v33 }
 0x2d1   : > { %v7210_v3 = vpop.xlane.xlu0 %2443 }
 0x2d2   : > { %9002 = vst [vmem:[#allocation97_spill] sm:$0xff] %v7210_v3  ;;  %3474 = vperm.xlu0 %5015, %v6865_v37   ;;  %3419 = vperm.xlu1 %5016, %v9003_v53   ;;  %v7224_v3 = vmul.f32 %v5070_v2, %v2855_v23  ;;  %v3160_v53 = vld [vmem:[%s7029_s27 + $0x78] sm:$0xff]  ;;  %5077 = vrsqrt.f32 %v2941_v61  ;;  %v5074_v19 = vpop.eup %5073  ;;  %v7237_v2 = vmul.f32 0.0051020407, %v6928_v47  ;;  %v2826_v23 = vld [vmem:[%s6367_s24 + $0x88] sm:$0xff]  ;;  %v3317_v61 = vsub.f32 %v3149_v31, %v9011_v41 }
 0x2d3   : > { %v3328_v43 = vsub.f32 %v3160_v53, %v6874_v54  ;;  %5079 = vrsqrt.f32 %v2912_v34  ;;  %v3078_v58 = vmul.f32 %v5074_v19, %v2826_v23  ;;  %v5076_v54 = vpop.eup %5075  ;;  %v7249_v53 = vmul.f32 0.0051020407, %v6938_v30  ;;  %v3162_v41 = vld [vmem:[%s7029_s27 + $0x88] sm:$0xff] }
 0x2d4   : > { %9008 = vst [vmem:[#allocation101_spill] sm:$0xff] %v7224_v3  ;;  %v2662_v47 = vmul.f32 %v7237_v2, %v7237_v2  ;;  %5081 = vrsqrt.f32 %v2954_v46  ;;  %v2620_v34 = vmul.f32 0.0051020407, %v6958_v0  ;;  %v9018_v0 = vld [vmem:[#allocation112_spill] sm:$0xff] }
 0x2d5   : > { %v7228_v37 = vpop.xlane.xlu0 %1779  ;;  %9012 = vst [vmem:[#allocation109_spill] sm:$0xff] %v7249_v53  ;;  %v3246_v19 = vmul.f32 %v3078_v58, %v7160_v16  ;;  %v2704_v30 = vmul.f32 %v7249_v53, %v7249_v53  ;;  %v7276_v53 = vmul.f32 0.0051020407, %v6971_v42  ;;  %v7286_v42 = vmul.f32 0.0051020407, %v6978_v27 }
 0x2d6   : > { %3684 = vperm.xlu0 %5015, %v7222_v25   ;;  %3629 = vperm.xlu1 %5016, %v7224_v3   ;;  %v2746_v8 = vsub.f32 %v2578_v29, %v2662_v47  ;;  %v9015_v25 = vld [vmem:[#allocation116_spill] sm:$0xff] }
 0x2d7   : > { %9020 = vst [vmem:[#allocation116_spill] sm:$0xff] %v7286_v42 }
 0x2d8   : > { %v2914_v29 = vadd.f32 0.001, %v2746_v8  ;;  %v2580_v8 = vmul.f32 0.0051020407, %v6983_v50 }
 0x2d9   : > { %v7239_v48 = vpop.xlane.xlu0 %1947 }
 0x2da   : > { %9009 = vst [vmem:[#allocation105_spill] sm:$0xff] %v7239_v48  ;;  %4062 = vperm.xlu0 %5015, %v3328_v43   ;;  %3424 = vperm.xlu1 %5016, %v9010_v44   ;;  %v2868_v43 = vld [vmem:[%s6367_s24 + $0x1d8] sm:$0xff]  ;;  %v7254_v44 = vpop.xlane.xlu1 %1775 }
 0x2db   : > { %v7257_v33 = vmul.f32 %v5076_v54, %v2868_v43  ;;  %v9016_v48 = vld [vmem:[#allocation113_spill] sm:$0xff]  ;;  %v2788_v54 = vsub.f32 %v2620_v34, %v2704_v30  ;;  %v2870_v30 = vld [vmem:[%s6367_s24 + $0x1e8] sm:$0xff] }
 0x2dc   : > { %v5078_v23 = vpop.eup %5077 }
 0x2dd   : > { %v7251_v3 = vpop.xlane.xlu0 %2283  ;;  %9013 = vst [vmem:[#allocation106_spill] sm:$0xff] %v7257_v33  ;;  %v7273_v47 = vmul.f32 %v5078_v23, %v2857_v10  ;;  %v5080_v43 = vpop.eup %5079 }
 0x2de   : > { %3484 = vperm.xlu0 %5015, %v3078_v58   ;;  %4007 = vperm.xlu1 %5016, %v3317_v61   ;;  %v9017_v61 = vsub.f32 %v9015_v25, %v9016_v48  ;;  %v7271_v16 = vpop.xlane.xlu1 %1943  ;;  %v3330_v58 = vsub.f32 %v3162_v41, %v3246_v19  ;;  %v2828_v25 = vld [vmem:[%s6367_s24 + $0x98] sm:$0xff]  ;;  %v2956_v48 = vadd.f32 0.001, %v2788_v54  ;;  %v5082_v10 = vpop.eup %5081  ;;  %v2664_v19 = vmul.f32 %v7276_v53, %v7276_v53  ;;  %v3151_v41 = vld [vmem:[%s7029_s27 + $0x30] sm:$0xff] }
 0x2df   : > { %9019 = vst [vmem:[#allocation108_spill] sm:$0xff] %v7273_v47  ;;  %v3080_v34 = vmul.f32 %v5080_v43, %v2828_v25  ;;  %v3164_v25 = vld [vmem:[%s7029_s27 + $0x98] sm:$0xff] }
 0x2e0   : > { %v2943_v46 = vadd.f32 0.001, %v9017_v61  ;;  %v2748_v50 = vsub.f32 %v2580_v8, %v2664_v19 }
 0x2e1   : > { %v7262_v31 = vpop.xlane.xlu0 %2451  ;;  %v3248_v27 = vmul.f32 %v3080_v34, %v7200_v49 }
 0x2e2   : > { %9014 = vst [vmem:[#allocation110_spill] sm:$0xff] %v7262_v31  ;;  %3694 = vperm.xlu0 %5015, %v7257_v33   ;;  %3429 = vperm.xlu1 %5016, %v9018_v0   ;;  %5083 = vrsqrt.f32 %v2943_v46  ;;  %v7292_v61 = vpop.xlane.xlu1 %2279  ;;  %v2622_v46 = vmul.f32 0.0051020407, %v6986_v17  ;;  %v7296_v0 = vmul.f32 %v5082_v10, %v2870_v30  ;;  %v2916_v17 = vadd.f32 0.001, %v2748_v50 }
 0x2e3   : > { %5085 = vrsqrt.f32 %v2914_v29  ;;  %v9023_v29 = vld [vmem:[#allocation115_spill] sm:$0xff]  ;;  %v3332_v49 = vsub.f32 %v3164_v25, %v3248_v27  ;;  %v7325_v25 = vmul.f32 0.0051020407, %v7002_v9 }
 0x2e4   : > { %5087 = vrsqrt.f32 %v2956_v48  ;;  %9022 = vst [vmem:[#allocation112_spill] sm:$0xff] %v7296_v0  ;;  %v3319_v54 = vsub.f32 %v3151_v41, %v9023_v29  ;;  %v7312_v41 = vmul.f32 0.0051020407, %v6994_v11 }
 0x2e5   : > { %v7278_v31 = vpop.xlane.xlu0 %1787 }
 0x2e6   : > { %4072 = vperm.xlu0 %5015, %v3330_v58   ;;  %3639 = vperm.xlu1 %5016, %v7273_v47   ;;  %v2706_v58 = vmul.f32 %v7286_v42, %v7286_v42  ;;  %v9024_v47 = vld [vmem:[#allocation124_spill] sm:$0xff]  ;;  %v7309_v30 = vpop.xlane.xlu1 %2447  ;;  %v2830_v42 = vld [vmem:[%s6367_s24 + $0xa8] sm:$0xff]  ;;  %v2666_v11 = vmul.f32 %v7312_v41, %v7312_v41 }
 0x2e8   : > { %v2790_v10 = vsub.f32 %v2622_v46, %v2706_v58  ;;  %v2582_v46 = vmul.f32 0.0051020407, %v7006_v15 }
 0x2e9   : > { %v7288_v23 = vpop.xlane.xlu0 %1955 }
 0x2ea   : > { %9021 = vst [vmem:[#allocation113_spill] sm:$0xff] %v7288_v23  ;;  %3494 = vperm.xlu0 %5015, %v3080_v34   ;;  %3434 = vperm.xlu1 %5016, %v7087_v13   ;;  %v9025_v13 = vld [vmem:[#allocation121_spill] sm:$0xff]  ;;  %v2958_v50 = vadd.f32 0.001, %v2790_v10  ;;  %v2750_v15 = vsub.f32 %v2582_v46, %v2666_v11  ;;  %v9033_v10 = vld [vmem:[#allocation123_spill] sm:$0xff] }
 0x2eb   : > { %v9026_v48 = vsub.f32 %v9024_v47, %v9025_v13  ;;  %v2859_v47 = vld [vmem:[%s6367_s24 + $0x190] sm:$0xff]  ;;  %9030 = vst [vmem:[#allocation121_spill] sm:$0xff] %v7325_v25 }
 0x2ec   : > { %v5084_v19 = vpop.eup %5083  ;;  %v9028_v13 = vld [vmem:[#allocation120_spill] sm:$0xff] }
 0x2ed   : > { %v7302_v43 = vpop.xlane.xlu0 %2291  ;;  %v2945_v8 = vadd.f32 0.001, %v9026_v48  ;;  %v5086_v34 = vpop.eup %5085  ;;  %v7320_v27 = vmul.f32 %v5084_v19, %v2859_v47 }
 0x2ee   : > { %3704 = vperm.xlu0 %5015, %v7296_v0   ;;  %4017 = vperm.xlu1 %5016, %v3319_v54   ;;  %v3082_v54 = vmul.f32 %v5086_v34, %v2830_v42  ;;  %v5088_v58 = vpop.eup %5087  ;;  %v2624_v42 = vmul.f32 0.0051020407, %v7011_v7  ;;  %v2708_v34 = vmul.f32 %v7325_v25, %v7325_v25  ;;  %v3166_v0 = vld [vmem:[%s7029_s27 + $0xa8] sm:$0xff]  ;;  %v2918_v7 = vadd.f32 0.001, %v2750_v15  ;;  %v2832_v25 = vld [vmem:[%s6367_s24 + $0xb8] sm:$0xff] }
 0x2ef   : > { %5089 = vrsqrt.f32 %v2945_v8  ;;  %9029 = vst [vmem:[#allocation124_spill] sm:$0xff] %v7320_v27  ;;  %v2872_v8 = vld [vmem:[%s6367_s24 + $0x1f8] sm:$0xff] }
 0x2f0   : > { %5091 = vrsqrt.f32 %v2916_v17  ;;  %v7335_v17 = vmul.f32 %v5088_v58, %v2872_v8  ;;  %v3250_v9 = vmul.f32 %v3082_v54, %v7237_v2  ;;  %v2792_v58 = vsub.f32 %v2624_v42, %v2708_v34 }
 0x2f1   : > { %v7314_v29 = vpop.xlane.xlu0 %2459  ;;  %5093 = vrsqrt.f32 %v2958_v50  ;;  %v2584_v42 = vmul.f32 0.0051020407, %v7045_v21  ;;  %v7364_v34 = vmul.f32 0.0051020407, %v7036_v12 }
 0x2f2   : > { %9027 = vst [vmem:[#allocation115_spill] sm:$0xff] %v7314_v29  ;;  %4082 = vperm.xlu0 %5015, %v3332_v49   ;;  %3439 = vperm.xlu1 %5016, %v9028_v13   ;;  %v3153_v49 = vld [vmem:[%s7029_s27 + $0x40] sm:$0xff]  ;;  %v7331_v13 = vpop.xlane.xlu1 %1783  ;;  %9032 = vst [vmem:[#allocation165_spill] sm:$0xff] %v7335_v17  ;;  %v3334_v2 = vsub.f32 %v3166_v0, %v3250_v9  ;;  %v2960_v15 = vadd.f32 0.001, %v2792_v58 }
 0x2f3   : > { %v3321_v19 = vsub.f32 %v3153_v49, %v9033_v10  ;;  %v7351_v49 = vmul.f32 0.0051020407, %v7017_v40  ;;  %9040 = vst [vmem:[#allocation166_spill] sm:$0xff] %v7364_v34 }
 0x2f5   : > { %v7327_v48 = vpop.xlane.xlu0 %1795  ;;  %v2668_v40 = vmul.f32 %v7351_v49, %v7351_v49 }
 0x2f6   : > { %9031 = vst [vmem:[#allocation120_spill] sm:$0xff] %v7327_v48  ;;  %3504 = vperm.xlu0 %5015, %v3082_v54   ;;  %3649 = vperm.xlu1 %5016, %v7320_v27   ;;  %v9035_v27 = vld [vmem:[#allocation128_spill] sm:$0xff]  ;;  %v7348_v8 = vpop.xlane.xlu1 %1951 }
 0x2f7   : > { %v9036_v50 = vsub.f32 %v6740_v63, %v9035_v27  ;;  %v2861_v63 = vld [vmem:[%s6367_s24 + $0x1a0] sm:$0xff]  ;;  %v9038_v27 = vld [vmem:[#allocation127_spill] sm:$0xff]  ;;  %v2752_v21 = vsub.f32 %v2584_v42, %v2668_v40  ;;  %v3168_v42 = vld [vmem:[%s7029_s27 + $0xb8] sm:$0xff] }
 0x2f9   : > { %v7341_v47 = vpop.xlane.xlu0 %1963  ;;  %v2947_v46 = vadd.f32 0.001, %v9036_v50  ;;  %v5090_v11 = vpop.eup %5089  ;;  %v2874_v50 = vld [vmem:[%s6367_s24 + $0x208] sm:$0xff] }
 0x2fa   : > { %9034 = vst [vmem:[#allocation123_spill] sm:$0xff] %v7341_v47  ;;  %3714 = vperm.xlu0 %5015, %v7335_v17   ;;  %4027 = vperm.xlu1 %5016, %v3321_v19   ;;  %v5092_v54 = vpop.eup %5091  ;;  %v7359_v0 = vmul.f32 %v5090_v11, %v2861_v63  ;;  %v9043_v11 = vld [vmem:[#allocation130_spill] sm:$0xff]  ;;  %v9044_v63 = vld [vmem:[#allocation133_spill] sm:$0xff] }
 0x2fb   : > { %5095 = vrsqrt.f32 %v2947_v46  ;;  %v3084_v19 = vmul.f32 %v5092_v54, %v2832_v25  ;;  %v5094_v9 = vpop.eup %5093  ;;  %v3155_v46 = vld [vmem:[%s7029_s27 + $0x50] sm:$0xff]  ;;  %v2626_v25 = vmul.f32 0.0051020407, %v7053_v14  ;;  %v2920_v14 = vadd.f32 0.001, %v2752_v21  ;;  %v9048_v21 = vld [vmem:[#allocation137_spill] sm:$0xff] }
 0x2fc   : > { %5097 = vrsqrt.f32 %v2918_v7  ;;  %9039 = vst [vmem:[#allocation127_spill] sm:$0xff] %v7359_v0  ;;  %v7374_v58 = vmul.f32 %v5094_v9, %v2874_v50  ;;  %v3323_v54 = vsub.f32 %v3155_v46, %v9043_v11  ;;  %v9046_v50 = vld [vmem:[#allocation135_spill] sm:$0xff]  ;;  %v7391_v11 = vmul.f32 0.0051020407, %v7064_v5 }
 0x2fd   : > { %v7353_v10 = vpop.xlane.xlu0 %2299  ;;  %5099 = vrsqrt.f32 %v2960_v15  ;;  %v3252_v12 = vmul.f32 %v3084_v19, %v7276_v53  ;;  %v2710_v15 = vmul.f32 %v7364_v34, %v7364_v34  ;;  %v7386_v46 = vmul.f32 0.0051020407, %v9046_v50 }
 0x2fe   : > { %9037 = vst [vmem:[#allocation128_spill] sm:$0xff] %v7353_v10  ;;  %4092 = vperm.xlu0 %5015, %v3334_v2   ;;  %3449 = vperm.xlu1 %5016, %v9038_v27   ;;  %v7368_v2 = vpop.xlane.xlu1 %2287  ;;  %9042 = vst [vmem:[#allocation168_spill] sm:$0xff] %v7374_v58  ;;  %v9045_v27 = vsub.f32 %v6804_v20, %v9044_v63  ;;  %v2670_v34 = vmul.f32 %v7391_v11, %v7391_v11  ;;  %v3170_v10 = vld [vmem:[%s7029_s27 + $0xc8] sm:$0xff] }
 0x2ff   : > { %v2794_v9 = vsub.f32 %v2626_v25, %v2710_v15  ;;  %9047 = vst [vmem:[#allocation130_spill] sm:$0xff] %v7386_v46  ;;  %v2615_v25 = vmul.f32 0.0051020407, %v9048_v21  ;;  %v9049_v15 = vld [vmem:[#allocation132_spill] sm:$0xff]  ;;  %v2876_v21 = vld [vmem:[%s6367_s24 + $0x218] sm:$0xff] }
 0x300   : > { %v2949_v17 = vadd.f32 0.001, %v9045_v27  ;;  %v2834_v27 = vld [vmem:[%s6367_s24 + $0xc8] sm:$0xff] }
 0x301   : > { %v7372_v7 = vpop.xlane.xlu0 %2467  ;;  %v2962_v50 = vadd.f32 0.001, %v2794_v9 }
 0x302   : > { %3514 = vperm.xlu0 %5015, %v3084_v19   ;;  %3659 = vperm.xlu1 %5016, %v7359_v0   ;;  %9041 = vst [vmem:[#allocation167_spill] sm:$0xff] %v7372_v7  ;;  %v7388_v53 = vpop.xlane.xlu1 %2455  ;;  %v3336_v19 = vsub.f32 %v3168_v42, %v3252_v12  ;;  %5101 = vrsqrt.f32 %v2949_v17  ;;  %v2586_v12 = vmul.f32 0.0051020407, %v7092_v38  ;;  %v2699_v17 = vmul.f32 %v7386_v46, %v7386_v46  ;;  %v9053_v38 = vld [vmem:[#allocation139_spill] sm:$0xff] }
 0x303   : > { %5103 = vrsqrt.f32 %v2920_v14  ;;  %v3157_v14 = vld [vmem:[%s7029_s27 + $0x60] sm:$0xff] }
 0x304   : > { %v2783_v9 = vsub.f32 %v2615_v25, %v2699_v17  ;;  %5105 = vrsqrt.f32 %v2962_v50 }
 0x305   : > { %v5096_v40 = vpop.eup %5095 }
 0x306   : > { %3724 = vperm.xlu0 %5015, %v7374_v58   ;;  %4037 = vperm.xlu1 %5016, %v3323_v54   ;;  %v5098_v20 = vpop.eup %5097  ;;  %v2863_v54 = vld [vmem:[%s6367_s24 + $0x1b0] sm:$0xff]  ;;  %v7407_v58 = vmul.f32 0.0051020407, %v7074_v1  ;;  %v7416_v46 = vpop.xlane.xlu1 %1791  ;;  %v9054_v1 = vld [vmem:[#allocation141_spill] sm:$0xff] }
 0x307   : > { %v3086_v5 = vmul.f32 %v5098_v20, %v2834_v27  ;;  %v7402_v42 = vmul.f32 %v5096_v40, %v2863_v54  ;;  %v5100_v0 = vpop.eup %5099  ;;  %v2754_v40 = vsub.f32 %v2586_v12, %v2670_v34  ;;  %v2628_v20 = vmul.f32 0.0051020407, %v7105_v60 }
 0x308   : > { %9051 = vst [vmem:[#allocation135_spill] sm:$0xff] %v7407_v58  ;;  %v2575_v27 = vmul.f32 0.0051020407, %v9054_v1  ;;  %v7421_v54 = vmul.f32 %v5100_v0, %v2876_v21  ;;  %v2712_v17 = vmul.f32 %v7407_v58, %v7407_v58  ;;  %v9057_v0 = vld [vmem:[#allocation145_spill] sm:$0xff]  ;;  %v7438_v21 = vmul.f32 0.0051020407, %v7115_v4 }
 0x309   : > { %v7393_v63 = vpop.permute.xlu0 %3399  ;;  %9050 = vst [vmem:[#allocation133_spill] sm:$0xff] %v7402_v42  ;;  %v3254_v25 = vmul.f32 %v3086_v5, %v7312_v41  ;;  %v7434_v50 = vmul.f32 0.0051020407, %v9057_v0  ;;  %v2922_v12 = vadd.f32 0.001, %v2754_v40  ;;  %v9058_v58 = vld [vmem:[#allocation140_spill] sm:$0xff] }
 0x30a   : > { %4102 = vperm.xlu0 %5015, %v3336_v19   ;;  %3459 = vperm.xlu1 %5016, %v9049_v15   ;;  %v7414_v15 = vmul.f32 0.0051020407, %v9053_v38  ;;  %9055 = vst [vmem:[#allocation132_spill] sm:$0xff] %v7421_v54  ;;  %v2796_v41 = vsub.f32 %v2628_v20, %v2712_v17  ;;  %v7443_v47 = vmul.f32 0.0051020407, %v9058_v58  ;;  %v2836_v0 = vld [vmem:[%s6367_s24 + $0xd8] sm:$0xff] }
 0x30b   : > { %v2588_v40 = vmul.f32 0.0051020407, %v7142_v55  ;;  %v9062_v20 = vld [vmem:[#allocation136_spill] sm:$0xff]  ;;  %v2661_v58 = vmul.f32 %v7434_v50, %v7434_v50  ;;  %v9065_v17 = vld [vmem:[#allocation146_spill] sm:$0xff]  ;;  %v2672_v55 = vmul.f32 %v7438_v21, %v7438_v21 }
 0x30c   : > { %v2659_v34 = vmul.f32 %v7414_v15, %v7414_v15  ;;  %v5102_v60 = vpop.eup %5101  ;;  %9059 = vst [vmem:[#allocation139_spill] sm:$0xff] %v7443_v47 }
 0x30d   : > { %v7409_v19 = vpop.permute.xlu0 %3614  ;;  %v5104_v1 = vpop.eup %5103 }
 0x30e   : > { %9052 = vst [vmem:[#allocation137_spill] sm:$0xff] %v7409_v19  ;;  %3524 = vperm.xlu0 %5015, %v3086_v5   ;;  %3669 = vperm.xlu1 %5016, %v7402_v42   ;;  %v9056_v19 = vld [vmem:[#allocation134_spill] sm:$0xff]  ;;  %v2951_v42 = vadd.f32 0.001, %v2783_v9  ;;  %v3338_v9 = vsub.f32 %v3170_v10, %v3254_v25  ;;  %v9064_v10 = vld [vmem:[#allocation143_spill] sm:$0xff] }
 0x30f   : > { %v3325_v7 = vsub.f32 %v3157_v14, %v9056_v19  ;;  %v2865_v5 = vld [vmem:[%s6367_s24 + $0x1c0] sm:$0xff]  ;;  %v2743_v19 = vsub.f32 %v2575_v27, %v2659_v34  ;;  %v7440_v14 = vpop.xlane.xlu1 %1959  ;;  %v2617_v27 = vmul.f32 0.0051020407, %v9064_v10  ;;  %v7457_v34 = vmul.f32 0.0051020407, %v9065_v17 }
 0x310   : > { %5107 = vrsqrt.f32 %v2951_v42  ;;  %v7451_v4 = vmul.f32 %v5102_v60, %v2865_v5  ;;  %v3088_v42 = vmul.f32 %v5104_v1, %v2836_v0  ;;  %v2701_v60 = vmul.f32 %v7443_v47, %v7443_v47 }
 0x311   : > { %v7427_v38 = vpop.permute.xlu0 %3992  ;;  %5109 = vrsqrt.f32 %v2922_v12  ;;  %v2911_v25 = vadd.f32 0.001, %v2743_v19  ;;  %9066 = vst [vmem:[#allocation145_spill] sm:$0xff] %v7457_v34  ;;  %v7465_v10 = vmul.f32 0.0051020407, %v7127_v6  ;;  %v2878_v12 = vld [vmem:[%s6367_s24 + $0x228] sm:$0xff]  ;;  %v2756_v17 = vsub.f32 %v2588_v40, %v2672_v55 }
 0x312   : > { %3734 = vperm.xlu0 %5015, %v7421_v54   ;;  %4047 = vperm.xlu1 %5016, %v3325_v7   ;;  %v9060_v54 = vld [vmem:[#allocation147_spill] sm:$0xff]  ;;  %9063 = vst [vmem:[#allocation134_spill] sm:$0xff] %v7451_v4  ;;  %v2785_v1 = vsub.f32 %v2617_v27, %v2701_v60  ;;  %v2630_v0 = vmul.f32 0.0051020407, %v7156_v35  ;;  %v2703_v6 = vmul.f32 %v7457_v34, %v7457_v34  ;;  %v3172_v27 = vld [vmem:[%s7029_s27 + $0xd8] sm:$0xff] }
 0x313   : > { %v2577_v7 = vmul.f32 0.0051020407, %v9060_v54  ;;  %v2964_v54 = vadd.f32 0.001, %v2796_v41  ;;  %9067 = vst [vmem:[#allocation140_spill] sm:$0xff] %v7465_v10  ;;  %v9068_v41 = vld [vmem:[#allocation148_spill] sm:$0xff]  ;;  %v7471_v48 = vpop.xlane.xlu1 %2295  ;;  %v2714_v55 = vmul.f32 %v7465_v10, %v7465_v10 }
 0x314   : > { %v2619_v19 = vmul.f32 0.0051020407, %v9068_v41  ;;  %v3256_v41 = vmul.f32 %v3088_v42, %v7351_v49  ;;  %v9072_v60 = vld [vmem:[#allocation149_spill] sm:$0xff]  ;;  %v7491_v49 = vmul.f32 0.0051020407, %v7180_v62  ;;  %v9085_v10 = vld [vmem:[#allocation83_spill] sm:$0xff] }
 0x315   : > { %v7446_v33 = vpop.permute.xlu0 %3624  ;;  %v2745_v5 = vsub.f32 %v2577_v7, %v2661_v58  ;;  %5111 = vrsqrt.f32 %v2964_v54  ;;  %v9069_v7 = vld [vmem:[#allocation138_spill] sm:$0xff]  ;;  %v7487_v35 = vmul.f32 0.0051020407, %v9072_v60  ;;  %v2590_v60 = vmul.f32 0.0051020407, %v7214_v59 }
 0x316   : > { %9061 = vst [vmem:[#allocation141_spill] sm:$0xff] %v7446_v33  ;;  %4112 = vperm.xlu0 %5015, %v3338_v9   ;;  %3469 = vperm.xlu1 %5016, %v9062_v20   ;;  %v3159_v9 = vld [vmem:[%s7029_s27 + $0x70] sm:$0xff]  ;;  %v5106_v20 = vpop.eup %5105  ;;  %5113 = vrsqrt.f32 %v2911_v25  ;;  %v2787_v54 = vsub.f32 %v2619_v19, %v2703_v6  ;;  %v2924_v25 = vadd.f32 0.001, %v2756_v17  ;;  %v3340_v19 = vsub.f32 %v3172_v27, %v3256_v41 }
 0x317   : > { %v3327_v58 = vsub.f32 %v3159_v9, %v9069_v7  ;;  %v7478_v47 = vmul.f32 %v5106_v20, %v2878_v12  ;;  %v2913_v40 = vadd.f32 0.001, %v2745_v5  ;;  %v2953_v9 = vadd.f32 0.001, %v2785_v1  ;;  %v9073_v5 = vld [vmem:[#allocation81_spill] sm:$0xff]  ;;  %v7494_v7 = vpop.xlane.xlu1 %2463 }
 0x318   : > { %v2798_v20 = vsub.f32 %v2630_v0, %v2714_v55  ;;  %v2579_v12 = vmul.f32 0.0051020407, %v9073_v5  ;;  %v2955_v1 = vadd.f32 0.001, %v2787_v54  ;;  %v2663_v62 = vmul.f32 %v7487_v35, %v7487_v35  ;;  %v9074_v0 = vld [vmem:[#allocation142_spill] sm:$0xff] }
 0x319   : > { %v7467_v33 = vpop.permute.xlu0 %4002  ;;  %9070 = vst [vmem:[#allocation147_spill] sm:$0xff] %v7478_v47  ;;  %5115 = vrsqrt.f32 %v2913_v40  ;;  %v2674_v40 = vmul.f32 %v7491_v49, %v7491_v49  ;;  %v3161_v5 = vld [vmem:[%s7029_s27 + $0x80] sm:$0xff]  ;;  %v7510_v34 = vmul.f32 0.0051020407, %v7195_v18 }
 0x31a   : > { %3534 = vperm.xlu0 %5015, %v3088_v42   ;;  %3679 = vperm.xlu1 %5016, %v7451_v4   ;;  %v5108_v42 = vpop.eup %5107  ;;  %5117 = vrsqrt.f32 %v2924_v25  ;;  %v2966_v41 = vadd.f32 0.001, %v2798_v20  ;;  %v2747_v59 = vsub.f32 %v2579_v12, %v2663_v62  ;;  %v2632_v20 = vmul.f32 0.0051020407, %v7233_v36  ;;  %v9080_v18 = vld [vmem:[#allocation82_spill] sm:$0xff] }
 0x31b   : > { %v5110_v6 = vpop.eup %5109  ;;  %5119 = vrsqrt.f32 %v2953_v9  ;;  %9076 = vst [vmem:[#allocation146_spill] sm:$0xff] %v7510_v34  ;;  %v2758_v4 = vsub.f32 %v2590_v60, %v2674_v40  ;;  %v7515_v9 = vpop.permute.xlu1 %3609  ;;  %v2716_v62 = vmul.f32 %v7510_v34, %v7510_v34 }
 0x31c   : > { %5121 = vrsqrt.f32 %v2955_v1  ;;  %9078 = vst [vmem:[#allocation138_spill] sm:$0xff] %v7515_v9  ;;  %v2915_v60 = vadd.f32 0.001, %v2747_v59 }
 0x31d   : > { %v7483_v29 = vpop.permute.xlu0 %3634  ;;  %5123 = vrsqrt.f32 %v2966_v41  ;;  %v2926_v40 = vadd.f32 0.001, %v2758_v4  ;;  %v3174_v41 = vld [vmem:[%s7029_s27 + $0xe8] sm:$0xff] }
 0x31e   : > { %9071 = vst [vmem:[#allocation136_spill] sm:$0xff] %v7483_v29  ;;  %3744 = vperm.xlu0 %5015, %v7478_v47   ;;  %4057 = vperm.xlu1 %5016, %v3327_v58   ;;  %v2838_v29 = vld [vmem:[%s6367_s24 + $0xe8] sm:$0xff]  ;;  %v2867_v58 = vld [vmem:[%s6367_s24 + $0x1d0] sm:$0xff]  ;;  %5125 = vrsqrt.f32 %v2915_v60 }
 0x31f   : > { %v3090_v55 = vmul.f32 %v5110_v6, %v2838_v29  ;;  %v7506_v27 = vmul.f32 %v5108_v42, %v2867_v58  ;;  %v5112_v54 = vpop.eup %5111  ;;  %v2827_v29 = vld [vmem:[%s6367_s24 + $0x90] sm:$0xff]  ;;  %v7522_v6 = vmul.f32 0.0051020407, %v9080_v18  ;;  %5127 = vrsqrt.f32 %v2926_v40 }
 0x320   : > { %v9079_v42 = vld [vmem:[#allocation144_spill] sm:$0xff] }
 0x321   : > { %v7497_v17 = vpop.permute.xlu0 %4012  ;;  %9075 = vst [vmem:[#allocation143_spill] sm:$0xff] %v7506_v27  ;;  %v3329_v12 = vsub.f32 %v3161_v5, %v9079_v42  ;;  %9081 = vst [vmem:[#allocation149_spill] sm:$0xff] %v7522_v6  ;;  %v3258_v1 = vmul.f32 %v3090_v55, %v7391_v11  ;;  %v7537_v11 = vmul.f32 0.0051020407, %v7254_v44  ;;  %v2705_v42 = vmul.f32 %v7522_v6, %v7522_v6  ;;  %v3163_v6 = vld [vmem:[%s7029_s27 + $0x90] sm:$0xff] }
 0x322   : > { %4122 = vperm.xlu0 %5015, %v3340_v19   ;;  %3479 = vperm.xlu1 %5016, %v9074_v0   ;;  %v2880_v19 = vld [vmem:[%s6367_s24 + $0x238] sm:$0xff]  ;;  %v5114_v0 = vpop.eup %5113 }
 0x323   : > { %v7524_v58 = vmul.f32 %v5112_v54, %v2880_v19  ;;  %v3079_v36 = vmul.f32 %v5114_v0, %v2827_v29  ;;  %v5116_v54 = vpop.eup %5115  ;;  %v2800_v19 = vsub.f32 %v2632_v20, %v2716_v62  ;;  %v9084_v0 = vld [vmem:[#allocation151_spill] sm:$0xff]  ;;  %v3342_v29 = vsub.f32 %v3174_v41, %v3258_v1  ;;  %v2869_v62 = vld [vmem:[%s6367_s24 + $0x1e0] sm:$0xff] }
 0x324   : > { %v5118_v4 = vpop.eup %5117  ;;  %v2676_v40 = vmul.f32 %v7537_v11, %v7537_v11 }
 0x325   : > { %v7512_v25 = vpop.permute.xlu0 %3644  ;;  %9082 = vst [vmem:[#allocation81_spill] sm:$0xff] %v7524_v58  ;;  %v5120_v18 = vpop.eup %5119  ;;  %v3247_v44 = vmul.f32 %v3079_v36, %v7414_v15  ;;  %v2968_v1 = vadd.f32 0.001, %v2800_v19 }
 0x326   : > { %9077 = vst [vmem:[#allocation148_spill] sm:$0xff] %v7512_v25  ;;  %3544 = vperm.xlu0 %5015, %v3090_v55   ;;  %3689 = vperm.xlu1 %5016, %v7506_v27   ;;  %v9083_v25 = vld [vmem:[#allocation150_spill] sm:$0xff]  ;;  %v2592_v27 = vmul.f32 0.0051020407, %v7292_v61  ;;  %v5122_v61 = vpop.eup %5121 }
 0x327   : > { %v2621_v5 = vmul.f32 0.0051020407, %v9083_v25  ;;  %v2829_v55 = vld [vmem:[%s6367_s24 + $0xa0] sm:$0xff]  ;;  %v7543_v25 = vmul.f32 0.0051020407, %v9084_v0  ;;  %v3331_v19 = vsub.f32 %v3163_v6, %v3247_v44  ;;  %5129 = vrsqrt.f32 %v2968_v1  ;;  %v3176_v1 = vld [vmem:[%s7029_s27 + $0xf8] sm:$0xff] }
 0x328   : > { %v7551_v0 = vmul.f32 %v5116_v54, %v2829_v55  ;;  %v2882_v54 = vld [vmem:[%s6367_s24 + $0x248] sm:$0xff] }
 0x329   : > { %v7529_v9 = vpop.permute.xlu0 %4022  ;;  %v2789_v34 = vsub.f32 %v2621_v5, %v2705_v42  ;;  %v2665_v15 = vmul.f32 %v7543_v25, %v7543_v25  ;;  %v7558_v5 = vmul.f32 0.0051020407, %v7271_v16  ;;  %v2760_v42 = vsub.f32 %v2592_v27, %v2676_v40  ;;  %v5185_v40 = vld [vmem:[%s5740_s21 + $0x98] sm:$0xff] }
 0x32a   : > { %3754 = vperm.xlu0 %5015, %v7524_v58   ;;  %4067 = vperm.xlu1 %5016, %v3329_v12   ;;  %v7534_v59 = vpop.xlane.xlu1 %1799  ;;  %v2840_v12 = vld [vmem:[%s6367_s24 + $0xf8] sm:$0xff]  ;;  %v2581_v58 = vmul.f32 0.0051020407, %v9085_v10  ;;  %v7560_v10 = vmul.f32 %v5120_v18, %v2869_v62  ;;  %v7572_v27 = vmul.f32 %v7551_v0, %v7434_v50  ;;  %v7587_v50 = vld [vmem:[%s7029_s27 + $0xa0] sm:$0xff] }
 0x32b   : > { %v3092_v41 = vmul.f32 %v5118_v4, %v2840_v12  ;;  %9086 = vst [vmem:[#allocation142_spill] sm:$0xff] %v7558_v5  ;;  %v2957_v55 = vadd.f32 0.001, %v2789_v34  ;;  %v2634_v4 = vmul.f32 0.0051020407, %v7309_v30  ;;  %v2871_v12 = vld [vmem:[%s6367_s24 + $0x1f0] sm:$0xff]  ;;  %v2718_v30 = vmul.f32 %v7558_v5, %v7558_v5 }
 0x32c   : > { %9087 = vst [vmem:[#allocation144_spill] sm:$0xff] %v7560_v10  ;;  %v2749_v47 = vsub.f32 %v2581_v58, %v2665_v15  ;;  %v9089_v18 = vld [vmem:[#allocation153_spill] sm:$0xff]  ;;  %v9091_v58 = vld [vmem:[#allocation20_spill] sm:$0xff] }
 0x32d   : > { %v3445_v20 = vpop.permute.xlu0 %3444  ;;  %v7575_v62 = vmul.f32 0.0051020407, %v9089_v18  ;;  %v3260_v6 = vmul.f32 %v3092_v41, %v7438_v21  ;;  %5131 = vrsqrt.f32 %v2957_v55 }
 0x32e   : > { %4132 = vperm.xlu0 %5015, %v3342_v29   ;;  %3489 = vperm.xlu1 %5016, %v3079_v36   ;;  %v1968_v60 = vpop.xlane.xlu1 %1967  ;;  %v5124_v36 = vpop.eup %5123  ;;  %v3835_v44 = vmul.f32 %v3445_v20, %v9091_v58  ;;  %v3836_v15 = vmul.f32 %v5185_v40, %v3445_v20  ;;  %v2917_v21 = vadd.f32 0.001, %v2749_v47 }
 0x32f   : > { %9090 = vst [vmem:[#allocation150_spill] sm:$0xff] %v7575_v62  ;;  %v7577_v34 = vmul.f32 0.0051020407, %v1968_v60  ;;  %v7590_v60 = vmul.f32 %v5122_v61, %v2871_v12  ;;  %v5126_v23 = vpop.eup %5125  ;;  %v2842_v61 = vld [vmem:[%s6367_s24 + $0x108] sm:$0xff]  ;;  %v9093_v12 = vld [vmem:[#allocation154_spill] sm:$0xff]  ;;  %v3344_v55 = vsub.f32 %v3176_v1, %v3260_v6 }
 0x330   : > { %v2594_v6 = vmul.f32 0.0051020407, %v7368_v2  ;;  %v5187_v2 = vld [vmem:[%s5740_s21 + $0x8] sm:$0xff] }
 0x331   : > { %v7562_v29 = vpop.permute.xlu0 %3654 }
 0x332   : > { %9088 = vst [vmem:[#allocation82_spill] sm:$0xff] %v7562_v29  ;;  %3554 = vperm.xlu0 %5015, %v3092_v41   ;;  %3699 = vperm.xlu1 %5016, %v7560_v10   ;;  %v7567_v16 = vpop.xlane.xlu1 %2303  ;;  %v7584_v29 = vmul.f32 %v5124_v36, %v2882_v54  ;;  %v2928_v10 = vadd.f32 0.001, %v2760_v42  ;;  %v2802_v41 = vsub.f32 %v2634_v4, %v2718_v30  ;;  %v2831_v36 = vld [vmem:[%s6367_s24 + $0xb0] sm:$0xff]  ;;  %v5128_v54 = vpop.eup %5127  ;;  %v7602_v30 = vmul.f32 0.0051020407, %v9093_v12 }
 0x333   : > { %v2724_v42 = vmul.f32 %v7577_v34, %v7577_v34  ;;  %v2707_v4 = vmul.f32 %v7575_v62, %v7575_v62  ;;  %v7611_v47 = vmul.f32 %v5126_v23, %v2831_v36  ;;  %v9095_v62 = vld [vmem:[#allocation157_spill] sm:$0xff]  ;;  %v5130_v36 = vpop.eup %5129 }
 0x334   : > { %9092 = vst [vmem:[#allocation151_spill] sm:$0xff] %v7584_v29  ;;  %5133 = vrsqrt.f32 %v2928_v10  ;;  %v2970_v12 = vadd.f32 0.001, %v2802_v41  ;;  %v2667_v23 = vmul.f32 %v7602_v30, %v7602_v30 }
 0x335   : > { %v4033_v18 = vpop.permute.xlu0 %4032  ;;  %5135 = vrsqrt.f32 %v2917_v21  ;;  %v7623_v21 = vmul.f32 0.0051020407, %v7348_v8 }
 0x336   : > { %v4423_v5 = vadd.f32 %v4033_v18, %v3835_v44  ;;  %v4424_v58 = vadd.f32 %v4033_v18, %v3836_v15  ;;  %3764 = vperm.xlu0 %5015, %v7584_v29   ;;  %4077 = vperm.xlu1 %5016, %v3331_v19   ;;  %v2472_v20 = vpop.xlane.xlu1 %2471  ;;  %v7605_v19 = vmul.f32 0.0051020407, %v7331_v13  ;;  %v9094_v44 = vld [vmem:[#allocation80_spill] sm:$0xff]  ;;  %v2583_v29 = vmul.f32 0.0051020407, %v9095_v62 }
 0x337   : > { %v2640_v40 = vmul.f32 0.0051020407, %v2472_v20  ;;  %v2623_v15 = vmul.f32 0.0051020407, %v9094_v44 }
 0x338   : > { %4591 = vst [vmem:[%s5740_s21 + $0x90] sm:$0xff] %v4423_v5  ;;  %4592 = vst.msk [vmem:[%s5740_s21 + $0x98] sm:$0xff] %vm1297_vm1, %v4424_v58  ;;  %v3094_v5 = vmul.f32 %v5128_v54, %v2842_v61  ;;  %v9096_v58 = vld [vmem:[#allocation4_spill] sm:$0xff]  ;;  %v2678_v62 = vmul.f32 %v7605_v19, %v7605_v19  ;;  %v3818_v54 = vmul.f32 %v5187_v2, %v7393_v63 }
 0x339   : > { %v2808_v18 = vsub.f32 %v2640_v40, %v2724_v42  ;;  %v3455_v20 = vpop.permute.xlu0 %3454  ;;  %v5186_v42 = vld [vmem:[%s5740_s21 + $0x18] sm:$0xff]  ;;  %v2791_v8 = vsub.f32 %v2623_v15, %v2707_v4 }
 0x33a   : > { %4142 = vperm.xlu0 %5015, %v3344_v55   ;;  %3499 = vperm.xlu1 %5016, %v7551_v0   ;;  %v3405_v13 = vpop.permute.xlu1 %3404  ;;  %v9097_v0 = vld [vmem:[#allocation2_spill] sm:$0xff]  ;;  %v5188_v15 = vld [vmem:[%s5740_s21 + $0xb8] sm:$0xff] }
 0x33b   : > { %v2976_v1 = vadd.f32 0.001, %v2808_v18  ;;  %v3819_v10 = vmul.f32 %v3405_v13, %v9096_v58  ;;  %v3820_v40 = vmul.f32 %v5186_v42, %v3405_v13  ;;  %v3817_v41 = vmul.f32 %v7393_v63, %v9097_v0  ;;  %v2884_v18 = vld [vmem:[%s6367_s24 + $0x258] sm:$0xff]  ;;  %v5132_v0 = vpop.eup %5131 }
 0x33c   : > { %v2751_v13 = vsub.f32 %v2583_v29, %v2667_v23  ;;  %v2636_v58 = vmul.f32 0.0051020407, %v7388_v53  ;;  %v2720_v29 = vmul.f32 %v7623_v21, %v7623_v21  ;;  %v9098_v53 = vld [vmem:[#allocation24_spill] sm:$0xff]  ;;  %v7644_v23 = vmul.f32 %v5130_v36, %v2884_v18  ;;  %v2844_v18 = vld [vmem:[%s6367_s24 + $0x118] sm:$0xff] }
 0x33d   : > { %5137 = vrsqrt.f32 %v2976_v1  ;;  %v4407_v61 = vadd.f32 %v7427_v38, %v3819_v10  ;;  %v4408_v55 = vadd.f32 %v7427_v38, %v3820_v40  ;;  %v7631_v44 = vpop.permute.xlu0 %3664  ;;  %v3262_v1 = vmul.f32 %v3094_v5, %v7491_v49 }
 0x33e   : > { %3564 = vperm.xlu0 %5015, %v3094_v5   ;;  %3709 = vperm.xlu1 %5016, %v7590_v60   ;;  %v3988_v63 = vpop.permute.xlu1 %3987  ;;  %5139 = vrsqrt.f32 %v2970_v12  ;;  %v2762_v10 = vsub.f32 %v2594_v6, %v2678_v62  ;;  %v3839_v4 = vmul.f32 %v3455_v20, %v9098_v53  ;;  %v3840_v40 = vmul.f32 %v5188_v15, %v3455_v20  ;;  %v3178_v12 = vld [vmem:[%s7029_s27 + $0x108] sm:$0xff]  ;;  %v5134_v2 = vpop.eup %5133 }
 0x33f   : > { %4575 = vst [vmem:[%s5740_s21 + $0x10] sm:$0xff] %v4407_v61  ;;  %4576 = vst.msk [vmem:[%s5740_s21 + $0x18] sm:$0xff] %vm1297_vm1, %v4408_v55  ;;  %v4405_v38 = vadd.f32 %v3988_v63, %v3817_v41  ;;  %v4406_v42 = vadd.f32 %v3988_v63, %v3818_v54  ;;  %v2959_v5 = vadd.f32 0.001, %v2791_v8  ;;  %v2804_v6 = vsub.f32 %v2636_v58, %v2720_v29  ;;  %v9100_v54 = vld [vmem:[#allocation155_spill] sm:$0xff]  ;;  %v5136_v8 = vpop.eup %5135 }
 0x340   : > { %v9099_v20 = vsub.f32 %v7587_v50, %v7572_v27  ;;  %v7655_v61 = vmul.f32 0.0051020407, %v9100_v54  ;;  %v2930_v55 = vadd.f32 0.001, %v2762_v10  ;;  %v2919_v63 = vadd.f32 0.001, %v2751_v13 }
 0x341   : > { %4573 = vst [vmem:[%s5740_s21] sm:$0xff] %v4405_v38  ;;  %4574 = vst.msk [vmem:[%s5740_s21 + $0x8] sm:$0xff] %vm1297_vm1, %v4406_v42  ;;  %v4043_v49 = vpop.permute.xlu0 %4042  ;;  %v3346_v58 = vsub.f32 %v3178_v12, %v3262_v1  ;;  %v2873_v38 = vld [vmem:[%s6367_s24 + $0x200] sm:$0xff]  ;;  %v3251_v27 = vmul.f32 %v7611_v47, %v7487_v35  ;;  %v7666_v29 = vmul.f32 0.0051020407, %v7416_v46  ;;  %v2892_v10 = vld [vmem:[%s6367_s24 + $0x298] sm:$0xff]  ;;  %5141 = vrsqrt.f32 %v2959_v5 }
 0x342   : > { %v4427_v62 = vadd.f32 %v4043_v49, %v3839_v4  ;;  %v4428_v41 = vadd.f32 %v4043_v49, %v3840_v40  ;;  %3774 = vperm.xlu0 %5015, %v7644_v23   ;;  %4087 = vperm.xlu1 %5016, %v9099_v20   ;;  %v3410_v36 = vpop.permute.xlu1 %3409  ;;  %v9101_v50 = vld [vmem:[#allocation94_spill] sm:$0xff]  ;;  %v3167_v4 = vld [vmem:[%s7029_s27 + $0xb0] sm:$0xff]  ;;  %v2972_v15 = vadd.f32 0.001, %v2804_v6  ;;  %v3096_v1 = vmul.f32 %v5134_v2, %v2844_v18  ;;  %v2886_v54 = vld [vmem:[%s6367_s24 + $0x268] sm:$0xff] }
 0x343   : > { %v2625_v42 = vmul.f32 0.0051020407, %v9101_v50  ;;  %v2833_v40 = vld [vmem:[%s6367_s24 + $0xc0] sm:$0xff]  ;;  %v2709_v35 = vmul.f32 %v7655_v61, %v7655_v61  ;;  %5143 = vrsqrt.f32 %v2930_v55  ;;  %v2596_v46 = vmul.f32 0.0051020407, %v7471_v48  ;;  %v9102_v55 = vld [vmem:[#allocation159_spill] sm:$0xff] }
 0x344   : > { %4595 = vst [vmem:[%s5740_s21 + $0xb0] sm:$0xff] %v4427_v62  ;;  %4596 = vst.msk [vmem:[%s5740_s21 + $0xb8] sm:$0xff] %vm1297_vm1, %v4428_v41  ;;  %v7678_v12 = vmul.f32 0.0051020407, %v7440_v14  ;;  %v7680_v5 = vmul.f32 %v5132_v0, %v2873_v38  ;;  %v3335_v6 = vsub.f32 %v3167_v4, %v3251_v27  ;;  %5145 = vrsqrt.f32 %v2919_v63  ;;  %v5189_v50 = vld [vmem:[%s5740_s21 + $0x38] sm:$0xff] }
 0x345   : > { %v3465_v53 = vpop.permute.xlu0 %3464  ;;  %v2793_v41 = vsub.f32 %v2625_v42, %v2709_v35  ;;  %v2680_v20 = vmul.f32 %v7666_v29, %v7666_v29  ;;  %v3085_v48 = vmul.f32 %v5136_v8, %v2833_v40  ;;  %v7690_v14 = vmul.f32 0.0051020407, %v9102_v55  ;;  %v9103_v8 = vld [vmem:[#allocation8_spill] sm:$0xff]  ;;  %v5190_v40 = vld [vmem:[%s5740_s21 + $0xd8] sm:$0xff]  ;;  %v5191_v35 = vld [vmem:[%s5740_s21 + $0x28] sm:$0xff] }
 0x346   : > { %4152 = vperm.xlu0 %5015, %v3346_v58   ;;  %3509 = vperm.xlu1 %5016, %v7611_v47   ;;  %v7671_v13 = vpop.permute.xlu1 %3619  ;;  %5147 = vrsqrt.f32 %v2972_v15  ;;  %v3264_v18 = vmul.f32 %v3096_v1, %v7537_v11  ;;  %v2638_v38 = vmul.f32 0.0051020407, %v7494_v7  ;;  %v2722_v4 = vmul.f32 %v7678_v12, %v7678_v12 }
 0x347   : > { %v5138_v49 = vpop.eup %5137  ;;  %v2764_v58 = vsub.f32 %v2596_v46, %v2680_v20  ;;  %v3822_v46 = vmul.f32 %v5191_v35, %v3410_v36 }
 0x348   : > { %v7682_v62 = vmul.f32 %v5138_v49, %v2892_v10  ;;  %v5140_v47 = vpop.eup %5139  ;;  %v9104_v10 = vld [vmem:[#allocation28_spill] sm:$0xff]  ;;  %v3844_v49 = vmul.f32 %v5190_v40, %v3465_v53  ;;  %v2806_v40 = vsub.f32 %v2638_v38, %v2722_v4  ;;  %v7726_v38 = vmul.f32 0.0051020407, %v7534_v59 }
 0x349   : > { %v7686_v2 = vpop.permute.xlu0 %3674  ;;  %v3843_v15 = vmul.f32 %v3465_v53, %v9104_v10  ;;  %v7705_v11 = vmul.f32 %v5140_v47, %v2886_v54  ;;  %v2598_v59 = vmul.f32 0.0051020407, %v7567_v16 }
 0x34a   : > { %3574 = vperm.xlu0 %5015, %v3096_v1   ;;  %3719 = vperm.xlu1 %5016, %v7680_v5   ;;  %v3415_v0 = vpop.permute.xlu1 %3414  ;;  %v7696_v63 = vmul.f32 %v7682_v62, %v7577_v34  ;;  %v9105_v1 = vld [vmem:[#allocation6_spill] sm:$0xff] }
 0x34b   : > { %v3823_v27 = vmul.f32 %v3415_v0, %v9103_v8  ;;  %v3824_v42 = vmul.f32 %v5189_v50, %v3415_v0  ;;  %v3821_v34 = vmul.f32 %v3410_v36, %v9105_v1  ;;  %v3180_v0 = vld [vmem:[%s7029_s27 + $0x118] sm:$0xff]  ;;  %v2961_v8 = vadd.f32 0.001, %v2793_v41  ;;  %v9106_v50 = vld [vmem:[#allocation162_spill] sm:$0xff]  ;;  %v2846_v1 = vld [vmem:[%s6367_s24 + $0x128] sm:$0xff] }
 0x34c   : > { %v2585_v10 = vmul.f32 0.0051020407, %v9106_v50  ;;  %v2932_v36 = vadd.f32 0.001, %v2764_v58 }
 0x34d   : > { %v4411_v7 = vadd.f32 %v7467_v33, %v3823_v27  ;;  %v4412_v20 = vadd.f32 %v7467_v33, %v3824_v42  ;;  %v4053_v55 = vpop.permute.xlu0 %4052  ;;  %v5142_v27 = vpop.eup %5141  ;;  %v2669_v42 = vmul.f32 %v7690_v14, %v7690_v14  ;;  %5149 = vrsqrt.f32 %v2961_v8 }
 0x34e   : > { %v4431_v53 = vadd.f32 %v4053_v55, %v3843_v15  ;;  %v4432_v47 = vadd.f32 %v4053_v55, %v3844_v49  ;;  %3784 = vperm.xlu0 %5015, %v7705_v11   ;;  %4097 = vperm.xlu1 %5016, %v3335_v6   ;;  %v3998_v54 = vpop.permute.xlu1 %3997  ;;  %v9107_v15 = vld [vmem:[#allocation160_spill] sm:$0xff]  ;;  %v3348_v6 = vsub.f32 %v3180_v0, %v3264_v18  ;;  %v5144_v58 = vpop.eup %5143  ;;  %5151 = vrsqrt.f32 %v2932_v36 }
 0x34f   : > { %4579 = vst [vmem:[%s5740_s21 + $0x30] sm:$0xff] %v4411_v7  ;;  %4580 = vst.msk [vmem:[%s5740_s21 + $0x38] sm:$0xff] %vm1297_vm1, %v4412_v20  ;;  %v4409_v33 = vadd.f32 %v3998_v54, %v3821_v34  ;;  %v4410_v41 = vadd.f32 %v3998_v54, %v3822_v46  ;;  %v7720_v49 = vmul.f32 0.0051020407, %v9107_v15  ;;  %v2875_v34 = vld [vmem:[%s6367_s24 + $0x210] sm:$0xff]  ;;  %v2753_v35 = vsub.f32 %v2585_v10, %v2669_v42  ;;  %v5146_v18 = vpop.eup %5145  ;;  %v2888_v54 = vld [vmem:[%s6367_s24 + $0x278] sm:$0xff] }
 0x350   : > { %4599 = vst [vmem:[%s5740_s21 + $0xd0] sm:$0xff] %v4431_v53  ;;  %4600 = vst.msk [vmem:[%s5740_s21 + $0xd8] sm:$0xff] %vm1297_vm1, %v4432_v47  ;;  %v2627_v46 = vmul.f32 0.0051020407, %v7089_v56  ;;  %v2974_v20 = vadd.f32 0.001, %v2806_v40  ;;  %v3253_v55 = vmul.f32 %v3085_v48, %v7543_v25  ;;  %v5148_v0 = vpop.eup %5147  ;;  %v3098_v8 = vmul.f32 %v5144_v58, %v2846_v1 }
 0x351   : > { %4577 = vst [vmem:[%s5740_s21 + $0x20] sm:$0xff] %v4409_v33  ;;  %4578 = vst.msk [vmem:[%s5740_s21 + $0x28] sm:$0xff] %vm1297_vm1, %v4410_v41  ;;  %v3475_v4 = vpop.permute.xlu0 %3474  ;;  %v2711_v50 = vmul.f32 %v7720_v49, %v7720_v49  ;;  %v7738_v10 = vmul.f32 %v5142_v27, %v2875_v34  ;;  %v3169_v56 = vld [vmem:[%s7029_s27 + $0xc0] sm:$0xff]  ;;  %v2682_v53 = vmul.f32 %v7726_v38, %v7726_v38  ;;  %v2921_v36 = vadd.f32 0.001, %v2753_v35  ;;  %v9109_v27 = vld [vmem:[#allocation32_spill] sm:$0xff] }
 0x352   : > { %4162 = vperm.xlu0 %5015, %v3348_v6   ;;  %3519 = vperm.xlu1 %5016, %v3085_v48   ;;  %v3420_v7 = vpop.permute.xlu1 %3419  ;;  %v2835_v48 = vld [vmem:[%s6367_s24 + $0xd0] sm:$0xff]  ;;  %v7751_v40 = vmul.f32 0.0051020407, %v7101_v39  ;;  %5153 = vrsqrt.f32 %v2974_v20  ;;  %v3337_v41 = vsub.f32 %v3169_v56, %v3253_v55  ;;  %v3847_v42 = vmul.f32 %v3475_v4, %v9109_v27  ;;  %v5192_v15 = vld [vmem:[%s5740_s21 + $0xf8] sm:$0xff]  ;;  %v3182_v35 = vld [vmem:[%s7029_s27 + $0x128] sm:$0xff] }
 0x353   : > { %v2795_v16 = vsub.f32 %v2627_v46, %v2711_v50  ;;  %v2766_v33 = vsub.f32 %v2598_v59, %v2682_v53  ;;  %v3848_v6 = vmul.f32 %v5192_v15, %v3475_v4  ;;  %v7755_v58 = vmul.f32 %v5148_v0, %v2888_v54  ;;  %v9110_v0 = vld [vmem:[#allocation12_spill] sm:$0xff] }
 0x354   : > { %v3266_v1 = vmul.f32 %v3098_v8, %v7605_v19  ;;  %v3087_v46 = vmul.f32 %v5146_v18, %v2835_v48  ;;  %5155 = vrsqrt.f32 %v2921_v36  ;;  %v2587_v4 = vmul.f32 0.0051020407, %v7112_v45  ;;  %v5193_v19 = vld [vmem:[%s5740_s21 + $0x58] sm:$0xff]  ;;  %v9111_v45 = vld [vmem:[#allocation10_spill] sm:$0xff] }
 0x355   : > { %v7743_v47 = vpop.permute.xlu0 %3684  ;;  %v2963_v39 = vadd.f32 0.001, %v2795_v16  ;;  %v2934_v55 = vadd.f32 0.001, %v2766_v33  ;;  %v2671_v53 = vmul.f32 %v7751_v40, %v7751_v40  ;;  %v7766_v54 = vmul.f32 0.0051020407, %v7107_v22 }
 0x356   : > { %3584 = vperm.xlu0 %5015, %v3098_v8   ;;  %3729 = vperm.xlu1 %5016, %v7738_v10   ;;  %v7747_v25 = vpop.permute.xlu1 %3629  ;;  %v3350_v36 = vsub.f32 %v3182_v35, %v3266_v1  ;;  %v3825_v48 = vmul.f32 %v3420_v7, %v9111_v45  ;;  %v5194_v33 = vld [vmem:[%s5740_s21 + $0x48] sm:$0xff]  ;;  %v2629_v22 = vmul.f32 0.0051020407, %v7120_v57  ;;  %v3255_v35 = vmul.f32 %v3087_v46, %v7602_v30 }
 0x357   : > { %9108 = vst [vmem:[#allocation83_spill] sm:$0xff] %v7747_v25  ;;  %v5150_v8 = vpop.eup %5149  ;;  %5157 = vrsqrt.f32 %v2963_v39  ;;  %v2713_v39 = vmul.f32 %v7766_v54, %v7766_v54 }
 0x358   : > { %v5152_v16 = vpop.eup %5151  ;;  %5159 = vrsqrt.f32 %v2934_v55 }
 0x359   : > { %v4063_v34 = vpop.permute.xlu0 %4062 }
 0x35a   : > { %v4435_v50 = vadd.f32 %v4063_v34, %v3847_v42  ;;  %v4436_v20 = vadd.f32 %v4063_v34, %v3848_v6  ;;  %3794 = vperm.xlu0 %5015, %v7755_v58   ;;  %4107 = vperm.xlu1 %5016, %v3337_v41   ;;  %v3425_v59 = vpop.permute.xlu1 %3424  ;;  %v3826_v41 = vmul.f32 %v5194_v33, %v3420_v7  ;;  %v2848_v6 = vld [vmem:[%s6367_s24 + $0x138] sm:$0xff]  ;;  %v2877_v34 = vld [vmem:[%s6367_s24 + $0x220] sm:$0xff]  ;;  %v7800_v33 = vmul.f32 0.0051020407, %v7130_v52 }
 0x35b   : > { %v3827_v56 = vmul.f32 %v3425_v59, %v9110_v0  ;;  %v3828_v18 = vmul.f32 %v5193_v19, %v3425_v59  ;;  %v2755_v7 = vsub.f32 %v2587_v4, %v2671_v53  ;;  %v7784_v57 = vmul.f32 %v5150_v8, %v2877_v34  ;;  %v3171_v59 = vld [vmem:[%s7029_s27 + $0xd0] sm:$0xff] }
 0x35c   : > { %4603 = vst [vmem:[%s5740_s21 + $0xf0] sm:$0xff] %v4435_v50  ;;  %4604 = vst.msk [vmem:[%s5740_s21 + $0xf8] sm:$0xff] %vm1297_vm1, %v4436_v20  ;;  %v3100_v20 = vmul.f32 %v5152_v16, %v2848_v6  ;;  %v5154_v0 = vpop.eup %5153  ;;  %v2797_v4 = vsub.f32 %v2629_v22, %v2713_v39  ;;  %v3339_v19 = vsub.f32 %v3171_v59, %v3255_v35  ;;  %v9112_v8 = vld [vmem:[#allocation36_spill] sm:$0xff]  ;;  %v7809_v52 = vmul.f32 0.0051020407, %v7138_v26  ;;  %v2850_v59 = vld [vmem:[%s6367_s24 + $0x148] sm:$0xff] }
 0x35d   : > { %v4415_v27 = vadd.f32 %v7497_v17, %v3827_v56  ;;  %v4416_v42 = vadd.f32 %v7497_v17, %v3828_v18  ;;  %v3485_v15 = vpop.permute.xlu0 %3484  ;;  %v2923_v56 = vadd.f32 0.001, %v2755_v7 }
 0x35e   : > { %4172 = vperm.xlu0 %5015, %v3350_v36   ;;  %3529 = vperm.xlu1 %5016, %v3087_v46   ;;  %v4008_v1 = vpop.permute.xlu1 %4007  ;;  %v2890_v46 = vld [vmem:[%s6367_s24 + $0x288] sm:$0xff]  ;;  %v5156_v18 = vpop.eup %5155  ;;  %v3851_v53 = vmul.f32 %v3485_v15, %v9112_v8  ;;  %v5195_v36 = vld [vmem:[%s5740_s21 + $0x118] sm:$0xff]  ;;  %v2965_v6 = vadd.f32 0.001, %v2797_v4 }
 0x35f   : > { %4583 = vst [vmem:[%s5740_s21 + $0x50] sm:$0xff] %v4415_v27  ;;  %4584 = vst.msk [vmem:[%s5740_s21 + $0x58] sm:$0xff] %vm1297_vm1, %v4416_v42  ;;  %v4413_v17 = vadd.f32 %v4008_v1, %v3825_v48  ;;  %v4414_v50 = vadd.f32 %v4008_v1, %v3826_v41  ;;  %v3852_v16 = vmul.f32 %v5195_v36, %v3485_v15  ;;  %v3184_v27 = vld [vmem:[%s7029_s27 + $0x138] sm:$0xff]  ;;  %v2837_v42 = vld [vmem:[%s6367_s24 + $0xe0] sm:$0xff]  ;;  %5161 = vrsqrt.f32 %v2923_v56 }
 0x360   : > { %v7796_v45 = vmul.f32 %v5154_v0, %v2890_v46  ;;  %v3268_v48 = vmul.f32 %v3100_v20, %v7666_v29  ;;  %v2589_v29 = vmul.f32 0.0051020407, %v7152_v51  ;;  %v3089_v7 = vmul.f32 %v5156_v18, %v2837_v42  ;;  %v9114_v46 = vld [vmem:[#allocation16_spill] sm:$0xff]  ;;  %v5196_v56 = vld [vmem:[%s5740_s21 + $0x78] sm:$0xff] }
 0x361   : > { %4581 = vst [vmem:[%s5740_s21 + $0x40] sm:$0xff] %v4413_v17  ;;  %4582 = vst.msk [vmem:[%s5740_s21 + $0x48] sm:$0xff] %vm1297_vm1, %v4414_v50  ;;  %v7790_v30 = vpop.permute.xlu0 %3694  ;;  %v5158_v1 = vpop.eup %5157  ;;  %v2673_v50 = vmul.f32 %v7800_v33, %v7800_v33  ;;  %5163 = vrsqrt.f32 %v2965_v6  ;;  %v2631_v0 = vmul.f32 0.0051020407, %v7162_v24  ;;  %v2715_v18 = vmul.f32 %v7809_v52, %v7809_v52 }
 0x362   : > { %3594 = vperm.xlu0 %5015, %v3100_v20   ;;  %3739 = vperm.xlu1 %5016, %v7784_v57   ;;  %v3430_v55 = vpop.permute.xlu1 %3429  ;;  %v3352_v35 = vsub.f32 %v3184_v27, %v3268_v48  ;;  %v5160_v17 = vpop.eup %5159  ;;  %v2879_v20 = vld [vmem:[%s6367_s24 + $0x230] sm:$0xff]  ;;  %v3257_v36 = vmul.f32 %v3089_v7, %v7690_v14 }
 0x363   : > { %v2757_v26 = vsub.f32 %v2589_v29, %v2673_v50  ;;  %v7823_v8 = vmul.f32 %v5158_v1, %v2879_v20  ;;  %v2799_v14 = vsub.f32 %v2631_v0, %v2715_v18  ;;  %v2839_v0 = vld [vmem:[%s6367_s24 + $0xf0] sm:$0xff] }
 0x365   : > { %v4073_v41 = vpop.permute.xlu0 %4072  ;;  %v2925_v29 = vadd.f32 0.001, %v2757_v26 }
 0x366   : > { %v4439_v34 = vadd.f32 %v4073_v41, %v3851_v53  ;;  %v4440_v22 = vadd.f32 %v4073_v41, %v3852_v16  ;;  %3804 = vperm.xlu0 %5015, %v7796_v45   ;;  %4117 = vperm.xlu1 %5016, %v3339_v19   ;;  %v7805_v15 = vpop.permute.xlu1 %3639  ;;  %v3102_v53 = vmul.f32 %v5160_v17, %v2850_v59  ;;  %v9115_v16 = vld [vmem:[#allocation14_spill] sm:$0xff]  ;;  %v5197_v41 = vld [vmem:[%s5740_s21 + $0x68] sm:$0xff] }
 0x367   : > { %9113 = vst [vmem:[#allocation153_spill] sm:$0xff] %v7805_v15  ;;  %v3829_v48 = vmul.f32 %v3430_v55, %v9115_v16  ;;  %v3830_v27 = vmul.f32 %v5197_v41, %v3430_v55  ;;  %5165 = vrsqrt.f32 %v2925_v29  ;;  %v9118_v16 = vld [vmem:[#allocation156_spill] sm:$0xff]  ;;  %v9122_v29 = vld [vmem:[#allocation158_spill] sm:$0xff] }
 0x368   : > { %4607 = vst [vmem:[%s5740_s21 + $0x110] sm:$0xff] %v4439_v34  ;;  %4608 = vst.msk [vmem:[%s5740_s21 + $0x118] sm:$0xff] %vm1297_vm1, %v4440_v22  ;;  %v3173_v34 = vld [vmem:[%s7029_s27 + $0xe0] sm:$0xff]  ;;  %v3270_v20 = vmul.f32 %v3102_v53, %v7726_v38 }
 0x369   : > { %v3495_v39 = vpop.permute.xlu0 %3494  ;;  %v3341_v50 = vsub.f32 %v3173_v34, %v3257_v36  ;;  %v5162_v59 = vpop.eup %5161  ;;  %v9117_v36 = vld [vmem:[#allocation78_spill] sm:$0xff] }
 0x36a   : > { %4182 = vperm.xlu0 %5015, %v3352_v35   ;;  %3539 = vperm.xlu1 %5016, %v3089_v7   ;;  %v3435_v51 = vpop.permute.xlu1 %3434  ;;  %v9116_v35 = vld [vmem:[#allocation40_spill] sm:$0xff]  ;;  %v5198_v7 = vld [vmem:[%s5740_s21 + $0x138] sm:$0xff]  ;;  %v3091_v18 = vmul.f32 %v5162_v59, %v2839_v0  ;;  %v9124_v59 = vld [vmem:[#allocation18_spill] sm:$0xff] }
 0x36b   : > { %v3831_v4 = vmul.f32 %v3435_v51, %v9114_v46  ;;  %v3832_v19 = vmul.f32 %v5196_v56, %v3435_v51  ;;  %v3856_v17 = vmul.f32 %v5198_v7, %v3495_v39  ;;  %v7841_v51 = vmul.f32 0.0051020407, %v7177_v32  ;;  %v3186_v46 = vld [vmem:[%s7029_s27 + $0x148] sm:$0xff] }
 0x36c   : > { %v2591_v32 = vmul.f32 0.0051020407, %v7202_v28  ;;  %v2881_v28 = vld [vmem:[%s6367_s24 + $0x240] sm:$0xff]  ;;  %v5199_v0 = vld [vmem:[%s5740_s21 + $0x88] sm:$0xff] }
 0x36d   : > { %v4419_v24 = vadd.f32 %v7529_v9, %v3831_v4  ;;  %v4420_v42 = vadd.f32 %v7529_v9, %v3832_v19  ;;  %v7830_v6 = vpop.permute.xlu0 %3704  ;;  %v3855_v9 = vmul.f32 %v3495_v39, %v9116_v35  ;;  %v2967_v39 = vadd.f32 0.001, %v2799_v14  ;;  %v5164_v19 = vpop.eup %5163 }
 0x36e   : > { %3749 = vperm.xlu1 %5016, %v7823_v8   ;;  %3604 = vperm.xlu0 %5015, %v3102_v53   ;;  %v4018_v22 = vpop.permute.xlu1 %4017  ;;  %v3354_v53 = vsub.f32 %v3186_v46, %v3270_v20  ;;  %v2675_v41 = vmul.f32 %v7841_v51, %v7841_v51 }
 0x36f   : > { %4587 = vst [vmem:[%s5740_s21 + $0x70] sm:$0xff] %v4419_v24  ;;  %4588 = vst.msk [vmem:[%s5740_s21 + $0x78] sm:$0xff] %vm1297_vm1, %v4420_v42  ;;  %v4417_v55 = vadd.f32 %v4018_v22, %v3829_v48  ;;  %v4418_v1 = vadd.f32 %v4018_v22, %v3830_v27  ;;  %v3272_v48 = vmul.f32 %v9118_v16, %v9117_v36  ;;  %v9119_v27 = vld [vmem:[#allocation102_spill] sm:$0xff]  ;;  %v3188_v42 = vld [vmem:[%s7029_s27 + $0x158] sm:$0xff]  ;;  %5167 = vrsqrt.f32 %v2967_v39 }
 0x370   : > { %v9121_v22 = vld [vmem:[#allocation90_spill] sm:$0xff]  ;;  %v9125_v36 = vld [vmem:[#allocation44_spill] sm:$0xff] }
 0x371   : > { %4585 = vst [vmem:[%s5740_s21 + $0x60] sm:$0xff] %v4417_v55  ;;  %4586 = vst.msk [vmem:[%s5740_s21 + $0x68] sm:$0xff] %vm1297_vm1, %v4418_v1  ;;  %v4083_v26 = vpop.permute.xlu0 %4082  ;;  %v3274_v14 = vmul.f32 %v9122_v29, %v9121_v22  ;;  %v2759_v55 = vsub.f32 %v2591_v32, %v2675_v41  ;;  %v9123_v1 = vld [vmem:[#allocation97_spill] sm:$0xff]  ;;  %v3356_v7 = vsub.f32 %v3188_v42, %v3272_v48  ;;  %v5166_v22 = vpop.eup %5165  ;;  %v7884_v29 = vmul.f32 0.0051020407, %v7228_v37 }
 0x372   : > { %v4443_v4 = vadd.f32 %v4083_v26, %v3855_v9  ;;  %v4444_v56 = vadd.f32 %v4083_v26, %v3856_v17  ;;  %4127 = vperm.xlu1 %5016, %v3341_v50   ;;  %3814 = vperm.xlu0 %5015, %v7682_v62   ;;  %v3440_v38 = vpop.permute.xlu1 %3439  ;;  %v7858_v62 = vmul.f32 0.0051020407, %v9119_v27  ;;  %v2633_v35 = vmul.f32 0.0051020407, %v9123_v1  ;;  %v3190_v9 = vld [vmem:[%s7029_s27 + $0x168] sm:$0xff]  ;;  %v5200_v48 = vld [vmem:[%s5740_s21 + $0x158] sm:$0xff] }
 0x373   : > { %v7868_v17 = vmul.f32 %v5164_v19, %v2881_v28  ;;  %v3259_v50 = vmul.f32 %v3091_v18, %v7751_v40  ;;  %v3833_v26 = vmul.f32 %v3440_v38, %v9124_v59  ;;  %v3834_v46 = vmul.f32 %v5199_v0, %v3440_v38  ;;  %v9126_v27 = vld [vmem:[#allocation100_spill] sm:$0xff]  ;;  %v9127_v42 = vld [vmem:[#allocation161_spill] sm:$0xff]  ;;  %v2841_v1 = vld [vmem:[%s6367_s24 + $0x100] sm:$0xff] }
 0x374   : > { %4611 = vst [vmem:[%s5740_s21 + $0x130] sm:$0xff] %v4443_v4  ;;  %4612 = vst.msk [vmem:[%s5740_s21 + $0x138] sm:$0xff] %vm1297_vm1, %v4444_v56  ;;  %v2717_v20 = vmul.f32 %v7858_v62, %v7858_v62  ;;  %v3175_v56 = vld [vmem:[%s7029_s27 + $0xf0] sm:$0xff]  ;;  %v3358_v32 = vsub.f32 %v3190_v9, %v3274_v14  ;;  %v2927_v40 = vadd.f32 0.001, %v2759_v55  ;;  %v3276_v28 = vmul.f32 %v9127_v42, %v9126_v27  ;;  %v3192_v55 = vld [vmem:[%s7029_s27 + $0x178] sm:$0xff] }
 0x375   : > { %v3505_v24 = vpop.permute.xlu0 %3504  ;;  %v3343_v41 = vsub.f32 %v3175_v56, %v3259_v50  ;;  %v2593_v50 = vmul.f32 0.0051020407, %v7251_v3  ;;  %v9128_v59 = vld [vmem:[#allocation107_spill] sm:$0xff]  ;;  %v2677_v56 = vmul.f32 %v7884_v29, %v7884_v29  ;;  %v2883_v3 = vld [vmem:[%s6367_s24 + $0x250] sm:$0xff]  ;;  %v3196_v27 = vld [vmem:[%s7029_s27 + $0x198] sm:$0xff] }
 0x376   : > { %3549 = vperm.xlu1 %5016, %v3091_v18   ;;  %4192 = vperm.xlu0 %5015, %v3354_v53   ;;  %v7862_v34 = vpop.permute.xlu1 %3649  ;;  %v2801_v19 = vsub.f32 %v2633_v35, %v2717_v20  ;;  %v3859_v16 = vmul.f32 %v3505_v24, %v9125_v36  ;;  %v3860_v38 = vmul.f32 %v5200_v48, %v3505_v24  ;;  %5169 = vrsqrt.f32 %v2927_v40  ;;  %v9133_v36 = vld [vmem:[#allocation164_spill] sm:$0xff] }
 0x377   : > { %9120 = vst [vmem:[#allocation20_spill] sm:$0xff] %v7862_v34  ;;  %v3360_v37 = vsub.f32 %v3192_v55, %v3276_v28  ;;  %v3093_v20 = vmul.f32 %v5166_v22, %v2841_v1  ;;  %v2761_v48 = vsub.f32 %v2593_v50, %v2677_v56  ;;  %v9135_v55 = vld [vmem:[#allocation22_spill] sm:$0xff] }
 0x379   : > { %v7875_v4 = vpop.permute.xlu0 %3714  ;;  %v3261_v22 = vmul.f32 %v3093_v20, %v7800_v33  ;;  %v9136_v33 = vld [vmem:[#allocation122_spill] sm:$0xff] }
 0x37a   : > { %4202 = vperm.xlu0 %5015, %v3356_v7   ;;  %3759 = vperm.xlu1 %5016, %v7868_v17   ;;  %v4028_v39 = vpop.permute.xlu1 %4027  ;;  %v2969_v7 = vadd.f32 0.001, %v2801_v19  ;;  %v3194_v19 = vld [vmem:[%s7029_s27 + $0x188] sm:$0xff] }
 0x37b   : > { %v4421_v18 = vadd.f32 %v4028_v39, %v3833_v26  ;;  %v4422_v53 = vadd.f32 %v4028_v39, %v3834_v46  ;;  %v9129_v26 = vld [vmem:[#allocation163_spill] sm:$0xff]  ;;  %v5168_v46 = vpop.eup %5167  ;;  %v9130_v39 = vld [vmem:[#allocation105_spill] sm:$0xff] }
 0x37c   : > { %v3278_v0 = vmul.f32 %v9129_v26, %v9128_v59  ;;  %5171 = vrsqrt.f32 %v2969_v7  ;;  %v7910_v28 = vmul.f32 %v5168_v46, %v2883_v3  ;;  %v3177_v7 = vld [vmem:[%s7029_s27 + $0x100] sm:$0xff] }
 0x37d   : > { %4589 = vst [vmem:[%s5740_s21 + $0x80] sm:$0xff] %v4421_v18  ;;  %4590 = vst.msk [vmem:[%s5740_s21 + $0x88] sm:$0xff] %vm1297_vm1, %v4422_v53  ;;  %v4093_v14 = vpop.permute.xlu0 %4092  ;;  %v9132_v53 = vld [vmem:[#allocation114_spill] sm:$0xff] }
 0x37e   : > { %v4447_v35 = vadd.f32 %v4093_v14, %v3859_v16  ;;  %v4448_v9 = vadd.f32 %v4093_v14, %v3860_v38  ;;  %4212 = vperm.xlu0 %5015, %v3358_v32   ;;  %4137 = vperm.xlu1 %5016, %v3343_v41   ;;  %v3450_v24 = vpop.permute.xlu1 %3449  ;;  %v7900_v32 = vmul.f32 0.0051020407, %v9130_v39  ;;  %v3280_v16 = vmul.f32 %v9133_v36, %v9132_v53  ;;  %v9134_v38 = vld [vmem:[#allocation110_spill] sm:$0xff]  ;;  %v5202_v53 = vld [vmem:[%s5740_s21 + $0x178] sm:$0xff] }
 0x37f   : > { %v2635_v41 = vmul.f32 0.0051020407, %v9134_v38  ;;  %v3362_v42 = vsub.f32 %v3194_v19, %v3278_v0  ;;  %v3837_v1 = vmul.f32 %v3450_v24, %v9135_v55  ;;  %v2929_v0 = vadd.f32 0.001, %v2761_v48  ;;  %v9138_v19 = vld [vmem:[#allocation48_spill] sm:$0xff] }
 0x380   : > { %4615 = vst [vmem:[%s5740_s21 + $0x150] sm:$0xff] %v4447_v35  ;;  %4616 = vst.msk [vmem:[%s5740_s21 + $0x158] sm:$0xff] %vm1297_vm1, %v4448_v9  ;;  %v2719_v14 = vmul.f32 %v7900_v32, %v7900_v32  ;;  %v5201_v35 = vld [vmem:[%s5740_s21 + $0xa8] sm:$0xff]  ;;  %v3364_v59 = vsub.f32 %v3196_v27, %v3280_v16  ;;  %v3345_v38 = vsub.f32 %v3177_v7, %v3261_v22  ;;  %v2843_v48 = vld [vmem:[%s6367_s24 + $0x110] sm:$0xff] }
 0x381   : > { %v3515_v40 = vpop.permute.xlu0 %3514  ;;  %v3838_v9 = vmul.f32 %v5201_v35, %v3450_v24  ;;  %v7924_v24 = vmul.f32 0.0051020407, %v7278_v31  ;;  %v3198_v27 = vld [vmem:[%s7029_s27 + $0x1a8] sm:$0xff]  ;;  %5173 = vrsqrt.f32 %v2929_v0  ;;  %v3200_v0 = vld [vmem:[%s7029_s27 + $0x1b8] sm:$0xff] }
 0x382   : > { %4222 = vperm.xlu0 %5015, %v3360_v37   ;;  %3559 = vperm.xlu1 %5016, %v3093_v20   ;;  %v7904_v18 = vpop.permute.xlu1 %3659  ;;  %v9137_v20 = vld [vmem:[#allocation89_spill] sm:$0xff]  ;;  %v2803_v46 = vsub.f32 %v2635_v41, %v2719_v14  ;;  %v3863_v3 = vmul.f32 %v3515_v40, %v9138_v19  ;;  %v3864_v36 = vmul.f32 %v5202_v53, %v3515_v40  ;;  %v2595_v41 = vmul.f32 0.0051020407, %v7302_v43  ;;  %v9140_v43 = vld [vmem:[#allocation92_spill] sm:$0xff]  ;;  %v9143_v19 = vld [vmem:[#allocation91_spill] sm:$0xff] }
 0x383   : > { %9131 = vst [vmem:[#allocation154_spill] sm:$0xff] %v7904_v18  ;;  %v3282_v26 = vmul.f32 %v9137_v20, %v9136_v33  ;;  %v2679_v22 = vmul.f32 %v7924_v24, %v7924_v24  ;;  %v9141_v33 = vld [vmem:[#allocation113_spill] sm:$0xff]  ;;  %v9145_v53 = vld [vmem:[#allocation115_spill] sm:$0xff] }
 0x384   : > { %v2971_v40 = vadd.f32 0.001, %v2803_v46  ;;  %v7942_v20 = vmul.f32 0.0051020407, %v9141_v33  ;;  %v2885_v46 = vld [vmem:[%s6367_s24 + $0x260] sm:$0xff]  ;;  %v9148_v33 = vld [vmem:[#allocation120_spill] sm:$0xff] }
 0x385   : > { %v7917_v37 = vpop.permute.xlu0 %3724 }
 0x386   : > { %4232 = vperm.xlu0 %5015, %v3362_v42   ;;  %3769 = vperm.xlu1 %5016, %v7910_v28   ;;  %v4038_v50 = vpop.permute.xlu1 %4037  ;;  %v5170_v42 = vpop.eup %5169  ;;  %5175 = vrsqrt.f32 %v2971_v40 }
 0x387   : > { %v4425_v56 = vadd.f32 %v4038_v50, %v3837_v1  ;;  %v4426_v39 = vadd.f32 %v4038_v50, %v3838_v9  ;;  %v3366_v1 = vsub.f32 %v3198_v27, %v3282_v26  ;;  %v3095_v35 = vmul.f32 %v5170_v42, %v2843_v48  ;;  %v9139_v9 = vld [vmem:[#allocation129_spill] sm:$0xff]  ;;  %v5172_v50 = vpop.eup %5171  ;;  %v9144_v26 = vld [vmem:[#allocation103_spill] sm:$0xff] }
 0x388   : > { %v3284_v7 = vmul.f32 %v9140_v43, %v9139_v9  ;;  %v2721_v48 = vmul.f32 %v7942_v20, %v7942_v20  ;;  %v3179_v9 = vld [vmem:[%s7029_s27 + $0x110] sm:$0xff]  ;;  %v9147_v43 = vld [vmem:[#allocation53_spill] sm:$0xff] }
 0x389   : > { %4593 = vst [vmem:[%s5740_s21 + $0xa0] sm:$0xff] %v4425_v56  ;;  %4594 = vst.msk [vmem:[%s5740_s21 + $0xa8] sm:$0xff] %vm1297_vm1, %v4426_v39  ;;  %v4103_v16 = vpop.permute.xlu0 %4102  ;;  %v2763_v56 = vsub.f32 %v2595_v41, %v2679_v22  ;;  %v3263_v27 = vmul.f32 %v3095_v35, %v7841_v51  ;;  %v9146_v41 = vld [vmem:[#allocation26_spill] sm:$0xff] }
 0x38a   : > { %v4451_v14 = vadd.f32 %v4103_v16, %v3863_v3  ;;  %v4452_v31 = vadd.f32 %v4103_v16, %v3864_v36  ;;  %4242 = vperm.xlu0 %5015, %v3364_v59   ;;  %4147 = vperm.xlu1 %5016, %v3345_v38   ;;  %v3460_v55 = vpop.permute.xlu1 %3459  ;;  %v3286_v3 = vmul.f32 %v9144_v26, %v9143_v19  ;;  %v2637_v36 = vmul.f32 0.0051020407, %v9145_v53  ;;  %v3202_v38 = vld [vmem:[%s7029_s27 + $0x1c8] sm:$0xff]  ;;  %v5204_v26 = vld [vmem:[%s5740_s21 + $0x198] sm:$0xff] }
 0x38b   : > { %v3368_v42 = vsub.f32 %v3200_v0, %v3284_v7  ;;  %v7952_v16 = vmul.f32 %v5172_v50, %v2885_v46  ;;  %v2931_v40 = vadd.f32 0.001, %v2763_v56  ;;  %v9149_v56 = vld [vmem:[#allocation52_spill] sm:$0xff] }
 0x38c   : > { %4619 = vst [vmem:[%s5740_s21 + $0x170] sm:$0xff] %v4451_v14  ;;  %4620 = vst.msk [vmem:[%s5740_s21 + $0x178] sm:$0xff] %vm1297_vm1, %v4452_v31  ;;  %v3841_v14 = vmul.f32 %v3460_v55, %v9146_v41  ;;  %v5203_v31 = vld [vmem:[%s5740_s21 + $0xc8] sm:$0xff]  ;;  %v2805_v50 = vsub.f32 %v2637_v36, %v2721_v48  ;;  %v3347_v41 = vsub.f32 %v3179_v9, %v3263_v27  ;;  %v3204_v36 = vld [vmem:[%s7029_s27 + $0x1d8] sm:$0xff] }
 0x38d   : > { %v3525_v59 = vpop.permute.xlu0 %3524  ;;  %v3842_v22 = vmul.f32 %v5203_v31, %v3460_v55  ;;  %v7968_v55 = vmul.f32 0.0051020407, %v9148_v33  ;;  %v9150_v31 = vld [vmem:[#allocation93_spill] sm:$0xff]  ;;  %5177 = vrsqrt.f32 %v2931_v40  ;;  %v9152_v9 = vld [vmem:[#allocation123_spill] sm:$0xff]  ;;  %v9153_v33 = vld [vmem:[#allocation128_spill] sm:$0xff] }
 0x38e   : > { %4252 = vperm.xlu0 %5015, %v3366_v1   ;;  %3569 = vperm.xlu1 %5016, %v3095_v35   ;;  %v7946_v39 = vpop.permute.xlu1 %3669  ;;  %v3370_v35 = vsub.f32 %v3202_v38, %v3286_v3  ;;  %v3867_v19 = vmul.f32 %v3525_v59, %v9149_v56  ;;  %v3868_v53 = vmul.f32 %v5204_v26, %v3525_v59  ;;  %v2845_v38 = vld [vmem:[%s6367_s24 + $0x120] sm:$0xff]  ;;  %v2973_v27 = vadd.f32 0.001, %v2805_v50  ;;  %v9154_v56 = vld [vmem:[#allocation99_spill] sm:$0xff] }
 0x38f   : > { %9142 = vst [vmem:[#allocation80_spill] sm:$0xff] %v7946_v39  ;;  %v5174_v39 = vpop.eup %5173  ;;  %v3206_v50 = vld [vmem:[%s7029_s27 + $0x1e8] sm:$0xff] }
 0x390   : > { %v5176_v26 = vpop.eup %5175  ;;  %5179 = vrsqrt.f32 %v2973_v27  ;;  %v3181_v27 = vld [vmem:[%s7029_s27 + $0x120] sm:$0xff] }
 0x391   : > { %v7959_v1 = vpop.permute.xlu0 %3734 }
 0x392   : > { %v7964_v7 = vmul.f32 %v7959_v1, %v9147_v43  ;;  %4262 = vperm.xlu0 %5015, %v3368_v42   ;;  %3779 = vperm.xlu1 %5016, %v7952_v16   ;;  %v4048_v51 = vpop.permute.xlu1 %4047  ;;  %v9151_v43 = vld [vmem:[#allocation106_spill] sm:$0xff] }
 0x393   : > { %v4429_v0 = vadd.f32 %v4048_v51, %v3841_v14  ;;  %v4430_v46 = vadd.f32 %v4048_v51, %v3842_v22  ;;  %v3288_v42 = vmul.f32 %v9151_v43, %v9150_v31  ;;  %v2681_v22 = vmul.f32 %v7968_v55, %v7968_v55  ;;  %v9157_v43 = vld [vmem:[#allocation109_spill] sm:$0xff] }
 0x394   : > { %v7982_v51 = vmul.f32 0.0051020407, %v9152_v9 }
 0x395   : > { %4597 = vst [vmem:[%s5740_s21 + $0xc0] sm:$0xff] %v4429_v0  ;;  %4598 = vst.msk [vmem:[%s5740_s21 + $0xc8] sm:$0xff] %vm1297_vm1, %v4430_v46  ;;  %v4113_v3 = vpop.permute.xlu0 %4112  ;;  %v2597_v0 = vmul.f32 0.0051020407, %v9153_v33  ;;  %v3372_v40 = vsub.f32 %v3204_v36, %v3288_v42  ;;  %v3097_v46 = vmul.f32 %v5174_v39, %v2845_v38  ;;  %v9159_v36 = vld [vmem:[#allocation167_spill] sm:$0xff] }
 0x396   : > { %v4455_v48 = vadd.f32 %v4113_v3, %v3867_v19  ;;  %v4456_v14 = vadd.f32 %v4113_v3, %v3868_v53  ;;  %4272 = vperm.xlu0 %5015, %v3370_v35   ;;  %4157 = vperm.xlu1 %5016, %v3347_v41   ;;  %v3470_v59 = vpop.permute.xlu1 %3469  ;;  %v9155_v19 = vld [vmem:[#allocation112_spill] sm:$0xff]  ;;  %v9158_v3 = vld [vmem:[#allocation165_spill] sm:$0xff]  ;;  %v2723_v39 = vmul.f32 %v7982_v51, %v7982_v51  ;;  %v2639_v38 = vmul.f32 0.0051020407, %v9159_v36 }
 0x397   : > { %v3290_v35 = vmul.f32 %v9155_v19, %v9154_v56  ;;  %v2887_v41 = vld [vmem:[%s6367_s24 + $0x270] sm:$0xff]  ;;  %v2765_v42 = vsub.f32 %v2597_v0, %v2681_v22  ;;  %v9160_v56 = vld [vmem:[#allocation30_spill] sm:$0xff] }
 0x398   : > { %4623 = vst [vmem:[%s5740_s21 + $0x190] sm:$0xff] %v4455_v48  ;;  %4624 = vst.msk [vmem:[%s5740_s21 + $0x198] sm:$0xff] %vm1297_vm1, %v4456_v14  ;;  %v3292_v48 = vmul.f32 %v9158_v3, %v9157_v43  ;;  %v3208_v14 = vld [vmem:[%s7029_s27 + $0x1f8] sm:$0xff]  ;;  %v8000_v33 = vmul.f32 %v5176_v26, %v2887_v41  ;;  %v3845_v19 = vmul.f32 %v3470_v59, %v9160_v56  ;;  %v9162_v41 = vld [vmem:[#allocation56_spill] sm:$0xff] }
 0x399   : > { %v3535_v53 = vpop.permute.xlu0 %3534  ;;  %v3374_v9 = vsub.f32 %v3206_v50, %v3290_v35  ;;  %v9161_v43 = vld [vmem:[#allocation57_spill] sm:$0xff]  ;;  %v2807_v35 = vsub.f32 %v2639_v38, %v2723_v39  ;;  %v5178_v50 = vpop.eup %5177  ;;  %v2847_v39 = vld [vmem:[%s6367_s24 + $0x130] sm:$0xff] }
 0x39a   : > { %4282 = vperm.xlu0 %5015, %v3372_v40   ;;  %3579 = vperm.xlu1 %5016, %v3097_v46   ;;  %v7992_v31 = vpop.permute.xlu1 %3679  ;;  %v3265_v40 = vmul.f32 %v3097_v46, %v7884_v29  ;;  %v3376_v29 = vsub.f32 %v3208_v14, %v3292_v48  ;;  %v2933_v46 = vadd.f32 0.001, %v2765_v42  ;;  %v5206_v3 = vld [vmem:[%s5740_s21 + $0x1b8] sm:$0xff]  ;;  %v3210_v48 = vld [vmem:[%s7029_s27 + $0x208] sm:$0xff] }
 0x39b   : > { %9156 = vst [vmem:[#allocation157_spill] sm:$0xff] %v7992_v31  ;;  %v5205_v31 = vld [vmem:[%s5740_s21 + $0xe8] sm:$0xff]  ;;  %v3872_v36 = vmul.f32 %v5206_v3, %v3535_v53 }
 0x39c   : > { %v3846_v18 = vmul.f32 %v5205_v31, %v3470_v59  ;;  %v3871_v31 = vmul.f32 %v3535_v53, %v9162_v41  ;;  %v3349_v56 = vsub.f32 %v3181_v27, %v3265_v40  ;;  %5181 = vrsqrt.f32 %v2933_v46  ;;  %v9166_v27 = vld [vmem:[#allocation132_spill] sm:$0xff]  ;;  %v3212_v41 = vld [vmem:[%s7029_s27 + $0x218] sm:$0xff]  ;;  %v9167_v46 = vld [vmem:[#allocation166_spill] sm:$0xff] }
 0x39d   : > { %v8005_v34 = vpop.permute.xlu0 %3744  ;;  %v2975_v53 = vadd.f32 0.001, %v2807_v35  ;;  %v3099_v40 = vmul.f32 %v5178_v50, %v2847_v39  ;;  %v9168_v35 = vld [vmem:[#allocation147_spill] sm:$0xff] }
 0x39e   : > { %v8010_v22 = vmul.f32 %v8005_v34, %v9161_v43  ;;  %4292 = vperm.xlu0 %5015, %v3374_v9   ;;  %3789 = vperm.xlu1 %5016, %v8000_v33   ;;  %v4058_v0 = vpop.permute.xlu1 %4057  ;;  %v9163_v43 = vld [vmem:[#allocation116_spill] sm:$0xff]  ;;  %v3214_v50 = vld [vmem:[%s7029_s27 + $0x228] sm:$0xff] }
 0x39f   : > { %v4433_v26 = vadd.f32 %v4058_v0, %v3845_v19  ;;  %v4434_v59 = vadd.f32 %v4058_v0, %v3846_v18  ;;  %v9164_v9 = vld [vmem:[#allocation168_spill] sm:$0xff]  ;;  %v9165_v19 = vld [vmem:[#allocation121_spill] sm:$0xff]  ;;  %5183 = vrsqrt.f32 %v2975_v53 }
 0x3a0   : > { %v3294_v15 = vmul.f32 %v9164_v9, %v9163_v43  ;;  %v3296_v0 = vmul.f32 %v9166_v27, %v9165_v19  ;;  %v5207_v9 = vld [vmem:[%s5740_s21 + $0x108] sm:$0xff]  ;;  %v9171_v27 = vld [vmem:[#allocation60_spill] sm:$0xff] }
 0x3a1   : > { %4601 = vst [vmem:[%s5740_s21 + $0xe0] sm:$0xff] %v4433_v26  ;;  %4602 = vst.msk [vmem:[%s5740_s21 + $0xe8] sm:$0xff] %vm1297_vm1, %v4434_v59  ;;  %v4123_v25 = vpop.permute.xlu0 %4122  ;;  %v5180_v26 = vpop.eup %5179 }
 0x3a2   : > { %v4459_v18 = vadd.f32 %v4123_v25, %v3871_v31  ;;  %v4460_v42 = vadd.f32 %v4123_v25, %v3872_v36  ;;  %4302 = vperm.xlu0 %5015, %v3376_v29   ;;  %4167 = vperm.xlu1 %5016, %v3349_v56   ;;  %v3480_v38 = vpop.permute.xlu1 %3479  ;;  %v3378_v14 = vsub.f32 %v3210_v48, %v3294_v15  ;;  %v2889_v25 = vld [vmem:[%s6367_s24 + $0x280] sm:$0xff] }
 0x3a3   : > { %v3298_v31 = vmul.f32 %v9168_v35, %v9167_v46  ;;  %v3380_v3 = vsub.f32 %v3212_v41, %v3296_v0  ;;  %v8033_v15 = vmul.f32 %v5180_v26, %v2889_v25  ;;  %v3267_v36 = vmul.f32 %v3099_v40, %v7924_v24  ;;  %v9169_v56 = vld [vmem:[#allocation34_spill] sm:$0xff]  ;;  %v5208_v0 = vld [vmem:[%s5740_s21 + $0x1d8] sm:$0xff]  ;;  %v9172_v25 = vld [vmem:[#allocation135_spill] sm:$0xff] }
 0x3a4   : > { %4627 = vst [vmem:[%s5740_s21 + $0x1b0] sm:$0xff] %v4459_v18  ;;  %4628 = vst.msk [vmem:[%s5740_s21 + $0x1b8] sm:$0xff] %vm1297_vm1, %v4460_v42  ;;  %v3849_v43 = vmul.f32 %v3480_v38, %v9169_v56  ;;  %v3850_v48 = vmul.f32 %v5207_v9, %v3480_v38  ;;  %v3183_v18 = vld [vmem:[%s7029_s27 + $0x130] sm:$0xff]  ;;  %v9170_v42 = vld [vmem:[#allocation61_spill] sm:$0xff] }
 0x3a5   : > { %v3545_v59 = vpop.permute.xlu0 %3544  ;;  %v3382_v19 = vsub.f32 %v3214_v50, %v3298_v31  ;;  %v3351_v41 = vsub.f32 %v3183_v18, %v3267_v36  ;;  %v9173_v46 = vld [vmem:[#allocation81_spill] sm:$0xff]  ;;  %v2849_v9 = vld [vmem:[%s6367_s24 + $0x140] sm:$0xff]  ;;  %v9174_v18 = vld [vmem:[#allocation140_spill] sm:$0xff] }
 0x3a6   : > { %4312 = vperm.xlu0 %5015, %v3378_v14   ;;  %3589 = vperm.xlu1 %5016, %v3099_v40   ;;  %v8029_v29 = vpop.permute.xlu1 %3689  ;;  %v3875_v38 = vmul.f32 %v3545_v59, %v9171_v27  ;;  %v3876_v26 = vmul.f32 %v5208_v0, %v3545_v59  ;;  %v3300_v35 = vmul.f32 %v9173_v46, %v9172_v25  ;;  %v5182_v56 = vpop.eup %5181  ;;  %v3218_v27 = vld [vmem:[%s7029_s27 + $0x248] sm:$0xff]  ;;  %v2891_v0 = vld [vmem:[%s6367_s24 + $0x290] sm:$0xff]  ;;  %v3220_v46 = vld [vmem:[%s7029_s27 + $0x258] sm:$0xff] }
 0x3a7   : > { %v3101_v36 = vmul.f32 %v5182_v56, %v2849_v9  ;;  %v9177_v56 = vld [vmem:[#allocation38_spill] sm:$0xff] }
 0x3a9   : > { %v8039_v39 = vpop.permute.xlu0 %3754 }
 0x3aa   : > { %v8044_v53 = vmul.f32 %v8039_v39, %v9170_v42  ;;  %4322 = vperm.xlu0 %5015, %v3380_v3   ;;  %3799 = vperm.xlu1 %5016, %v8033_v15   ;;  %v4068_v14 = vpop.permute.xlu1 %4067  ;;  %v9175_v42 = vld [vmem:[#allocation151_spill] sm:$0xff] }
 0x3ab   : > { %v4437_v24 = vadd.f32 %v4068_v14, %v3849_v43  ;;  %v4438_v40 = vadd.f32 %v4068_v14, %v3850_v48  ;;  %v3216_v43 = vld [vmem:[%s7029_s27 + $0x238] sm:$0xff]  ;;  %v3302_v14 = vmul.f32 %v9175_v42, %v9174_v18 }
 0x3ac   : > { %v3384_v59 = vsub.f32 %v3216_v43, %v3300_v35  ;;  %v3269_v35 = vmul.f32 %v3101_v36, %v7968_v55  ;;  %v5209_v43 = vld [vmem:[%s5740_s21 + $0x128] sm:$0xff] }
 0x3ad   : > { %4605 = vst [vmem:[%s5740_s21 + $0x100] sm:$0xff] %v4437_v24  ;;  %4606 = vst.msk [vmem:[%s5740_s21 + $0x108] sm:$0xff] %vm1297_vm1, %v4438_v40  ;;  %v4133_v3 = vpop.permute.xlu0 %4132  ;;  %v5184_v24 = vpop.eup %5183 }
 0x3ae   : > { %v4463_v31 = vadd.f32 %v4133_v3, %v3875_v38  ;;  %v4464_v50 = vadd.f32 %v4133_v3, %v3876_v26  ;;  %4332 = vperm.xlu0 %5015, %v3382_v19   ;;  %4177 = vperm.xlu1 %5016, %v3351_v41   ;;  %v3490_v48 = vpop.permute.xlu1 %3489  ;;  %v9176_v38 = vld [vmem:[#allocation146_spill] sm:$0xff]  ;;  %v3386_v41 = vsub.f32 %v3218_v27, %v3302_v14  ;;  %v9179_v14 = vld [vmem:[#allocation79_spill] sm:$0xff]  ;;  %v9181_v27 = vld [vmem:[#allocation64_spill] sm:$0xff] }
 0x3af   : > { %v3304_v26 = vmul.f32 %v7644_v23, %v9176_v38  ;;  %v8067_v25 = vmul.f32 %v5184_v24, %v2891_v0  ;;  %v3853_v3 = vmul.f32 %v3490_v48, %v9177_v56  ;;  %v3854_v9 = vmul.f32 %v5209_v43, %v3490_v48  ;;  %v9180_v48 = vld [vmem:[#allocation152_spill] sm:$0xff]  ;;  %v5210_v38 = vld [vmem:[%s5740_s21 + $0x1f8] sm:$0xff] }
 0x3b0   : > { %4631 = vst [vmem:[%s5740_s21 + $0x1d0] sm:$0xff] %v4463_v31  ;;  %4632 = vst.msk [vmem:[%s5740_s21 + $0x1d8] sm:$0xff] %vm1297_vm1, %v4464_v50  ;;  %v3185_v50 = vld [vmem:[%s7029_s27 + $0x140] sm:$0xff]  ;;  %v3271_v24 = vmul.f32 %v9180_v48, %v9179_v14 }
 0x3b1   : > { %v3555_v40 = vpop.permute.xlu0 %3554  ;;  %v3388_v42 = vsub.f32 %v3220_v46, %v3304_v26  ;;  %v3353_v43 = vsub.f32 %v3185_v50, %v3269_v35  ;;  %v3222_v26 = vld [vmem:[%s7029_s27 + $0x268] sm:$0xff]  ;;  %v3187_v46 = vld [vmem:[%s7029_s27 + $0x150] sm:$0xff]  ;;  %v3308_v35 = vmul.f32 %v7755_v58, %v7623_v21  ;;  %v3310_v21 = vmul.f32 %v7796_v45, %v7678_v12 }
 0x3b2   : > { %4342 = vperm.xlu0 %5015, %v3384_v59   ;;  %3599 = vperm.xlu1 %5016, %v3101_v36   ;;  %v8063_v19 = vpop.permute.xlu1 %3699  ;;  %v9178_v59 = vld [vmem:[#allocation65_spill] sm:$0xff]  ;;  %v3879_v0 = vmul.f32 %v3555_v40, %v9181_v27  ;;  %v3880_v56 = vmul.f32 %v5210_v38, %v3555_v40  ;;  %v9183_v50 = vld [vmem:[#allocation88_spill] sm:$0xff] }
 0x3b3   : > { %v3224_v27 = vld [vmem:[%s7029_s27 + $0x278] sm:$0xff]  ;;  %v9185_v38 = vld [vmem:[#allocation96_spill] sm:$0xff] }
 0x3b4   : > { %v3191_v58 = vld [vmem:[%s7029_s27 + $0x170] sm:$0xff] }
 0x3b5   : > { %v8073_v31 = vpop.permute.xlu0 %3764 }
 0x3b6   : > { %v8078_v18 = vmul.f32 %v8073_v31, %v9178_v59  ;;  %4352 = vperm.xlu0 %5015, %v3386_v41   ;;  %3809 = vperm.xlu1 %5016, %v8067_v25   ;;  %v4078_v23 = vpop.permute.xlu1 %4077  ;;  %v9182_v59 = vld [vmem:[#allocation142_spill] sm:$0xff] }
 0x3b7   : > { %v4441_v55 = vadd.f32 %v4078_v23, %v3853_v3  ;;  %v4442_v36 = vadd.f32 %v4078_v23, %v3854_v9  ;;  %v3306_v41 = vmul.f32 %v7705_v11, %v9182_v59  ;;  %v3355_v11 = vsub.f32 %v3187_v46, %v3271_v24  ;;  %v9187_v24 = vld [vmem:[#allocation42_spill] sm:$0xff] }
 0x3b8   : > { %v3392_v59 = vsub.f32 %v3224_v27, %v3308_v35 }
 0x3b9   : > { %4609 = vst [vmem:[%s5740_s21 + $0x120] sm:$0xff] %v4441_v55  ;;  %4610 = vst.msk [vmem:[%s5740_s21 + $0x128] sm:$0xff] %vm1297_vm1, %v4442_v36  ;;  %v4143_v3 = vpop.permute.xlu0 %4142  ;;  %v3390_v40 = vsub.f32 %v3222_v26, %v3306_v41  ;;  %v9184_v55 = vld [vmem:[#allocation125_spill] sm:$0xff]  ;;  %v5211_v26 = vld [vmem:[%s5740_s21 + $0x148] sm:$0xff] }
 0x3ba   : > { %v4467_v9 = vadd.f32 %v4143_v3, %v3879_v0  ;;  %v4468_v23 = vadd.f32 %v4143_v3, %v3880_v56  ;;  %4362 = vperm.xlu0 %5015, %v3388_v42   ;;  %4187 = vperm.xlu1 %5016, %v3353_v43   ;;  %v3500_v14 = vpop.permute.xlu1 %3499  ;;  %v3273_v36 = vmul.f32 %v9184_v55, %v9183_v50  ;;  %v3189_v0 = vld [vmem:[%s7029_s27 + $0x160] sm:$0xff]  ;;  %v9186_v56 = vld [vmem:[#allocation101_spill] sm:$0xff]  ;;  %v9189_v55 = vld [vmem:[#allocation68_spill] sm:$0xff] }
 0x3bb   : > { %v3275_v43 = vmul.f32 %v9186_v56, %v9185_v38  ;;  %v3857_v3 = vmul.f32 %v3500_v14, %v9187_v24  ;;  %v3858_v46 = vmul.f32 %v5211_v26, %v3500_v14  ;;  %v5212_v14 = vld [vmem:[%s5740_s21 + $0x218] sm:$0xff]  ;;  %v9190_v38 = vld [vmem:[#allocation104_spill] sm:$0xff]  ;;  %v3193_v26 = vld [vmem:[%s7029_s27 + $0x180] sm:$0xff] }
 0x3bc   : > { %4635 = vst [vmem:[%s5740_s21 + $0x1f0] sm:$0xff] %v4467_v9  ;;  %4636 = vst.msk [vmem:[%s5740_s21 + $0x1f8] sm:$0xff] %vm1297_vm1, %v4468_v23  ;;  %v3357_v41 = vsub.f32 %v3189_v0, %v3273_v36  ;;  %v3226_v23 = vld [vmem:[%s7029_s27 + $0x288] sm:$0xff]  ;;  %v9191_v56 = vld [vmem:[#allocation108_spill] sm:$0xff] }
 0x3bd   : > { %v3565_v48 = vpop.permute.xlu0 %3564  ;;  %v3359_v50 = vsub.f32 %v3191_v58, %v3275_v43  ;;  %v3394_v0 = vsub.f32 %v3226_v23, %v3310_v21  ;;  %v3277_v24 = vmul.f32 %v9191_v56, %v9190_v38  ;;  %v9192_v58 = vld [vmem:[#allocation111_spill] sm:$0xff]  ;;  %v9193_v23 = vld [vmem:[#allocation124_spill] sm:$0xff] }
 0x3be   : > { %4372 = vperm.xlu0 %5015, %v3390_v40   ;;  %4197 = vperm.xlu1 %5016, %v3355_v11   ;;  %v8101_v42 = vpop.permute.xlu1 %3709  ;;  %v9188_v40 = vld [vmem:[#allocation69_spill] sm:$0xff]  ;;  %v3883_v36 = vmul.f32 %v3565_v48, %v9189_v55  ;;  %v3884_v27 = vmul.f32 %v5212_v14, %v3565_v48 }
 0x3bf   : > { %v3361_v21 = vsub.f32 %v3193_v26, %v3277_v24  ;;  %v3197_v24 = vld [vmem:[%s7029_s27 + $0x1a0] sm:$0xff] }
 0x3c1   : > { %v8110_v9 = vpop.permute.xlu0 %3774 }
 0x3c2   : > { %v8115_v11 = vmul.f32 %v8110_v9, %v9188_v40  ;;  %4382 = vperm.xlu0 %5015, %v3392_v59   ;;  %4207 = vperm.xlu1 %5016, %v3357_v41   ;;  %v4088_v35 = vpop.permute.xlu1 %4087  ;;  %v3228_v41 = vld [vmem:[%s7029_s27 + $0x298] sm:$0xff]  ;;  %v3279_v40 = vmul.f32 %v9193_v23, %v9192_v58 }
 0x3c3   : > { %v4445_v12 = vadd.f32 %v4088_v35, %v3857_v3  ;;  %v4446_v45 = vadd.f32 %v4088_v35, %v3858_v46  ;;  %v3396_v48 = vsub.f32 %v3228_v41, %v7696_v63  ;;  %v5213_v63 = vld [vmem:[%s5740_s21 + $0x168] sm:$0xff]  ;;  %v5214_v58 = vld [vmem:[%s5740_s21 + $0x238] sm:$0xff] }
 0x3c5   : > { %4613 = vst [vmem:[%s5740_s21 + $0x140] sm:$0xff] %v4445_v12  ;;  %4614 = vst.msk [vmem:[%s5740_s21 + $0x148] sm:$0xff] %vm1297_vm1, %v4446_v45  ;;  %v4153_v59 = vpop.permute.xlu0 %4152  ;;  %v3195_v12 = vld [vmem:[%s7029_s27 + $0x190] sm:$0xff] }
 0x3c6   : > { %v4471_v3 = vadd.f32 %v4153_v59, %v3883_v36  ;;  %v4472_v46 = vadd.f32 %v4153_v59, %v3884_v27  ;;  %4392 = vperm.xlu0 %5015, %v3394_v0   ;;  %4217 = vperm.xlu1 %5016, %v3359_v50   ;;  %v3510_v43 = vpop.permute.xlu1 %3509  ;;  %v3363_v55 = vsub.f32 %v3195_v12, %v3279_v40  ;;  %v9195_v50 = vld [vmem:[#allocation118_spill] sm:$0xff]  ;;  %v9196_v36 = vld [vmem:[#allocation127_spill] sm:$0xff]  ;;  %v9198_v59 = vld [vmem:[#allocation73_spill] sm:$0xff] }
 0x3c7   : > { %v3281_v14 = vmul.f32 %v9196_v36, %v9195_v50  ;;  %v9197_v27 = vld [vmem:[#allocation46_spill] sm:$0xff]  ;;  %v3862_v38 = vmul.f32 %v5213_v63, %v3510_v43  ;;  %v9201_v12 = vld [vmem:[#allocation133_spill] sm:$0xff] }
 0x3c8   : > { %4639 = vst [vmem:[%s5740_s21 + $0x210] sm:$0xff] %v4471_v3  ;;  %4640 = vst.msk [vmem:[%s5740_s21 + $0x218] sm:$0xff] %vm1297_vm1, %v4472_v46  ;;  %v3861_v0 = vmul.f32 %v3510_v43, %v9197_v27  ;;  %v9200_v40 = vld [vmem:[#allocation126_spill] sm:$0xff]  ;;  %v3199_v27 = vld [vmem:[%s7029_s27 + $0x1b0] sm:$0xff] }
 0x3c9   : > { %v3575_v35 = vpop.permute.xlu0 %3574  ;;  %v3365_v43 = vsub.f32 %v3197_v24, %v3281_v14  ;;  %v3283_v50 = vmul.f32 %v9201_v12, %v9200_v40  ;;  %v9203_v14 = vld [vmem:[#allocation134_spill] sm:$0xff] }
 0x3ca   : > { %4402 = vperm.xlu0 %5015, %v3396_v48   ;;  %4227 = vperm.xlu1 %5016, %v3361_v21   ;;  %v8133_v45 = vpop.permute.xlu1 %3719  ;;  %v9199_v48 = vld [vmem:[#allocation72_spill] sm:$0xff]  ;;  %v3888_v23 = vmul.f32 %v5214_v58, %v3575_v35  ;;  %v9207_v58 = vld [vmem:[#allocation130_spill] sm:$0xff] }
 0x3cb   : > { %9194 = vst [vmem:[#allocation4_spill] sm:$0xff] %v8133_v45  ;;  %v3887_v21 = vmul.f32 %v3575_v35, %v9199_v48  ;;  %v3367_v35 = vsub.f32 %v3199_v27, %v3283_v50  ;;  %v9209_v40 = vld [vmem:[#allocation50_spill] sm:$0xff]  ;;  %v5215_v50 = vld [vmem:[%s5740_s21 + $0x188] sm:$0xff] }
 0x3cd   : > { %v8139_v56 = vpop.permute.xlu0 %3784 }
 0x3ce   : > { %v8144_v41 = vmul.f32 %v8139_v56, %v9198_v59  ;;  %4237 = vperm.xlu1 %5016, %v3363_v55   ;;  %v4098_v26 = vpop.permute.xlu1 %4097 }
 0x3cf   : > { %v4449_v3 = vadd.f32 %v4098_v26, %v3861_v0  ;;  %v4450_v46 = vadd.f32 %v4098_v26, %v3862_v38  ;;  %v9202_v38 = vld [vmem:[#allocation131_spill] sm:$0xff]  ;;  %v3201_v26 = vld [vmem:[%s7029_s27 + $0x1c0] sm:$0xff] }
 0x3d0   : > { %v3285_v24 = vmul.f32 %v9203_v14, %v9202_v38 }
 0x3d1   : > { %4617 = vst [vmem:[%s5740_s21 + $0x160] sm:$0xff] %v4449_v3  ;;  %4618 = vst.msk [vmem:[%s5740_s21 + $0x168] sm:$0xff] %vm1297_vm1, %v4450_v46  ;;  %v4163_v36 = vpop.permute.xlu0 %4162  ;;  %v9205_v46 = vld [vmem:[#allocation51_spill] sm:$0xff] }
 0x3d2   : > { %v4475_v55 = vadd.f32 %v4163_v36, %v3887_v21  ;;  %v4476_v63 = vadd.f32 %v4163_v36, %v3888_v23  ;;  %4247 = vperm.xlu1 %5016, %v3365_v43   ;;  %v3520_v0 = vpop.permute.xlu1 %3519  ;;  %v3369_v21 = vsub.f32 %v3201_v26, %v3285_v24  ;;  %v9208_v23 = vld [vmem:[#allocation143_spill] sm:$0xff]  ;;  %v9211_v26 = vld [vmem:[#allocation76_spill] sm:$0xff] }
 0x3d3   : > { %v3287_v43 = vmul.f32 %v9208_v23, %v9207_v58  ;;  %v3865_v12 = vmul.f32 %v3520_v0, %v9209_v40  ;;  %v3866_v36 = vmul.f32 %v5215_v50, %v3520_v0  ;;  %v5216_v58 = vld [vmem:[%s5740_s21 + $0x258] sm:$0xff]  ;;  %v9212_v40 = vld [vmem:[#allocation139_spill] sm:$0xff]  ;;  %v9213_v50 = vld [vmem:[#allocation144_spill] sm:$0xff] }
 0x3d4   : > { %4643 = vst [vmem:[%s5740_s21 + $0x230] sm:$0xff] %v4475_v55  ;;  %4644 = vst.msk [vmem:[%s5740_s21 + $0x238] sm:$0xff] %vm1297_vm1, %v4476_v63  ;;  %v3203_v55 = vld [vmem:[%s7029_s27 + $0x1d0] sm:$0xff]  ;;  %v9210_v63 = vld [vmem:[#allocation77_spill] sm:$0xff] }
 0x3d5   : > { %v3585_v59 = vpop.permute.xlu0 %3584  ;;  %v3371_v0 = vsub.f32 %v3203_v55, %v3287_v43 }
 0x3d6   : > { %4257 = vperm.xlu1 %5016, %v3367_v35   ;;  %v8160_v3 = vpop.permute.xlu1 %3729  ;;  %v3892_v23 = vmul.f32 %v5216_v58, %v3585_v59  ;;  %v9217_v58 = vld [vmem:[#allocation149_spill] sm:$0xff] }
 0x3d7   : > { %9204 = vst [vmem:[#allocation2_spill] sm:$0xff] %v8160_v3  ;;  %v8164_v48 = vmul.f32 %v8160_v3, %v9205_v46  ;;  %v3891_v46 = vmul.f32 %v3585_v59, %v9211_v26  ;;  %v3205_v3 = vld [vmem:[%s7029_s27 + $0x1e0] sm:$0xff] }
 0x3d9   : > { %9206 = vst [vmem:[#allocation24_spill] sm:$0xff] %v8164_v48  ;;  %v8170_v27 = vpop.permute.xlu0 %3794  ;;  %v3289_v48 = vmul.f32 %v9213_v50, %v9212_v40  ;;  %v3209_v40 = vld [vmem:[%s7029_s27 + $0x200] sm:$0xff]  ;;  %v9219_v50 = vld [vmem:[#allocation87_spill] sm:$0xff] }
 0x3da   : > { %v8175_v35 = vmul.f32 %v8170_v27, %v9210_v63  ;;  %4267 = vperm.xlu1 %5016, %v3369_v21   ;;  %v4108_v38 = vpop.permute.xlu1 %4107 }
 0x3db   : > { %v4453_v14 = vadd.f32 %v4108_v38, %v3865_v12  ;;  %v4454_v24 = vadd.f32 %v4108_v38, %v3866_v36  ;;  %v3373_v59 = vsub.f32 %v3205_v3, %v3289_v48  ;;  %v9214_v36 = vld [vmem:[#allocation145_spill] sm:$0xff]  ;;  %v3207_v38 = vld [vmem:[%s7029_s27 + $0x1f0] sm:$0xff]  ;;  %v5217_v3 = vld [vmem:[%s5740_s21 + $0x1a8] sm:$0xff] }
 0x3dc   : > { %v3291_v43 = vmul.f32 %v7590_v60, %v9214_v36  ;;  %v9220_v36 = vld [vmem:[#allocation86_spill] sm:$0xff] }
 0x3dd   : > { %4621 = vst [vmem:[%s5740_s21 + $0x180] sm:$0xff] %v4453_v14  ;;  %4622 = vst.msk [vmem:[%s5740_s21 + $0x188] sm:$0xff] %vm1297_vm1, %v4454_v24  ;;  %v4173_v63 = vpop.permute.xlu0 %4172  ;;  %v9215_v24 = vld [vmem:[#allocation55_spill] sm:$0xff] }
 0x3de   : > { %v4479_v21 = vadd.f32 %v4173_v63, %v3891_v46  ;;  %v4480_v45 = vadd.f32 %v4173_v63, %v3892_v23  ;;  %4277 = vperm.xlu1 %5016, %v3371_v0   ;;  %v3530_v12 = vpop.permute.xlu1 %3529  ;;  %v3375_v46 = vsub.f32 %v3207_v38, %v3291_v43  ;;  %v3293_v23 = vmul.f32 %v7680_v5, %v9217_v58  ;;  %v9218_v0 = vld [vmem:[#allocation54_spill] sm:$0xff]  ;;  %v5218_v38 = vld [vmem:[%s5740_s21 + $0x278] sm:$0xff] }
 0x3df   : > { %v3870_v60 = vmul.f32 %v5217_v3, %v3530_v12  ;;  %v9221_v58 = vld [vmem:[#allocation150_spill] sm:$0xff] }
 0x3e0   : > { %4647 = vst [vmem:[%s5740_s21 + $0x250] sm:$0xff] %v4479_v21  ;;  %4648 = vst.msk [vmem:[%s5740_s21 + $0x258] sm:$0xff] %vm1297_vm1, %v4480_v45  ;;  %v3869_v45 = vmul.f32 %v3530_v12, %v9218_v0  ;;  %v3377_v12 = vsub.f32 %v3209_v40, %v3293_v23  ;;  %v3295_v0 = vmul.f32 %v7738_v10, %v9221_v58  ;;  %v3213_v10 = vld [vmem:[%s7029_s27 + $0x220] sm:$0xff] }
 0x3e1   : > { %v3595_v55 = vpop.permute.xlu0 %3594  ;;  %v3297_v23 = vmul.f32 %v7784_v57, %v7655_v61 }
 0x3e2   : > { %4287 = vperm.xlu1 %5016, %v3373_v59   ;;  %v8191_v14 = vpop.permute.xlu1 %3739  ;;  %v3895_v43 = vmul.f32 %v3595_v55, %v9220_v36  ;;  %v3299_v36 = vmul.f32 %v7823_v8, %v7720_v49  ;;  %v9225_v49 = vld [vmem:[#allocation117_spill] sm:$0xff] }
 0x3e3   : > { %v8195_v26 = vmul.f32 %v8191_v14, %v9215_v24  ;;  %v3896_v24 = vmul.f32 %v5218_v38, %v3595_v55  ;;  %v5219_v38 = vld [vmem:[%s5740_s21 + $0x1c8] sm:$0xff] }
 0x3e5   : > { %9216 = vst [vmem:[#allocation155_spill] sm:$0xff] %v8195_v26  ;;  %v8201_v48 = vpop.permute.xlu0 %3804 }
 0x3e6   : > { %v8206_v63 = vmul.f32 %v8201_v48, %v9219_v50  ;;  %4297 = vperm.xlu1 %5016, %v3375_v46   ;;  %v4118_v21 = vpop.permute.xlu1 %4117  ;;  %v3211_v50 = vld [vmem:[%s7029_s27 + $0x210] sm:$0xff] }
 0x3e7   : > { %v4457_v59 = vadd.f32 %v4118_v21, %v3869_v45  ;;  %v4458_v5 = vadd.f32 %v4118_v21, %v3870_v60  ;;  %v3379_v55 = vsub.f32 %v3211_v50, %v3295_v0  ;;  %v9222_v21 = vld [vmem:[#allocation59_spill] sm:$0xff] }
 0x3e9   : > { %4625 = vst [vmem:[%s5740_s21 + $0x1a0] sm:$0xff] %v4457_v59  ;;  %4626 = vst.msk [vmem:[%s5740_s21 + $0x1a8] sm:$0xff] %vm1297_vm1, %v4458_v5  ;;  %v4183_v3 = vpop.permute.xlu0 %4182  ;;  %v3381_v5 = vsub.f32 %v3213_v10, %v3297_v23  ;;  %v3301_v23 = vmul.f32 %v7868_v17, %v7766_v54  ;;  %v3303_v17 = vmul.f32 %v7910_v28, %v7809_v52 }
 0x3ea   : > { %v4483_v46 = vadd.f32 %v4183_v3, %v3895_v43  ;;  %v4484_v26 = vadd.f32 %v4183_v3, %v3896_v24  ;;  %4307 = vperm.xlu1 %5016, %v3377_v12   ;;  %v3540_v45 = vpop.permute.xlu1 %3539  ;;  %v9223_v43 = vld [vmem:[#allocation58_spill] sm:$0xff]  ;;  %v3215_v24 = vld [vmem:[%s7029_s27 + $0x230] sm:$0xff]  ;;  %v9224_v12 = vld [vmem:[#allocation119_spill] sm:$0xff]  ;;  %v3305_v28 = vmul.f32 %v7952_v16, %v7858_v62 }
 0x3eb   : > { %v3874_v61 = vmul.f32 %v5219_v38, %v3540_v45  ;;  %v9226_v38 = vld [vmem:[#allocation5_spill] sm:$0xff] }
 0x3ec   : > { %4651 = vst [vmem:[%s5740_s21 + $0x270] sm:$0xff] %v4483_v46  ;;  %4652 = vst.msk [vmem:[%s5740_s21 + $0x278] sm:$0xff] %vm1297_vm1, %v4484_v26  ;;  %v3873_v26 = vmul.f32 %v3540_v45, %v9223_v43  ;;  %v5220_v46 = vld [vmem:[%s5740_s21 + $0x298] sm:$0xff]  ;;  %v3383_v45 = vsub.f32 %v3215_v24, %v3299_v36  ;;  %v3219_v24 = vld [vmem:[%s7029_s27 + $0x250] sm:$0xff] }
 0x3ed   : > { %v3605_v60 = vpop.permute.xlu0 %3604  ;;  %v3387_v52 = vsub.f32 %v3219_v24, %v3303_v17  ;;  %v9232_v24 = vld [vmem:[#allocation13_spill] sm:$0xff] }
 0x3ee   : > { %4317 = vperm.xlu1 %5016, %v3379_v55   ;;  %v8222_v40 = vpop.permute.xlu1 %3749  ;;  %v3899_v8 = vmul.f32 %v3605_v60, %v9225_v49  ;;  %v3900_v55 = vmul.f32 %v5220_v46, %v3605_v60  ;;  %v5224_v62 = vld [vmem:[%s5740_s21 + $0x2f8] sm:$0xff] }
 0x3ef   : > { %v8226_v59 = vmul.f32 %v8222_v40, %v9222_v21  ;;  %v3217_v21 = vld [vmem:[%s7029_s27 + $0x240] sm:$0xff] }
 0x3f0   : > { %v3385_v54 = vsub.f32 %v3217_v21, %v3301_v23  ;;  %v5222_v23 = vld [vmem:[%s5740_s21 + $0x2d8] sm:$0xff] }
 0x3f1   : > { %v8232_v57 = vpop.permute.xlu0 %3814 }
 0x3f2   : > { %v8237_v58 = vmul.f32 %v8232_v57, %v9224_v12  ;;  %4327 = vperm.xlu1 %5016, %v3381_v5   ;;  %v4128_v0 = vpop.permute.xlu1 %4127 }
 0x3f3   : > { %v4461_v3 = vadd.f32 %v4128_v0, %v3873_v26  ;;  %v4462_v50 = vadd.f32 %v4128_v0, %v3874_v61  ;;  %v9227_v61 = vld [vmem:[#allocation137_spill] sm:$0xff] }
 0x3f4   : > { %v3903_v12 = vmul.f32 %v9227_v61, %v9226_v38  ;;  %v5221_v0 = vld [vmem:[%s5740_s21 + $0x2b8] sm:$0xff]  ;;  %v5223_v38 = vld [vmem:[%s5740_s21 + $0x1e8] sm:$0xff] }
 0x3f5   : > { %4629 = vst [vmem:[%s5740_s21 + $0x1c0] sm:$0xff] %v4461_v3  ;;  %4630 = vst.msk [vmem:[%s5740_s21 + $0x1c8] sm:$0xff] %vm1297_vm1, %v4462_v50  ;;  %v4193_v10 = vpop.permute.xlu0 %4192  ;;  %v3904_v60 = vmul.f32 %v5221_v0, %v9227_v61  ;;  %v3221_v0 = vld [vmem:[%s7029_s27 + $0x260] sm:$0xff] }
 0x3f6   : > { %v4487_v5 = vadd.f32 %v4193_v10, %v3899_v8  ;;  %v4488_v43 = vadd.f32 %v4193_v10, %v3900_v55  ;;  %4337 = vperm.xlu1 %5016, %v3383_v45   ;;  %v3550_v26 = vpop.permute.xlu1 %3549  ;;  %v9228_v8 = vld [vmem:[#allocation63_spill] sm:$0xff]  ;;  %v9229_v55 = vld [vmem:[#allocation9_spill] sm:$0xff] }
 0x3f7   : > { %v9230_v45 = vld [vmem:[#allocation141_spill] sm:$0xff]  ;;  %v3878_v61 = vmul.f32 %v5223_v38, %v3550_v26 }
 0x3f8   : > { %4655 = vst [vmem:[%s5740_s21 + $0x290] sm:$0xff] %v4487_v5  ;;  %4656 = vst.msk [vmem:[%s5740_s21 + $0x298] sm:$0xff] %vm1297_vm1, %v4488_v43  ;;  %v3907_v10 = vmul.f32 %v9230_v45, %v9229_v55  ;;  %v3908_v21 = vmul.f32 %v5222_v23, %v9230_v45  ;;  %v9231_v5 = vld [vmem:[#allocation62_spill] sm:$0xff]  ;;  %v3307_v55 = vmul.f32 %v8000_v33, %v7900_v32 }
 0x3f9   : > { %v4203_v36 = vpop.permute.xlu0 %4202  ;;  %v3877_v43 = vmul.f32 %v3550_v26, %v9231_v5  ;;  %v3389_v26 = vsub.f32 %v3221_v0, %v3305_v28  ;;  %v9234_v5 = vld [vmem:[#allocation17_spill] sm:$0xff]  ;;  %v3309_v33 = vmul.f32 %v8033_v15, %v7942_v20  ;;  %v3225_v0 = vld [vmem:[%s7029_s27 + $0x280] sm:$0xff]  ;;  %v3311_v15 = vmul.f32 %v8067_v25, %v7982_v51 }
 0x3fa   : > { %v4491_v3 = vadd.f32 %v4203_v36, %v3903_v12  ;;  %v4492_v50 = vadd.f32 %v4203_v36, %v3904_v60  ;;  %4347 = vperm.xlu1 %5016, %v3385_v54   ;;  %v8257_v49 = vpop.permute.xlu1 %3759  ;;  %v5228_v51 = vld [vmem:[%s5740_s21 + $0x358] sm:$0xff] }
 0x3fb   : > { %v8261_v46 = vmul.f32 %v8257_v49, %v9228_v8  ;;  %v3393_v20 = vsub.f32 %v3225_v0, %v3309_v33  ;;  %v3924_v25 = vmul.f32 %v5228_v51, %v7631_v44 }
 0x3fc   : > { %4659 = vst [vmem:[%s5740_s21 + $0x2b0] sm:$0xff] %v4491_v3  ;;  %4660 = vst.msk [vmem:[%s5740_s21 + $0x2b8] sm:$0xff] %vm1297_vm1, %v4492_v50  ;;  %v9233_v50 = vld [vmem:[#allocation136_spill] sm:$0xff] }
 0x3fd   : > { %v4213_v12 = vpop.permute.xlu0 %4212  ;;  %v3911_v8 = vmul.f32 %v9233_v50, %v9232_v24  ;;  %v3912_v16 = vmul.f32 %v5224_v62, %v9233_v50  ;;  %v9237_v24 = vld [vmem:[#allocation21_spill] sm:$0xff]  ;;  %v9238_v50 = vld [vmem:[#allocation82_spill] sm:$0xff] }
 0x3fe   : > { %v4495_v60 = vadd.f32 %v4213_v12, %v3907_v10  ;;  %v4496_v54 = vadd.f32 %v4213_v12, %v3908_v21  ;;  %4357 = vperm.xlu1 %5016, %v3387_v52   ;;  %v4138_v36 = vpop.permute.xlu1 %4137  ;;  %v3223_v10 = vld [vmem:[%s7029_s27 + $0x270] sm:$0xff]  ;;  %v5226_v62 = vld [vmem:[%s5740_s21 + $0x338] sm:$0xff] }
 0x3ff   : > { %v4465_v3 = vadd.f32 %v4138_v36, %v3877_v43  ;;  %v4466_v17 = vadd.f32 %v4138_v36, %v3878_v61  ;;  %v9235_v43 = vld [vmem:[#allocation148_spill] sm:$0xff]  ;;  %v5225_v61 = vld [vmem:[%s5740_s21 + $0x318] sm:$0xff]  ;;  %v3391_v32 = vsub.f32 %v3223_v10, %v3307_v55 }
 0x400   : > { %4663 = vst [vmem:[%s5740_s21 + $0x2d0] sm:$0xff] %v4495_v60  ;;  %4664 = vst.msk [vmem:[%s5740_s21 + $0x2d8] sm:$0xff] %vm1297_vm1, %v4496_v54  ;;  %v3915_v38 = vmul.f32 %v9235_v43, %v9234_v5  ;;  %v3916_v28 = vmul.f32 %v5225_v61, %v9235_v43 }
 0x401   : > { %4633 = vst [vmem:[%s5740_s21 + $0x1e0] sm:$0xff] %v4465_v3  ;;  %4634 = vst.msk [vmem:[%s5740_s21 + $0x1e8] sm:$0xff] %vm1297_vm1, %v4466_v17  ;;  %v4223_v45 = vpop.permute.xlu0 %4222  ;;  %v9236_v3 = vld [vmem:[#allocation67_spill] sm:$0xff] }
 0x402   : > { %v4499_v23 = vadd.f32 %v4223_v45, %v3911_v8  ;;  %v4500_v21 = vadd.f32 %v4223_v45, %v3912_v16  ;;  %4367 = vperm.xlu1 %5016, %v3389_v26   ;;  %v3560_v52 = vpop.permute.xlu1 %3559  ;;  %v3919_v8 = vmul.f32 %v9238_v50, %v9237_v24  ;;  %v3920_v16 = vmul.f32 %v5226_v62, %v9238_v50  ;;  %v9239_v26 = vld [vmem:[#allocation66_spill] sm:$0xff]  ;;  %v5227_v45 = vld [vmem:[%s5740_s21 + $0x208] sm:$0xff] }
 0x403   : > { %v3881_v55 = vmul.f32 %v3560_v52, %v9239_v26  ;;  %v3882_v10 = vmul.f32 %v5227_v45, %v3560_v52 }
 0x404   : > { %4667 = vst [vmem:[%s5740_s21 + $0x2f0] sm:$0xff] %v4499_v23  ;;  %4668 = vst.msk [vmem:[%s5740_s21 + $0x2f8] sm:$0xff] %vm1297_vm1, %v4500_v21  ;;  %v3227_v21 = vld [vmem:[%s7029_s27 + $0x290] sm:$0xff] }
 0x405   : > { %v4233_v12 = vpop.permute.xlu0 %4232  ;;  %v3395_v52 = vsub.f32 %v3227_v21, %v3311_v15  ;;  %v9242_v15 = vld [vmem:[#allocation71_spill] sm:$0xff] }
 0x406   : > { %v4503_v60 = vadd.f32 %v4233_v12, %v3915_v38  ;;  %v4504_v54 = vadd.f32 %v4233_v12, %v3916_v28  ;;  %4377 = vperm.xlu1 %5016, %v3391_v32   ;;  %v8298_v36 = vpop.permute.xlu1 %3769  ;;  %v9240_v32 = vld [vmem:[#allocation25_spill] sm:$0xff] }
 0x407   : > { %v8302_v17 = vmul.f32 %v8298_v36, %v9236_v3  ;;  %v3923_v33 = vmul.f32 %v7631_v44, %v9240_v32  ;;  %v9241_v3 = vld [vmem:[#allocation29_spill] sm:$0xff] }
 0x408   : > { %4671 = vst [vmem:[%s5740_s21 + $0x310] sm:$0xff] %v4503_v60  ;;  %4672 = vst.msk [vmem:[%s5740_s21 + $0x318] sm:$0xff] %vm1297_vm1, %v4504_v54  ;;  %v3927_v24 = vmul.f32 %v7686_v2, %v9241_v3  ;;  %v5229_v44 = vld [vmem:[%s5740_s21 + $0x378] sm:$0xff] }
 0x409   : > { %v4243_v23 = vpop.permute.xlu0 %4242  ;;  %v3928_v50 = vmul.f32 %v5229_v44, %v7686_v2 }
 0x40a   : > { %v4507_v5 = vadd.f32 %v4243_v23, %v3919_v8  ;;  %v4508_v43 = vadd.f32 %v4243_v23, %v3920_v16  ;;  %4387 = vperm.xlu1 %5016, %v3393_v20   ;;  %v4148_v38 = vpop.permute.xlu1 %4147  ;;  %v9244_v23 = vld [vmem:[#allocation70_spill] sm:$0xff] }
 0x40b   : > { %v4469_v61 = vadd.f32 %v4148_v38, %v3881_v55  ;;  %v4470_v28 = vadd.f32 %v4148_v38, %v3882_v10  ;;  %v9243_v55 = vld [vmem:[#allocation33_spill] sm:$0xff] }
 0x40c   : > { %4675 = vst [vmem:[%s5740_s21 + $0x330] sm:$0xff] %v4507_v5  ;;  %4676 = vst.msk [vmem:[%s5740_s21 + $0x338] sm:$0xff] %vm1297_vm1, %v4508_v43  ;;  %v3931_v45 = vmul.f32 %v7743_v47, %v9243_v55  ;;  %v5230_v10 = vld [vmem:[%s5740_s21 + $0x398] sm:$0xff]  ;;  %v5231_v5 = vld [vmem:[%s5740_s21 + $0x228] sm:$0xff] }
 0x40d   : > { %4637 = vst [vmem:[%s5740_s21 + $0x200] sm:$0xff] %v4469_v61  ;;  %4638 = vst.msk [vmem:[%s5740_s21 + $0x208] sm:$0xff] %vm1297_vm1, %v4470_v28  ;;  %v4253_v12 = vpop.permute.xlu0 %4252  ;;  %v3932_v2 = vmul.f32 %v5230_v10, %v7743_v47  ;;  %v9247_v55 = vld [vmem:[#allocation75_spill] sm:$0xff]  ;;  %v9248_v10 = vld [vmem:[#allocation45_spill] sm:$0xff] }
 0x40e   : > { %v4511_v0 = vadd.f32 %v4253_v12, %v3923_v33  ;;  %v4512_v60 = vadd.f32 %v4253_v12, %v3924_v25  ;;  %4397 = vperm.xlu1 %5016, %v3395_v52   ;;  %v3570_v54 = vpop.permute.xlu1 %3569  ;;  %v9245_v25 = vld [vmem:[#allocation37_spill] sm:$0xff] }
 0x40f   : > { %v3885_v21 = vmul.f32 %v3570_v54, %v9244_v23  ;;  %v3886_v43 = vmul.f32 %v5231_v5, %v3570_v54  ;;  %v3935_v47 = vmul.f32 %v7790_v30, %v9245_v25  ;;  %v5232_v52 = vld [vmem:[%s5740_s21 + $0x3b8] sm:$0xff] }
 0x410   : > { %4679 = vst [vmem:[%s5740_s21 + $0x350] sm:$0xff] %v4511_v0  ;;  %4680 = vst.msk [vmem:[%s5740_s21 + $0x358] sm:$0xff] %vm1297_vm1, %v4512_v60  ;;  %v3936_v12 = vmul.f32 %v5232_v52, %v7790_v30  ;;  %v5234_v23 = vld [vmem:[%s5740_s21 + $0x3f8] sm:$0xff] }
 0x411   : > { %v4263_v8 = vpop.permute.xlu0 %4262  ;;  %v5236_v52 = vld [vmem:[%s5740_s21 + $0x418] sm:$0xff] }
 0x412   : > { %v4515_v62 = vadd.f32 %v4263_v8, %v3927_v24  ;;  %v4516_v16 = vadd.f32 %v4263_v8, %v3928_v50  ;;  %v8333_v20 = vpop.permute.xlu1 %3779  ;;  %v9246_v24 = vld [vmem:[#allocation41_spill] sm:$0xff] }
 0x413   : > { %v8337_v26 = vmul.f32 %v8333_v20, %v9242_v15  ;;  %v3939_v44 = vmul.f32 %v7830_v6, %v9246_v24  ;;  %v5233_v50 = vld [vmem:[%s5740_s21 + $0x3d8] sm:$0xff] }
 0x414   : > { %4683 = vst [vmem:[%s5740_s21 + $0x370] sm:$0xff] %v4515_v62  ;;  %4684 = vst.msk [vmem:[%s5740_s21 + $0x378] sm:$0xff] %vm1297_vm1, %v4516_v16  ;;  %v3940_v30 = vmul.f32 %v5233_v50, %v7830_v6  ;;  %v3944_v6 = vmul.f32 %v5234_v23, %v7875_v4  ;;  %v5237_v24 = vld [vmem:[%s5740_s21 + $0x438] sm:$0xff] }
 0x415   : > { %v4273_v38 = vpop.permute.xlu0 %4272 }
 0x416   : > { %v4519_v61 = vadd.f32 %v4273_v38, %v3931_v45  ;;  %v4520_v28 = vadd.f32 %v4273_v38, %v3932_v2  ;;  %v4158_v32 = vpop.permute.xlu1 %4157  ;;  %v3943_v2 = vmul.f32 %v7875_v4, %v9248_v10  ;;  %v9250_v4 = vld [vmem:[#allocation49_spill] sm:$0xff] }
 0x417   : > { %v4473_v33 = vadd.f32 %v4158_v32, %v3885_v21  ;;  %v4474_v51 = vadd.f32 %v4158_v32, %v3886_v43  ;;  %v9249_v21 = vld [vmem:[#allocation74_spill] sm:$0xff]  ;;  %v5235_v43 = vld [vmem:[%s5740_s21 + $0x248] sm:$0xff] }
 0x418   : > { %4687 = vst [vmem:[%s5740_s21 + $0x390] sm:$0xff] %v4519_v61  ;;  %4688 = vst.msk [vmem:[%s5740_s21 + $0x398] sm:$0xff] %vm1297_vm1, %v4520_v28 }
 0x419   : > { %4641 = vst [vmem:[%s5740_s21 + $0x220] sm:$0xff] %v4473_v33  ;;  %4642 = vst.msk [vmem:[%s5740_s21 + $0x228] sm:$0xff] %vm1297_vm1, %v4474_v51  ;;  %v4283_v0 = vpop.permute.xlu0 %4282 }
 0x41a   : > { %v4523_v60 = vadd.f32 %v4283_v0, %v3935_v47  ;;  %v4524_v54 = vadd.f32 %v4283_v0, %v3936_v12  ;;  %v3580_v3 = vpop.permute.xlu1 %3579  ;;  %v3947_v47 = vmul.f32 %v7917_v37, %v9250_v4  ;;  %v3948_v12 = vmul.f32 %v5236_v52, %v7917_v37 }
 0x41b   : > { %v3889_v5 = vmul.f32 %v3580_v3, %v9249_v21  ;;  %v3890_v38 = vmul.f32 %v5235_v43, %v3580_v3 }
 0x41c   : > { %4691 = vst [vmem:[%s5740_s21 + $0x3b0] sm:$0xff] %v4523_v60  ;;  %4692 = vst.msk [vmem:[%s5740_s21 + $0x3b8] sm:$0xff] %vm1297_vm1, %v4524_v54 }
 0x41d   : > { %v4293_v8 = vpop.permute.xlu0 %4292 }
 0x41e   : > { %v4527_v62 = vadd.f32 %v4293_v8, %v3939_v44  ;;  %v4528_v16 = vadd.f32 %v4293_v8, %v3940_v30  ;;  %v8365_v15 = vpop.permute.xlu1 %3789  ;;  %v3952_v44 = vmul.f32 %v5237_v24, %v7959_v1  ;;  %v9252_v1 = vld [vmem:[#allocation84_spill] sm:$0xff] }
 0x41f   : > { %v8369_v45 = vmul.f32 %v8365_v15, %v9247_v55  ;;  %v5238_v55 = vld [vmem:[%s5740_s21 + $0x458] sm:$0xff] }
 0x420   : > { %4695 = vst [vmem:[%s5740_s21 + $0x3d0] sm:$0xff] %v4527_v62  ;;  %4696 = vst.msk [vmem:[%s5740_s21 + $0x3d8] sm:$0xff] %vm1297_vm1, %v4528_v16  ;;  %v9251_v62 = vld [vmem:[#allocation85_spill] sm:$0xff]  ;;  %v3956_v10 = vmul.f32 %v5238_v55, %v8005_v34 }
 0x421   : > { %v4303_v61 = vpop.permute.xlu0 %4302  ;;  %v5240_v34 = vld [vmem:[%s5740_s21 + $0x478] sm:$0xff] }
 0x422   : > { %v4531_v28 = vadd.f32 %v4303_v61, %v3943_v2  ;;  %v4532_v32 = vadd.f32 %v4303_v61, %v3944_v6  ;;  %v4168_v33 = vpop.permute.xlu1 %4167  ;;  %v5239_v2 = vld [vmem:[%s5740_s21 + $0x268] sm:$0xff] }
 0x423   : > { %v4477_v51 = vadd.f32 %v4168_v33, %v3889_v5  ;;  %v4478_v25 = vadd.f32 %v4168_v33, %v3890_v38 }
 0x424   : > { %4699 = vst [vmem:[%s5740_s21 + $0x3f0] sm:$0xff] %v4531_v28  ;;  %4700 = vst.msk [vmem:[%s5740_s21 + $0x3f8] sm:$0xff] %vm1297_vm1, %v4532_v32  ;;  %v3960_v28 = vmul.f32 %v5240_v34, %v8039_v39 }
 0x425   : > { %4645 = vst [vmem:[%s5740_s21 + $0x240] sm:$0xff] %v4477_v51  ;;  %4646 = vst.msk [vmem:[%s5740_s21 + $0x248] sm:$0xff] %vm1297_vm1, %v4478_v25  ;;  %v4313_v0 = vpop.permute.xlu0 %4312  ;;  %v5241_v25 = vld [vmem:[%s5740_s21 + $0x498] sm:$0xff] }
 0x426   : > { %v4535_v60 = vadd.f32 %v4313_v0, %v3947_v47  ;;  %v4536_v54 = vadd.f32 %v4313_v0, %v3948_v12  ;;  %v3590_v3 = vpop.permute.xlu1 %3589  ;;  %v3964_v4 = vmul.f32 %v5241_v25, %v8073_v31  ;;  %v9253_v0 = vld [vmem:[#allocation98_spill] sm:$0xff]  ;;  %v9254_v31 = vld [vmem:[#allocation95_spill] sm:$0xff] }
 0x427   : > { %v3894_v23 = vmul.f32 %v5239_v2, %v3590_v3 }
 0x428   : > { %4703 = vst [vmem:[%s5740_s21 + $0x410] sm:$0xff] %v4535_v60  ;;  %4704 = vst.msk [vmem:[%s5740_s21 + $0x418] sm:$0xff] %vm1297_vm1, %v4536_v54 }
 0x429   : > { %v4323_v37 = vpop.permute.xlu0 %4322 }
 0x42a   : > { %v4539_v50 = vadd.f32 %v4323_v37, %v7964_v7  ;;  %v4540_v30 = vadd.f32 %v4323_v37, %v3952_v44  ;;  %v8396_v8 = vpop.permute.xlu1 %3799  ;;  %v3893_v7 = vmul.f32 %v3590_v3, %v9252_v1  ;;  %v9255_v1 = vld [vmem:[#allocation3_spill] sm:$0xff] }
 0x42b   : > { %v8400_v16 = vmul.f32 %v8396_v8, %v9251_v62 }
 0x42c   : > { %4707 = vst [vmem:[%s5740_s21 + $0x430] sm:$0xff] %v4539_v50  ;;  %4708 = vst.msk [vmem:[%s5740_s21 + $0x438] sm:$0xff] %vm1297_vm1, %v4540_v30 }
 0x42d   : > { %v4333_v6 = vpop.permute.xlu0 %4332 }
 0x42e   : > { %v4543_v21 = vadd.f32 %v4333_v6, %v8010_v22  ;;  %v4544_v5 = vadd.f32 %v4333_v6, %v3956_v10  ;;  %v4178_v43 = vpop.permute.xlu1 %4177  ;;  %v5244_v10 = vld [vmem:[%s5740_s21 + $0x4d8] sm:$0xff] }
 0x42f   : > { %v4481_v38 = vadd.f32 %v4178_v43, %v3893_v7  ;;  %v4482_v61 = vadd.f32 %v4178_v43, %v3894_v23  ;;  %v9256_v7 = vld [vmem:[#allocation138_spill] sm:$0xff]  ;;  %v5245_v23 = vld [vmem:[%s5740_s21 + $0x2a8] sm:$0xff] }
 0x430   : > { %4711 = vst [vmem:[%s5740_s21 + $0x450] sm:$0xff] %v4543_v21  ;;  %4712 = vst.msk [vmem:[%s5740_s21 + $0x458] sm:$0xff] %vm1297_vm1, %v4544_v5  ;;  %v3901_v2 = vmul.f32 %v9256_v7, %v9255_v1 }
 0x431   : > { %4649 = vst [vmem:[%s5740_s21 + $0x260] sm:$0xff] %v4481_v38  ;;  %4650 = vst.msk [vmem:[%s5740_s21 + $0x268] sm:$0xff] %vm1297_vm1, %v4482_v61  ;;  %v4343_v32 = vpop.permute.xlu0 %4342  ;;  %v5246_v61 = vld [vmem:[%s5740_s21 + $0x4f8] sm:$0xff] }
 0x432   : > { %v4547_v22 = vadd.f32 %v4343_v32, %v8044_v53  ;;  %v4548_v33 = vadd.f32 %v4343_v32, %v3960_v28  ;;  %v3600_v51 = vpop.permute.xlu1 %3599  ;;  %v5242_v53 = vld [vmem:[%s5740_s21 + $0x4b8] sm:$0xff]  ;;  %v3976_v34 = vmul.f32 %v5246_v61, %v8170_v27  ;;  %v9257_v28 = vld [vmem:[#allocation7_spill] sm:$0xff] }
 0x433   : > { %v3968_v54 = vmul.f32 %v5242_v53, %v8110_v9  ;;  %v3897_v3 = vmul.f32 %v3600_v51, %v9254_v31  ;;  %v3972_v9 = vmul.f32 %v5244_v10, %v8139_v56  ;;  %v3905_v32 = vmul.f32 %v7671_v13, %v9257_v28  ;;  %v5251_v10 = vld [vmem:[%s5740_s21 + $0x308] sm:$0xff] }
 0x434   : > { %4715 = vst [vmem:[%s5740_s21 + $0x470] sm:$0xff] %v4547_v22  ;;  %4716 = vst.msk [vmem:[%s5740_s21 + $0x478] sm:$0xff] %vm1297_vm1, %v4548_v33  ;;  %v5247_v22 = vld [vmem:[%s5740_s21 + $0x2c8] sm:$0xff] }
 0x435   : > { %v4353_v39 = vpop.permute.xlu0 %4352  ;;  %v9264_v61 = vld [vmem:[#allocation23_spill] sm:$0xff] }
 0x436   : > { %v4551_v47 = vadd.f32 %v4353_v39, %v8078_v18  ;;  %v4552_v52 = vadd.f32 %v4353_v39, %v3964_v4  ;;  %v8425_v12 = vpop.permute.xlu1 %3809  ;;  %v5243_v18 = vld [vmem:[%s5740_s21 + $0x288] sm:$0xff] }
 0x437   : > { %v8429_v60 = vmul.f32 %v8425_v12, %v9253_v0  ;;  %v3898_v24 = vmul.f32 %v5243_v18, %v3600_v51  ;;  %v9259_v0 = vld [vmem:[#allocation83_spill] sm:$0xff] }
 0x438   : > { %4719 = vst [vmem:[%s5740_s21 + $0x490] sm:$0xff] %v4551_v47  ;;  %4720 = vst.msk [vmem:[%s5740_s21 + $0x498] sm:$0xff] %vm1297_vm1, %v4552_v52  ;;  %v5248_v47 = vld [vmem:[%s5740_s21 + $0x518] sm:$0xff] }
 0x439   : > { %v4363_v44 = vpop.permute.xlu0 %4362  ;;  %v3980_v52 = vmul.f32 %v5248_v47, %v8201_v48 }
 0x43a   : > { %v4555_v37 = vadd.f32 %v4363_v44, %v8115_v11  ;;  %v4556_v50 = vadd.f32 %v4363_v44, %v3968_v54  ;;  %v4188_v30 = vpop.permute.xlu1 %4187  ;;  %v3902_v11 = vmul.f32 %v5245_v23, %v9256_v7  ;;  %v5249_v54 = vld [vmem:[%s5740_s21 + $0x2e8] sm:$0xff] }
 0x43b   : > { %v4485_v62 = vadd.f32 %v4188_v30, %v3897_v3  ;;  %v4486_v55 = vadd.f32 %v4188_v30, %v3898_v24  ;;  %v9260_v30 = vld [vmem:[#allocation15_spill] sm:$0xff] }
 0x43c   : > { %4723 = vst [vmem:[%s5740_s21 + $0x4b0] sm:$0xff] %v4555_v37  ;;  %4724 = vst.msk [vmem:[%s5740_s21 + $0x4b8] sm:$0xff] %vm1297_vm1, %v4556_v50  ;;  %v5250_v37 = vld [vmem:[%s5740_s21 + $0x538] sm:$0xff] }
 0x43d   : > { %4653 = vst [vmem:[%s5740_s21 + $0x280] sm:$0xff] %v4485_v62  ;;  %4654 = vst.msk [vmem:[%s5740_s21 + $0x288] sm:$0xff] %vm1297_vm1, %v4486_v55  ;;  %v4373_v6 = vpop.permute.xlu0 %4372  ;;  %v3984_v50 = vmul.f32 %v5250_v37, %v8232_v57  ;;  %v9261_v62 = vld [vmem:[#allocation153_spill] sm:$0xff] }
 0x43e   : > { %v4559_v56 = vadd.f32 %v4373_v6, %v8144_v41  ;;  %v4560_v21 = vadd.f32 %v4373_v6, %v3972_v9  ;;  %v4198_v5 = vpop.permute.xlu1 %4197  ;;  %v3906_v41 = vmul.f32 %v5247_v22, %v7671_v13  ;;  %v9258_v13 = vld [vmem:[#allocation11_spill] sm:$0xff]  ;;  %v3913_v55 = vmul.f32 %v9261_v62, %v9260_v30  ;;  %v9263_v6 = vld [vmem:[#allocation20_spill] sm:$0xff] }
 0x43f   : > { %v4489_v43 = vadd.f32 %v4198_v5, %v3901_v2  ;;  %v4490_v38 = vadd.f32 %v4198_v5, %v3902_v11  ;;  %v3909_v53 = vmul.f32 %v9259_v0, %v9258_v13  ;;  %v9262_v11 = vld [vmem:[#allocation19_spill] sm:$0xff] }
 0x440   : > { %4727 = vst [vmem:[%s5740_s21 + $0x4d0] sm:$0xff] %v4559_v56  ;;  %4728 = vst.msk [vmem:[%s5740_s21 + $0x4d8] sm:$0xff] %vm1297_vm1, %v4560_v21  ;;  %v3917_v56 = vmul.f32 %v9263_v6, %v9262_v11  ;;  %v5252_v21 = vld [vmem:[%s5740_s21 + $0x328] sm:$0xff] }
 0x441   : > { %4657 = vst [vmem:[%s5740_s21 + $0x2a0] sm:$0xff] %v4489_v43  ;;  %4658 = vst.msk [vmem:[%s5740_s21 + $0x2a8] sm:$0xff] %vm1297_vm1, %v4490_v38  ;;  %v4383_v33 = vpop.permute.xlu0 %4382  ;;  %v3918_v5 = vmul.f32 %v5252_v21, %v9263_v6  ;;  %v5258_v6 = vld [vmem:[%s5740_s21 + $0x3e8] sm:$0xff] }
 0x442   : > { %v4563_v27 = vadd.f32 %v4383_v33, %v8175_v35  ;;  %v4564_v51 = vadd.f32 %v4383_v33, %v3976_v34  ;;  %v4208_v25 = vpop.permute.xlu1 %4207  ;;  %v3910_v35 = vmul.f32 %v5249_v54, %v9259_v0  ;;  %v9265_v34 = vld [vmem:[#allocation154_spill] sm:$0xff]  ;;  %v9269_v54 = vld [vmem:[#allocation157_spill] sm:$0xff] }
 0x443   : > { %v4493_v4 = vadd.f32 %v4208_v25, %v3905_v32  ;;  %v4494_v39 = vadd.f32 %v4208_v25, %v3906_v41  ;;  %v3921_v28 = vmul.f32 %v9265_v34, %v9264_v61  ;;  %v5253_v32 = vld [vmem:[%s5740_s21 + $0x348] sm:$0xff]  ;;  %v9267_v25 = vld [vmem:[#allocation80_spill] sm:$0xff] }
 0x444   : > { %4731 = vst [vmem:[%s5740_s21 + $0x4f0] sm:$0xff] %v4563_v27  ;;  %4732 = vst.msk [vmem:[%s5740_s21 + $0x4f8] sm:$0xff] %vm1297_vm1, %v4564_v51  ;;  %v3922_v22 = vmul.f32 %v5253_v32, %v9265_v34  ;;  %v9266_v51 = vld [vmem:[#allocation27_spill] sm:$0xff] }
 0x445   : > { %4661 = vst [vmem:[%s5740_s21 + $0x2c0] sm:$0xff] %v4493_v4  ;;  %4662 = vst.msk [vmem:[%s5740_s21 + $0x2c8] sm:$0xff] %vm1297_vm1, %v4494_v39  ;;  %v4393_v31 = vpop.permute.xlu0 %4392  ;;  %v3925_v4 = vmul.f32 %v9267_v25, %v9266_v51  ;;  %v5254_v39 = vld [vmem:[%s5740_s21 + $0x368] sm:$0xff]  ;;  %v9276_v51 = vld [vmem:[#allocation24_spill] sm:$0xff] }
 0x446   : > { %v4567_v48 = vadd.f32 %v4393_v31, %v8206_v63  ;;  %v4568_v3 = vadd.f32 %v4393_v31, %v3980_v52  ;;  %v4218_v18 = vpop.permute.xlu1 %4217  ;;  %v3914_v63 = vmul.f32 %v5251_v10, %v9261_v62  ;;  %v3926_v47 = vmul.f32 %v5254_v39, %v9267_v25  ;;  %v5255_v31 = vld [vmem:[%s5740_s21 + $0x388] sm:$0xff] }
 0x447   : > { %v4497_v24 = vadd.f32 %v4218_v18, %v3909_v53  ;;  %v4498_v44 = vadd.f32 %v4218_v18, %v3910_v35  ;;  %v9268_v53 = vld [vmem:[#allocation31_spill] sm:$0xff] }
 0x448   : > { %4735 = vst [vmem:[%s5740_s21 + $0x510] sm:$0xff] %v4567_v48  ;;  %4736 = vst.msk [vmem:[%s5740_s21 + $0x518] sm:$0xff] %vm1297_vm1, %v4568_v3  ;;  %v3929_v35 = vmul.f32 %v9269_v54, %v9268_v53  ;;  %v3930_v48 = vmul.f32 %v5255_v31, %v9269_v54  ;;  %v5259_v61 = vld [vmem:[%s5740_s21 + $0x408] sm:$0xff] }
 0x449   : > { %4665 = vst [vmem:[%s5740_s21 + $0x2e0] sm:$0xff] %v4497_v24  ;;  %4666 = vst.msk [vmem:[%s5740_s21 + $0x2e8] sm:$0xff] %vm1297_vm1, %v4498_v44  ;;  %v4403_v9 = vpop.permute.xlu0 %4402  ;;  %v9270_v44 = vld [vmem:[#allocation35_spill] sm:$0xff] }
 0x44a   : > { %v4571_v1 = vadd.f32 %v4403_v9, %v8237_v58  ;;  %v4572_v57 = vadd.f32 %v4403_v9, %v3984_v50  ;;  %v4228_v7 = vpop.permute.xlu1 %4227  ;;  %v3933_v37 = vmul.f32 %v8029_v29, %v9270_v44  ;;  %v5256_v50 = vld [vmem:[%s5740_s21 + $0x3a8] sm:$0xff] }
 0x44b   : > { %v4501_v2 = vadd.f32 %v4228_v7, %v3913_v55  ;;  %v4502_v23 = vadd.f32 %v4228_v7, %v3914_v63  ;;  %v3934_v30 = vmul.f32 %v5256_v50, %v8029_v29  ;;  %v9271_v63 = vld [vmem:[#allocation39_spill] sm:$0xff] }
 0x44c   : > { %4739 = vst [vmem:[%s5740_s21 + $0x530] sm:$0xff] %v4571_v1  ;;  %4740 = vst.msk [vmem:[%s5740_s21 + $0x538] sm:$0xff] %vm1297_vm1, %v4572_v57  ;;  %v3937_v9 = vmul.f32 %v8063_v19, %v9271_v63  ;;  %v5257_v1 = vld [vmem:[%s5740_s21 + $0x3c8] sm:$0xff] }
 0x44d   : > { %4669 = vst [vmem:[%s5740_s21 + $0x300] sm:$0xff] %v4501_v2  ;;  %4670 = vst.msk [vmem:[%s5740_s21 + $0x308] sm:$0xff] %vm1297_vm1, %v4502_v23  ;;  %v3938_v57 = vmul.f32 %v5257_v1, %v8063_v19  ;;  %v9272_v23 = vld [vmem:[#allocation43_spill] sm:$0xff] }
 0x44e   : > { %v4238_v58 = vpop.permute.xlu1 %4237  ;;  %v3941_v11 = vmul.f32 %v8101_v42, %v9272_v23  ;;  %v5261_v39 = vld [vmem:[%s5740_s21 + $0x448] sm:$0xff] }
 0x44f   : > { %v4505_v43 = vadd.f32 %v4238_v58, %v3917_v56  ;;  %v4506_v38 = vadd.f32 %v4238_v58, %v3918_v5  ;;  %v3942_v56 = vmul.f32 %v5258_v6, %v8101_v42  ;;  %v9273_v58 = vld [vmem:[#allocation47_spill] sm:$0xff] }
 0x450   : > { %v5262_v54 = vld [vmem:[%s5740_s21 + $0x468] sm:$0xff] }
 0x451   : > { %4673 = vst [vmem:[%s5740_s21 + $0x320] sm:$0xff] %v4505_v43  ;;  %4674 = vst.msk [vmem:[%s5740_s21 + $0x328] sm:$0xff] %vm1297_vm1, %v4506_v38  ;;  %v9274_v43 = vld [vmem:[#allocation4_spill] sm:$0xff]  ;;  %v5266_v63 = vld [vmem:[%s5740_s21 + $0x4e8] sm:$0xff] }
 0x452   : > { %v4248_v41 = vpop.permute.xlu1 %4247  ;;  %v3945_v38 = vmul.f32 %v9274_v43, %v9273_v58  ;;  %v3946_v34 = vmul.f32 %v5259_v61, %v9274_v43 }
 0x453   : > { %v4509_v33 = vadd.f32 %v4248_v41, %v3921_v28  ;;  %v4510_v27 = vadd.f32 %v4248_v41, %v3922_v22  ;;  %v5260_v22 = vld [vmem:[%s5740_s21 + $0x428] sm:$0xff]  ;;  %v9275_v41 = vld [vmem:[#allocation2_spill] sm:$0xff] }
 0x455   : > { %4677 = vst [vmem:[%s5740_s21 + $0x340] sm:$0xff] %v4509_v33  ;;  %4678 = vst.msk [vmem:[%s5740_s21 + $0x348] sm:$0xff] %vm1297_vm1, %v4510_v27  ;;  %v3950_v33 = vmul.f32 %v5260_v22, %v9275_v41 }
 0x456   : > { %v4258_v52 = vpop.permute.xlu1 %4257 }
 0x457   : > { %v4513_v13 = vadd.f32 %v4258_v52, %v3925_v4  ;;  %v4514_v0 = vadd.f32 %v4258_v52, %v3926_v47  ;;  %v3954_v47 = vmul.f32 %v5261_v39, %v8191_v14 }
 0x459   : > { %4681 = vst [vmem:[%s5740_s21 + $0x360] sm:$0xff] %v4513_v13  ;;  %4682 = vst.msk [vmem:[%s5740_s21 + $0x368] sm:$0xff] %vm1297_vm1, %v4514_v0  ;;  %v9277_v13 = vld [vmem:[#allocation155_spill] sm:$0xff] }
 0x45a   : > { %v4268_v3 = vpop.permute.xlu1 %4267 }
 0x45b   : > { %v4517_v18 = vadd.f32 %v4268_v3, %v3929_v35  ;;  %v4518_v24 = vadd.f32 %v4268_v3, %v3930_v48  ;;  %v3958_v35 = vmul.f32 %v5262_v54, %v8222_v40  ;;  %v5263_v3 = vld [vmem:[%s5740_s21 + $0x488] sm:$0xff] }
 0x45d   : > { %4685 = vst [vmem:[%s5740_s21 + $0x380] sm:$0xff] %v4517_v18  ;;  %4686 = vst.msk [vmem:[%s5740_s21 + $0x388] sm:$0xff] %vm1297_vm1, %v4518_v24  ;;  %v3962_v18 = vmul.f32 %v5263_v3, %v8257_v49 }
 0x45e   : > { %v4278_v62 = vpop.permute.xlu1 %4277 }
 0x45f   : > { %v4521_v55 = vadd.f32 %v4278_v62, %v3933_v37  ;;  %v4522_v10 = vadd.f32 %v4278_v62, %v3934_v30  ;;  %v5264_v37 = vld [vmem:[%s5740_s21 + $0x4a8] sm:$0xff] }
 0x460   : > { %v3966_v50 = vmul.f32 %v5264_v37, %v8298_v36  ;;  %v5265_v62 = vld [vmem:[%s5740_s21 + $0x4c8] sm:$0xff] }
 0x461   : > { %4689 = vst [vmem:[%s5740_s21 + $0x3a0] sm:$0xff] %v4521_v55  ;;  %4690 = vst.msk [vmem:[%s5740_s21 + $0x3a8] sm:$0xff] %vm1297_vm1, %v4522_v10  ;;  %v3970_v55 = vmul.f32 %v5265_v62, %v8333_v20 }
 0x462   : > { %v4288_v29 = vpop.permute.xlu1 %4287 }
 0x463   : > { %v4525_v7 = vadd.f32 %v4288_v29, %v3937_v9  ;;  %v4526_v2 = vadd.f32 %v4288_v29, %v3938_v57  ;;  %v3974_v9 = vmul.f32 %v5266_v63, %v8365_v15  ;;  %v5267_v57 = vld [vmem:[%s5740_s21 + $0x508] sm:$0xff] }
 0x464   : > { %v3978_v29 = vmul.f32 %v5267_v57, %v8396_v8 }
 0x465   : > { %4693 = vst [vmem:[%s5740_s21 + $0x3c0] sm:$0xff] %v4525_v7  ;;  %4694 = vst.msk [vmem:[%s5740_s21 + $0x3c8] sm:$0xff] %vm1297_vm1, %v4526_v2  ;;  %v5268_v2 = vld [vmem:[%s5740_s21 + $0x528] sm:$0xff] }
 0x466   : > { %v4298_v19 = vpop.permute.xlu1 %4297  ;;  %v3982_v23 = vmul.f32 %v5268_v2, %v8425_v12 }
 0x467   : > { %v4529_v21 = vadd.f32 %v4298_v19, %v3941_v11  ;;  %v4530_v5 = vadd.f32 %v4298_v19, %v3942_v56 }
 0x469   : > { %4697 = vst [vmem:[%s5740_s21 + $0x3e0] sm:$0xff] %v4529_v21  ;;  %4698 = vst.msk [vmem:[%s5740_s21 + $0x3e8] sm:$0xff] %vm1297_vm1, %v4530_v5 }
 0x46a   : > { %v4308_v42 = vpop.permute.xlu1 %4307 }
 0x46b   : > { %v4533_v28 = vadd.f32 %v4308_v42, %v3945_v38  ;;  %v4534_v32 = vadd.f32 %v4308_v42, %v3946_v34 }
 0x46d   : > { %4701 = vst [vmem:[%s5740_s21 + $0x400] sm:$0xff] %v4533_v28  ;;  %4702 = vst.msk [vmem:[%s5740_s21 + $0x408] sm:$0xff] %vm1297_vm1, %v4534_v32 }
 0x46e   : > { %v4318_v27 = vpop.permute.xlu1 %4317 }
 0x46f   : > { %v4537_v25 = vadd.f32 %v4318_v27, %v9276_v51  ;;  %v4538_v4 = vadd.f32 %v4318_v27, %v3950_v33 }
 0x471   : > { %4705 = vst [vmem:[%s5740_s21 + $0x420] sm:$0xff] %v4537_v25  ;;  %4706 = vst.msk [vmem:[%s5740_s21 + $0x428] sm:$0xff] %vm1297_vm1, %v4538_v4 }
 0x472   : > { %v4328_v52 = vpop.permute.xlu1 %4327 }
 0x473   : > { %v4541_v0 = vadd.f32 %v4328_v52, %v9277_v13  ;;  %v4542_v53 = vadd.f32 %v4328_v52, %v3954_v47 }
 0x475   : > { %4709 = vst [vmem:[%s5740_s21 + $0x440] sm:$0xff] %v4541_v0  ;;  %4710 = vst.msk [vmem:[%s5740_s21 + $0x448] sm:$0xff] %vm1297_vm1, %v4542_v53 }
 0x476   : > { %v4338_v31 = vpop.permute.xlu1 %4337 }
 0x477   : > { %v4545_v14 = vadd.f32 %v4338_v31, %v8226_v59  ;;  %v4546_v48 = vadd.f32 %v4338_v31, %v3958_v35 }
 0x479   : > { %4713 = vst [vmem:[%s5740_s21 + $0x460] sm:$0xff] %v4545_v14  ;;  %4714 = vst.msk [vmem:[%s5740_s21 + $0x468] sm:$0xff] %vm1297_vm1, %v4546_v48 }
 0x47a   : > { %v4348_v24 = vpop.permute.xlu1 %4347 }
 0x47b   : > { %v4549_v40 = vadd.f32 %v4348_v24, %v8261_v46  ;;  %v4550_v44 = vadd.f32 %v4348_v24, %v3962_v18 }
 0x47d   : > { %4717 = vst [vmem:[%s5740_s21 + $0x480] sm:$0xff] %v4549_v40  ;;  %4718 = vst.msk [vmem:[%s5740_s21 + $0x488] sm:$0xff] %vm1297_vm1, %v4550_v44 }
 0x47e   : > { %v4358_v59 = vpop.permute.xlu1 %4357 }
 0x47f   : > { %v4553_v49 = vadd.f32 %v4358_v59, %v8302_v17  ;;  %v4554_v30 = vadd.f32 %v4358_v59, %v3966_v50 }
 0x481   : > { %4721 = vst [vmem:[%s5740_s21 + $0x4a0] sm:$0xff] %v4553_v49  ;;  %4722 = vst.msk [vmem:[%s5740_s21 + $0x4a8] sm:$0xff] %vm1297_vm1, %v4554_v30 }
 0x482   : > { %v4368_v46 = vpop.permute.xlu1 %4367 }
 0x483   : > { %v4557_v36 = vadd.f32 %v4368_v46, %v8337_v26  ;;  %v4558_v10 = vadd.f32 %v4368_v46, %v3970_v55 }
 0x485   : > { %4725 = vst [vmem:[%s5740_s21 + $0x4c0] sm:$0xff] %v4557_v36  ;;  %4726 = vst.msk [vmem:[%s5740_s21 + $0x4c8] sm:$0xff] %vm1297_vm1, %v4558_v10 }
 0x486   : > { %v4378_v17 = vpop.permute.xlu1 %4377 }
 0x487   : > { %v4561_v20 = vadd.f32 %v4378_v17, %v8369_v45  ;;  %v4562_v1 = vadd.f32 %v4378_v17, %v3974_v9 }
 0x489   : > { %4729 = vst [vmem:[%s5740_s21 + $0x4e0] sm:$0xff] %v4561_v20  ;;  %4730 = vst.msk [vmem:[%s5740_s21 + $0x4e8] sm:$0xff] %vm1297_vm1, %v4562_v1 }
 0x48a   : > { %v4388_v26 = vpop.permute.xlu1 %4387 }
 0x48b   : > { %v4565_v7 = vadd.f32 %v4388_v26, %v8400_v16  ;;  %v4566_v15 = vadd.f32 %v4388_v26, %v3978_v29 }
 0x48d   : > { %4733 = vst [vmem:[%s5740_s21 + $0x500] sm:$0xff] %v4565_v7  ;;  %4734 = vst.msk [vmem:[%s5740_s21 + $0x508] sm:$0xff] %vm1297_vm1, %v4566_v15 }
 0x48e   : > { %v4398_v45 = vpop.permute.xlu1 %4397 }
 0x48f   : > { %v4569_v11 = vadd.f32 %v4398_v45, %v8429_v60  ;;  %v4570_v6 = vadd.f32 %v4398_v45, %v3982_v23 }
 0x491   : > { %4737 = vst [vmem:[%s5740_s21 + $0x520] sm:$0xff] %v4569_v11  ;;  %4738 = vst.msk [vmem:[%s5740_s21 + $0x528] sm:$0xff] %vm1297_vm1, %v4570_v6 }
 0x492 PF: > { %s14_s15 = sadd.s32 1, %s5275_s15  }
 0x493   : > { %p11_p4 = scmp.ge.s32.totalorder %s14_s15, 4  }
 0x495   :  { %13 = sbr.rel (!%p11_p4) target bundleno = 1 (0x1), region = 72 }

</bundles_post_ra>
